<compile_context>
chip_gen: v6e
topology: v6e:2x2x1
jax: 0.10.0
libtpu: 0.0.40
codegen_flags: <defaults>
</compile_context>

<pallas_src>
import functools

import jax
import jax.numpy as jnp
from jax.experimental import pallas as pl
from jax.experimental.pallas import tpu as pltpu


# ----------------------------- Pallas kernel -----------------------------

def _conv_bn_body(x_ref, w_ref, g_ref, b_ref, mask_ref, r_ref, o_ref,
                  *, taps, stride, ww, mp, m_true, eps, relu):
    """Fused conv (tap-matmul accumulation) + BN(train stats) [+ residual] [+ ReLU].

    x_ref   : (P, R, Cin) f32  -- phase-split, spatially padded, row-flattened input
    w_ref   : (T, Cin, tn) bf16-- per-tap weight slabs (zero-padded output channels)
    g_ref   : (1, tn) f32      -- BN gamma (zero in padded columns)
    b_ref   : (1, tn) f32      -- BN beta
    mask_ref: (mp, 1) f32|None -- 1.0 on rows that are real output positions
    r_ref   : (mp, tn) bf16|None -- residual, same padded-row layout as the output
    o_ref   : (mp, tn)         -- bf16 (intermediate) or f32 (block output)
    """
    acc = None
    for t, (di, dj) in enumerate(taps):
        p = (di % stride) * stride + (dj % stride)      # phase holding this tap
        off = (di // stride) * ww + (dj // stride)      # static row offset inside the phase
        a = x_ref[p, pl.ds(off, mp), :].astype(jnp.bfloat16)   # (mp, Cin) window, bf16 for MXU
        d = jnp.dot(a, w_ref[t], preferred_element_type=jnp.float32)
        acc = d if acc is None else acc + d

    # Training-mode BatchNorm over the m_true valid rows (biased variance), all in f32.
    inv_m = 1.0 / m_true
    if mask_ref is not None:
        mask = mask_ref[...]
        mean = jnp.sum(acc * mask, axis=0, keepdims=True) * inv_m
        centered = (acc - mean) * mask
    else:                                               # padded grid == real grid
        mean = jnp.sum(acc, axis=0, keepdims=True) * inv_m
        centered = acc - mean
    var = jnp.sum(centered * centered, axis=0, keepdims=True) * inv_m
    scale = g_ref[...] * jax.lax.rsqrt(var + eps)
    out = centered * scale + b_ref[...]
    if r_ref is not None:
        out = out + r_ref[...].astype(jnp.float32)      # residual added in f32
    if relu:
        out = jnp.maximum(out, 0.0)
    o_ref[...] = out.astype(o_ref.dtype)


def _k_plain(x, w, g, b, o, **kw):
    _conv_bn_body(x, w, g, b, None, None, o, **kw)


def _k_mask(x, w, g, b, m, o, **kw):
    _conv_bn_body(x, w, g, b, m, None, o, **kw)


def _k_res(x, w, g, b, r, o, **kw):
    _conv_bn_body(x, w, g, b, None, r, o, **kw)


def _k_mask_res(x, w, g, b, m, r, o, **kw):
    _conv_bn_body(x, w, g, b, m, r, o, **kw)


_KERNELS = {(False, False): _k_plain, (True, False): _k_mask,
            (False, True): _k_res, (True, True): _k_mask_res}


# ----------------------------- Pallas wrapper -----------------------------

def _round_up(x, m):
    return ((x + m - 1) // m) * m


def conv_bn_act(flat, w_p, g_p, b_p, *, geom, relu, eps=1e-5, mask=None, res=None,
                out_dtype=jnp.bfloat16):
    """Fused conv+BN(+res)(+ReLU); output (mp, npd) on the padded row grid of `geom`."""
    P, R, cin = flat.shape
    T, cin2, npd = w_p.shape
    assert cin == cin2 and T == len(geom['taps']) and geom['m_true'] > 0
    mp = geom['mp']

    # Output-channel tile: >=2 "parallel" blocks for wide stages (v7x megacore); the whole
    # (small) input + full-M accumulator stay resident either way, so BN stats are one-pass.
    tn = 256 if npd >= 512 else min(npd, 128)
    grid = (npd // tn,)

    in_specs = [
        pl.BlockSpec((P, R, cin), lambda j: (0, 0, 0)),   # phase-flat input, fully resident
        pl.BlockSpec((T, cin, tn), lambda j: (0, 0, j)),  # per-tap weights
        pl.BlockSpec((1, tn), lambda j: (0, j)),          # BN gamma
        pl.BlockSpec((1, tn), lambda j: (0, j)),          # BN beta
    ]
    args = [flat, w_p, g_p, b_p]
    if mask is not None:
        in_specs.append(pl.BlockSpec((mp, 1), lambda j: (0, 0)))      # valid-row mask
        args.append(mask)
    if res is not None:
        in_specs.append(pl.BlockSpec((mp, tn), lambda j: (0, j)))     # bf16 residual
        args.append(res)

    kernel = functools.partial(
        _KERNELS[(mask is not None, res is not None)],
        taps=tuple(geom['taps']), stride=geom['stride'], ww=geom['ww'],
        mp=mp, m_true=geom['m_true'], eps=eps, relu=relu)

    return pl.pallas_call(
        kernel,
        out_shape=jax.ShapeDtypeStruct((mp, npd), out_dtype),
        grid_spec=pltpu.PrefetchScalarGridSpec(
            num_scalar_prefetch=0,
            grid=grid,
            in_specs=in_specs,
            out_specs=pl.BlockSpec((mp, tn), lambda j: (0, j)),
        ),
        compiler_params=pltpu.CompilerParams(
            dimension_semantics=("parallel",)),
    )(*args)


# ----------------------------- JAX glue -----------------------------

def _prep_conv_input(x, kh, kw, stride, pad):
    """NHWC activation -> (flat (s*s, R, C) f32, mask (mp,1) f32 | None, geometry dict).

    Tap (di, dj) of the kh x kw / stride-s conv is the contiguous row window
        flat[(di%s)*s + (dj%s), off : off + mp, :],  off = (di//s)*Ww + (dj//s),
    in the (n, h, w)-row-major padded output grid of shape (N, Hh, Ww).  Rows with h >= Ho or
    w >= Wo (and the zero rows appended for alignment) are not real outputs: they are excluded
    from the BN statistics via `mask` and dropped when reshaping back to NHWC.
    """
    N, H, W, C = x.shape
    s = stride
    Ho = (H + 2 * pad - kh) // s + 1
    Wo = (W + 2 * pad - kw) // s + 1
    xp = jnp.pad(x.astype(jnp.float32), ((0, 0), (pad, pad), (pad, pad), (0, 0)))
    Hp, Wp = H + 2 * pad, W + 2 * pad
    Hq, Wq = _round_up(Hp, s), _round_up(Wp, s)
    if (Hq, Wq) != (Hp, Wp):
        xp = jnp.pad(xp, ((0, 0), (0, Hq - Hp), (0, Wq - Wp), (0, 0)))
    Hh, Ww = Hq // s, Wq // s
    # space-to-depth phase split (s == 1 -> single phase, a no-op)
    phases = jnp.stack([xp[:, a::s, b::s, :] for a in range(s) for b in range(s)], axis=0)
    rows = N * Hh * Ww
    m_true = N * Ho * Wo
    mp = _round_up(rows, 16)
    max_off = ((kh - 1) // s) * Ww + (kw - 1) // s
    R = mp + max_off                                  # extra zero rows so every window fits
    flat = jnp.pad(phases.reshape(s * s, rows, C), ((0, 0), (0, R - rows), (0, 0)))
    if rows == m_true and mp == rows:
        mask = None
    else:
        valid = jnp.zeros((N, Hh, Ww), jnp.float32).at[:, :Ho, :Wo].set(1.0)
        mask = jnp.pad(valid.reshape(rows), (0, mp - rows)).reshape(mp, 1)
    taps = tuple((di, dj) for di in range(kh) for dj in range(kw))
    geom = dict(stride=s, hh=Hh, ww=Ww, Ho=Ho, Wo=Wo, mp=mp, m_true=m_true,
                rows=rows, taps=taps)
    return flat, mask, geom


def basic_block_forward(params, x_nhwc, *, inplanes, planes, stride, eps=1e-5):
    N, H, W, C = x_nhwc.shape
    assert C == inplanes
    c1, c2 = params['conv1'], params['conv2']
    npd = c1['w'].shape[2]

    # conv1 (3x3, stride, pad 1) -> bn1 -> relu                        [fused kernel, bf16 out]
    f1, m1, g1 = _prep_conv_input(x_nhwc, 3, 3, stride, 1)
    y1 = conv_bn_act(f1, c1['w'], c1['g'], c1['b'], geom=g1, relu=True, eps=eps,
                     mask=m1, out_dtype=jnp.bfloat16)
    Ho, Wo = g1['Ho'], g1['Wo']
    out1 = y1[:g1['rows']].reshape(N, g1['hh'], g1['ww'], npd)[:, :Ho, :Wo, :planes]

    # identity branch: fused 1x1(stride)+BN downsample (bf16 out) or plain x kept as bf16
    if 'down' in params:
        dn = params['down']
        fd, md, gd = _prep_conv_input(x_nhwc[:, ::stride, ::stride, :], 1, 1, 1, 0)
        yd = conv_bn_act(fd, dn['w'], dn['g'], dn['b'], geom=gd, relu=False, eps=eps,
                         mask=md, out_dtype=jnp.bfloat16)
        identity = yd[:gd['m_true']].reshape(N, Ho, Wo, npd)
    else:
        identity = x_nhwc.astype(jnp.bfloat16)          # stride==1, inplanes==planes

    # conv2 (3x3, stride 1, pad 1) -> bn2 -> +identity -> relu         [fused kernel, f32 out]
    f2, m2, g2 = _prep_conv_input(out1, 3, 3, 1, 1)
    # lay the residual out on conv2's padded output grid (bf16; padded rows/cols are unused)
    res = jnp.pad(identity,
                  ((0, 0), (0, g2['hh'] - Ho), (0, g2['ww'] - Wo),
                   (0, npd - identity.shape[-1])))
    res = jnp.pad(res.reshape(g2['rows'], npd), ((0, g2['mp'] - g2['rows']), (0, 0)))
    y2 = conv_bn_act(f2, c2['w'], c2['g'], c2['b'], geom=g2, relu=True, eps=eps,
                     mask=m2, res=res, out_dtype=jnp.float32)
    return y2[:g2['rows']].reshape(N, g2['hh'], g2['ww'], npd)[:, :Ho, :Wo, :planes]


# ----------------------------- parameters -----------------------------

def _kaiming_fan_out(key, shape):
    # shape = (kh, kw, cin, cout); fan_out = kh*kw*cout (torch mode='fan_out')
    fan_out = shape[0] * shape[1] * shape[3]
    std = (2.0 / fan_out) ** 0.5
    return std * jax.random.normal(key, shape, jnp.float32)


def _prep_conv(key, kh, kw, cin, cout):
    """Conv + BN params, prepared ONCE outside jit.

    Invariants the fused kernel relies on: weight/gamma columns >= cout are zero-padded
    (so padded output channels are exactly 0 and sliced off), and BN gamma=1, beta=0.
    """
    w = _kaiming_fan_out(key, (kh, kw, cin, cout))
    npd = _round_up(cout, 128)
    w_p = jnp.zeros((kh * kw, cin, npd), jnp.bfloat16)
    w_p = w_p.at[:, :, :cout].set(w.reshape(kh * kw, cin, cout).astype(jnp.bfloat16))
    g_p = jnp.zeros((1, npd), jnp.float32).at[:, :cout].set(1.0)   # BN gamma (pad cols = 0)
    b_p = jnp.zeros((1, npd), jnp.float32)                         # BN beta
    return {'w': w_p, 'g': g_p, 'b': b_p}


def init_basic_block(key, inplanes, planes, stride):
    k1, k2, k3 = jax.random.split(key, 3)
    params = {'conv1': _prep_conv(k1, 3, 3, inplanes, planes),
              'conv2': _prep_conv(k2, 3, 3, planes, planes)}
    if stride != 1 or inplanes != planes:       # torchvision downsample = conv1x1(stride) + BN
        params['down'] = _prep_conv(k3, 1, 1, inplanes, planes)
    return params


# ----------------------------- main -----------------------------

if __name__ == "__main__":
    key = jax.random.PRNGKey(0)
    pkey, xkey = jax.random.split(key)

    # BasicBlock(inplanes=64, planes=128, stride=2, downsample=conv1x1+BN)
    inplanes, planes, stride = 64, 128, 2
    params = init_basic_block(pkey, inplanes, planes, stride)

    # Reference module is NCHW (2, 64, 16, 16) -> NHWC for our kernels.
    x_nchw = jax.random.normal(xkey, (2, inplanes, 16, 16), jnp.float32)
    x_nhwc = jnp.transpose(x_nchw, (0, 2, 3, 1))

    fwd = jax.jit(functools.partial(basic_block_forward,
                                    inplanes=inplanes, planes=planes, stride=stride))
    out = jax.block_until_ready(fwd(params, x_nhwc))

    assert out.shape == (2, 8, 8, planes), out.shape
    assert bool(jnp.all(jnp.isfinite(out)))
    assert bool(jnp.all(out >= 0.0))            # final ReLU
    print("KERNEL_OK")
</pallas_src>

<mosaic_0001>
module attributes {stable_mosaic.version = 11 : i64} {
  func.func @_k_mask(%arg0: i32, %arg1: memref<4x186x64xf32, #tpu.memory_space<vmem>>, %arg2: memref<9x64x128xbf16, #tpu.memory_space<vmem>>, %arg3: memref<1x128xf32, #tpu.memory_space<vmem>>, %arg4: memref<1x128xf32, #tpu.memory_space<vmem>>, %arg5: memref<176x1xf32, #tpu.memory_space<vmem>>, %arg6: memref<176x128xbf16, #tpu.memory_space<vmem>>) attributes {dimension_semantics = [#tpu.dimension_semantics<parallel>], iteration_bounds = array<i64: 1>, scalar_prefetch = 0 : i64, scratch_operands = 0 : i64, tpu.core_type = #tpu.core_type<tc>, window_params = [{pipeline_mode = #tpu.pipeline_mode<synchronous>, transform_indices = @transform_0, window_bounds = array<i64: 4, 186, 64>}, {transform_indices = @transform_1, window_bounds = array<i64: 9, 64, 128>}, {transform_indices = @transform_2, window_bounds = array<i64: 1, 128>}, {transform_indices = @transform_3, window_bounds = array<i64: 1, 128>}, {pipeline_mode = #tpu.pipeline_mode<synchronous>, transform_indices = @transform_4, window_bounds = array<i64: 176, 1>}, {transform_indices = @transform_5, window_bounds = array<i64: 176, 128>}]} {
    %c0 = arith.constant 0 : index
    %c0_0 = arith.constant 0 : index
    %c0_1 = arith.constant 0 : index
    %0 = vector.load %arg1[%c0, %c0_0, %c0_1] : memref<4x186x64xf32, #tpu.memory_space<vmem>>, vector<1x176x64xf32>
    %1 = vector.shape_cast %0 : vector<1x176x64xf32> to vector<176x64xf32>
    %2 = arith.truncf %1 : vector<176x64xf32> to vector<176x64xbf16>
    %c0_2 = arith.constant 0 : index
    %c0_3 = arith.constant 0 : index
    %c0_4 = arith.constant 0 : index
    %3 = vector.load %arg2[%c0_2, %c0_3, %c0_4] : memref<9x64x128xbf16, #tpu.memory_space<vmem>>, vector<1x64x128xbf16>
    %4 = vector.shape_cast %3 : vector<1x64x128xbf16> to vector<64x128xbf16>
    %cst = arith.constant dense<0.000000e+00> : vector<176x128xf32>
    %5 = tpu.matmul %2, %4, %cst {dimension_numbers = #tpu.dot_dimension_numbers<[1], [0], [0], [1], [0, 0, 1, 1], [], []>} : vector<176x64xbf16>, vector<64x128xbf16>, vector<176x128xf32> -> vector<176x128xf32>
    %c1 = arith.constant 1 : index
    %c0_5 = arith.constant 0 : index
    %c0_6 = arith.constant 0 : index
    %6 = vector.load %arg1[%c1, %c0_5, %c0_6] : memref<4x186x64xf32, #tpu.memory_space<vmem>>, vector<1x176x64xf32>
    %7 = vector.shape_cast %6 : vector<1x176x64xf32> to vector<176x64xf32>
    %8 = arith.truncf %7 : vector<176x64xf32> to vector<176x64xbf16>
    %c1_7 = arith.constant 1 : index
    %c0_8 = arith.constant 0 : index
    %c0_9 = arith.constant 0 : index
    %9 = vector.load %arg2[%c1_7, %c0_8, %c0_9] : memref<9x64x128xbf16, #tpu.memory_space<vmem>>, vector<1x64x128xbf16>
    %10 = vector.shape_cast %9 : vector<1x64x128xbf16> to vector<64x128xbf16>
    %cst_10 = arith.constant dense<0.000000e+00> : vector<176x128xf32>
    %11 = tpu.matmul %8, %10, %cst_10 {dimension_numbers = #tpu.dot_dimension_numbers<[1], [0], [0], [1], [0, 0, 1, 1], [], []>} : vector<176x64xbf16>, vector<64x128xbf16>, vector<176x128xf32> -> vector<176x128xf32>
    %12 = arith.addf %5, %11 : vector<176x128xf32>
    %c0_11 = arith.constant 0 : index
    %c1_12 = arith.constant 1 : index
    %c0_13 = arith.constant 0 : index
    %13 = vector.load %arg1[%c0_11, %c1_12, %c0_13] : memref<4x186x64xf32, #tpu.memory_space<vmem>>, vector<1x176x64xf32>
    %14 = vector.shape_cast %13 : vector<1x176x64xf32> to vector<176x64xf32>
    %15 = arith.truncf %14 : vector<176x64xf32> to vector<176x64xbf16>
    %c2 = arith.constant 2 : index
    %c0_14 = arith.constant 0 : index
    %c0_15 = arith.constant 0 : index
    %16 = vector.load %arg2[%c2, %c0_14, %c0_15] : memref<9x64x128xbf16, #tpu.memory_space<vmem>>, vector<1x64x128xbf16>
    %17 = vector.shape_cast %16 : vector<1x64x128xbf16> to vector<64x128xbf16>
    %cst_16 = arith.constant dense<0.000000e+00> : vector<176x128xf32>
    %18 = tpu.matmul %15, %17, %cst_16 {dimension_numbers = #tpu.dot_dimension_numbers<[1], [0], [0], [1], [0, 0, 1, 1], [], []>} : vector<176x64xbf16>, vector<64x128xbf16>, vector<176x128xf32> -> vector<176x128xf32>
    %19 = arith.addf %12, %18 : vector<176x128xf32>
    %c2_17 = arith.constant 2 : index
    %c0_18 = arith.constant 0 : index
    %c0_19 = arith.constant 0 : index
    %20 = vector.load %arg1[%c2_17, %c0_18, %c0_19] : memref<4x186x64xf32, #tpu.memory_space<vmem>>, vector<1x176x64xf32>
    %21 = vector.shape_cast %20 : vector<1x176x64xf32> to vector<176x64xf32>
    %22 = arith.truncf %21 : vector<176x64xf32> to vector<176x64xbf16>
    %c3 = arith.constant 3 : index
    %c0_20 = arith.constant 0 : index
    %c0_21 = arith.constant 0 : index
    %23 = vector.load %arg2[%c3, %c0_20, %c0_21] : memref<9x64x128xbf16, #tpu.memory_space<vmem>>, vector<1x64x128xbf16>
    %24 = vector.shape_cast %23 : vector<1x64x128xbf16> to vector<64x128xbf16>
    %cst_22 = arith.constant dense<0.000000e+00> : vector<176x128xf32>
    %25 = tpu.matmul %22, %24, %cst_22 {dimension_numbers = #tpu.dot_dimension_numbers<[1], [0], [0], [1], [0, 0, 1, 1], [], []>} : vector<176x64xbf16>, vector<64x128xbf16>, vector<176x128xf32> -> vector<176x128xf32>
    %26 = arith.addf %19, %25 : vector<176x128xf32>
    %c3_23 = arith.constant 3 : index
    %c0_24 = arith.constant 0 : index
    %c0_25 = arith.constant 0 : index
    %27 = vector.load %arg1[%c3_23, %c0_24, %c0_25] : memref<4x186x64xf32, #tpu.memory_space<vmem>>, vector<1x176x64xf32>
    %28 = vector.shape_cast %27 : vector<1x176x64xf32> to vector<176x64xf32>
    %29 = arith.truncf %28 : vector<176x64xf32> to vector<176x64xbf16>
    %c4 = arith.constant 4 : index
    %c0_26 = arith.constant 0 : index
    %c0_27 = arith.constant 0 : index
    %30 = vector.load %arg2[%c4, %c0_26, %c0_27] : memref<9x64x128xbf16, #tpu.memory_space<vmem>>, vector<1x64x128xbf16>
    %31 = vector.shape_cast %30 : vector<1x64x128xbf16> to vector<64x128xbf16>
    %cst_28 = arith.constant dense<0.000000e+00> : vector<176x128xf32>
    %32 = tpu.matmul %29, %31, %cst_28 {dimension_numbers = #tpu.dot_dimension_numbers<[1], [0], [0], [1], [0, 0, 1, 1], [], []>} : vector<176x64xbf16>, vector<64x128xbf16>, vector<176x128xf32> -> vector<176x128xf32>
    %33 = arith.addf %26, %32 : vector<176x128xf32>
    %c2_29 = arith.constant 2 : index
    %c1_30 = arith.constant 1 : index
    %c0_31 = arith.constant 0 : index
    %34 = vector.load %arg1[%c2_29, %c1_30, %c0_31] : memref<4x186x64xf32, #tpu.memory_space<vmem>>, vector<1x176x64xf32>
    %35 = vector.shape_cast %34 : vector<1x176x64xf32> to vector<176x64xf32>
    %36 = arith.truncf %35 : vector<176x64xf32> to vector<176x64xbf16>
    %c5 = arith.constant 5 : index
    %c0_32 = arith.constant 0 : index
    %c0_33 = arith.constant 0 : index
    %37 = vector.load %arg2[%c5, %c0_32, %c0_33] : memref<9x64x128xbf16, #tpu.memory_space<vmem>>, vector<1x64x128xbf16>
    %38 = vector.shape_cast %37 : vector<1x64x128xbf16> to vector<64x128xbf16>
    %cst_34 = arith.constant dense<0.000000e+00> : vector<176x128xf32>
    %39 = tpu.matmul %36, %38, %cst_34 {dimension_numbers = #tpu.dot_dimension_numbers<[1], [0], [0], [1], [0, 0, 1, 1], [], []>} : vector<176x64xbf16>, vector<64x128xbf16>, vector<176x128xf32> -> vector<176x128xf32>
    %40 = arith.addf %33, %39 : vector<176x128xf32>
    %c0_35 = arith.constant 0 : index
    %c9 = arith.constant 9 : index
    %c0_36 = arith.constant 0 : index
    %41 = vector.load %arg1[%c0_35, %c9, %c0_36] : memref<4x186x64xf32, #tpu.memory_space<vmem>>, vector<1x176x64xf32>
    %42 = vector.shape_cast %41 : vector<1x176x64xf32> to vector<176x64xf32>
    %43 = arith.truncf %42 : vector<176x64xf32> to vector<176x64xbf16>
    %c6 = arith.constant 6 : index
    %c0_37 = arith.constant 0 : index
    %c0_38 = arith.constant 0 : index
    %44 = vector.load %arg2[%c6, %c0_37, %c0_38] : memref<9x64x128xbf16, #tpu.memory_space<vmem>>, vector<1x64x128xbf16>
    %45 = vector.shape_cast %44 : vector<1x64x128xbf16> to vector<64x128xbf16>
    %cst_39 = arith.constant dense<0.000000e+00> : vector<176x128xf32>
    %46 = tpu.matmul %43, %45, %cst_39 {dimension_numbers = #tpu.dot_dimension_numbers<[1], [0], [0], [1], [0, 0, 1, 1], [], []>} : vector<176x64xbf16>, vector<64x128xbf16>, vector<176x128xf32> -> vector<176x128xf32>
    %47 = arith.addf %40, %46 : vector<176x128xf32>
    %c1_40 = arith.constant 1 : index
    %c9_41 = arith.constant 9 : index
    %c0_42 = arith.constant 0 : index
    %48 = vector.load %arg1[%c1_40, %c9_41, %c0_42] : memref<4x186x64xf32, #tpu.memory_space<vmem>>, vector<1x176x64xf32>
    %49 = vector.shape_cast %48 : vector<1x176x64xf32> to vector<176x64xf32>
    %50 = arith.truncf %49 : vector<176x64xf32> to vector<176x64xbf16>
    %c7 = arith.constant 7 : index
    %c0_43 = arith.constant 0 : index
    %c0_44 = arith.constant 0 : index
    %51 = vector.load %arg2[%c7, %c0_43, %c0_44] : memref<9x64x128xbf16, #tpu.memory_space<vmem>>, vector<1x64x128xbf16>
    %52 = vector.shape_cast %51 : vector<1x64x128xbf16> to vector<64x128xbf16>
    %cst_45 = arith.constant dense<0.000000e+00> : vector<176x128xf32>
    %53 = tpu.matmul %50, %52, %cst_45 {dimension_numbers = #tpu.dot_dimension_numbers<[1], [0], [0], [1], [0, 0, 1, 1], [], []>} : vector<176x64xbf16>, vector<64x128xbf16>, vector<176x128xf32> -> vector<176x128xf32>
    %54 = arith.addf %47, %53 : vector<176x128xf32>
    %c0_46 = arith.constant 0 : index
    %c10 = arith.constant 10 : index
    %c0_47 = arith.constant 0 : index
    %55 = vector.load %arg1[%c0_46, %c10, %c0_47] : memref<4x186x64xf32, #tpu.memory_space<vmem>>, vector<1x176x64xf32>
    %56 = vector.shape_cast %55 : vector<1x176x64xf32> to vector<176x64xf32>
    %57 = arith.truncf %56 : vector<176x64xf32> to vector<176x64xbf16>
    %c8 = arith.constant 8 : index
    %c0_48 = arith.constant 0 : index
    %c0_49 = arith.constant 0 : index
    %58 = vector.load %arg2[%c8, %c0_48, %c0_49] : memref<9x64x128xbf16, #tpu.memory_space<vmem>>, vector<1x64x128xbf16>
    %59 = vector.shape_cast %58 : vector<1x64x128xbf16> to vector<64x128xbf16>
    %cst_50 = arith.constant dense<0.000000e+00> : vector<176x128xf32>
    %60 = tpu.matmul %57, %59, %cst_50 {dimension_numbers = #tpu.dot_dimension_numbers<[1], [0], [0], [1], [0, 0, 1, 1], [], []>} : vector<176x64xbf16>, vector<64x128xbf16>, vector<176x128xf32> -> vector<176x128xf32>
    %61 = arith.addf %54, %60 : vector<176x128xf32>
    %c0_51 = arith.constant 0 : index
    %c0_52 = arith.constant 0 : index
    %62 = vector.load %arg5[%c0_51, %c0_52] : memref<176x1xf32, #tpu.memory_space<vmem>>, vector<176x1xf32>
    %63 = vector.broadcast %62 : vector<176x1xf32> to vector<176x128xf32>
    %64 = arith.mulf %61, %63 : vector<176x128xf32>
    %cst_53 = arith.constant dense<0.000000e+00> : vector<128xf32>
    %65 = vector.multi_reduction <add>, %64, %cst_53 [0] : vector<176x128xf32> to vector<128xf32>
    %66 = vector.shape_cast %65 : vector<128xf32> to vector<1x128xf32>
    %cst_54 = arith.constant 7.812500e-03 : f32
    %67 = vector.broadcast %cst_54 : f32 to vector<1x128xf32>
    %68 = arith.mulf %66, %67 : vector<1x128xf32>
    %69 = vector.broadcast %68 : vector<1x128xf32> to vector<176x128xf32>
    %70 = arith.subf %61, %69 : vector<176x128xf32>
    %71 = vector.broadcast %62 : vector<176x1xf32> to vector<176x128xf32>
    %72 = arith.mulf %70, %71 : vector<176x128xf32>
    %73 = arith.mulf %72, %72 : vector<176x128xf32>
    %cst_55 = arith.constant dense<0.000000e+00> : vector<128xf32>
    %74 = vector.multi_reduction <add>, %73, %cst_55 [0] : vector<176x128xf32> to vector<128xf32>
    %75 = vector.shape_cast %74 : vector<128xf32> to vector<1x128xf32>
    %cst_56 = arith.constant 7.812500e-03 : f32
    %76 = vector.broadcast %cst_56 : f32 to vector<1x128xf32>
    %77 = arith.mulf %75, %76 : vector<1x128xf32>
    %c0_57 = arith.constant 0 : index
    %c0_58 = arith.constant 0 : index
    %78 = vector.load %arg3[%c0_57, %c0_58] : memref<1x128xf32, #tpu.memory_space<vmem>>, vector<1x128xf32>
    %cst_59 = arith.constant 9.99999974E-6 : f32
    %79 = vector.broadcast %cst_59 : f32 to vector<1x128xf32>
    %80 = arith.addf %77, %79 : vector<1x128xf32>
    %81 = math.rsqrt %80 : vector<1x128xf32>
    %82 = arith.mulf %78, %81 : vector<1x128xf32>
    %83 = vector.broadcast %82 : vector<1x128xf32> to vector<176x128xf32>
    %84 = arith.mulf %72, %83 : vector<176x128xf32>
    %c0_60 = arith.constant 0 : index
    %c0_61 = arith.constant 0 : index
    %85 = vector.load %arg4[%c0_60, %c0_61] : memref<1x128xf32, #tpu.memory_space<vmem>>, vector<1x128xf32>
    %86 = vector.broadcast %85 : vector<1x128xf32> to vector<176x128xf32>
    %87 = arith.addf %84, %86 : vector<176x128xf32>
    %cst_62 = arith.constant 0.000000e+00 : f32
    %88 = vector.broadcast %cst_62 : f32 to vector<176x128xf32>
    %89 = arith.maximumf %87, %88 : vector<176x128xf32>
    %90 = arith.truncf %89 : vector<176x128xf32> to vector<176x128xbf16>
    %c0_63 = arith.constant 0 : index
    %c0_64 = arith.constant 0 : index
    %91 = vector.load %arg6[%c0_63, %c0_64] : memref<176x128xbf16, #tpu.memory_space<vmem>>, vector<176x128xbf16>
    tpu.vector_store %arg6[%c0_63, %c0_64], %90 {strides = array<i32>} : memref<176x128xbf16, #tpu.memory_space<vmem>>, vector<176x128xbf16>,
    return
  }
  func.func @transform_0(%arg0: i32) -> (i32, i32, i32) {
    %c0_i32 = arith.constant 0 : i32
    %c0_i32_0 = arith.constant 0 : i32
    %c0_i32_1 = arith.constant 0 : i32
    %c0_i32_2 = arith.constant 0 : i32
    return %c0_i32, %c0_i32_0, %c0_i32_1 : i32, i32, i32
  }
  func.func @transform_1(%arg0: i32) -> (i32, i32, i32) {
    %c0_i32 = arith.constant 0 : i32
    %c0_i32_0 = arith.constant 0 : i32
    %c0_i32_1 = arith.constant 0 : i32
    return %c0_i32, %c0_i32_0, %arg0 : i32, i32, i32
  }
  func.func @transform_2(%arg0: i32) -> (i32, i32) {
    %c0_i32 = arith.constant 0 : i32
    %c0_i32_0 = arith.constant 0 : i32
    return %c0_i32, %arg0 : i32, i32
  }
  func.func @transform_3(%arg0: i32) -> (i32, i32) {
    %c0_i32 = arith.constant 0 : i32
    %c0_i32_0 = arith.constant 0 : i32
    return %c0_i32, %arg0 : i32, i32
  }
  func.func @transform_4(%arg0: i32) -> (i32, i32) {
    %c0_i32 = arith.constant 0 : i32
    %c0_i32_0 = arith.constant 0 : i32
    %c0_i32_1 = arith.constant 0 : i32
    return %c0_i32, %c0_i32_0 : i32, i32
  }
  func.func @transform_5(%arg0: i32) -> (i32, i32) {
    %c0_i32 = arith.constant 0 : i32
    %c0_i32_0 = arith.constant 0 : i32
    return %c0_i32, %arg0 : i32, i32
  }
}

module attributes {stable_mosaic.version = 11 : i64} {
  func.func @_k_plain(%arg0: i32, %arg1: memref<1x128x64xf32, #tpu.memory_space<vmem>>, %arg2: memref<1x64x128xbf16, #tpu.memory_space<vmem>>, %arg3: memref<1x128xf32, #tpu.memory_space<vmem>>, %arg4: memref<1x128xf32, #tpu.memory_space<vmem>>, %arg5: memref<128x128xbf16, #tpu.memory_space<vmem>>) attributes {dimension_semantics = [#tpu.dimension_semantics<parallel>], iteration_bounds = array<i64: 1>, scalar_prefetch = 0 : i64, scratch_operands = 0 : i64, tpu.core_type = #tpu.core_type<tc>, window_params = [{pipeline_mode = #tpu.pipeline_mode<synchronous>, transform_indices = @transform_0, window_bounds = array<i64: 1, 128, 64>}, {transform_indices = @transform_1, window_bounds = array<i64: 1, 64, 128>}, {transform_indices = @transform_2, window_bounds = array<i64: 1, 128>}, {transform_indices = @transform_3, window_bounds = array<i64: 1, 128>}, {transform_indices = @transform_4, window_bounds = array<i64: 128, 128>}]} {
    %c0 = arith.constant 0 : index
    %c0_0 = arith.constant 0 : index
    %c0_1 = arith.constant 0 : index
    %0 = vector.load %arg1[%c0, %c0_0, %c0_1] : memref<1x128x64xf32, #tpu.memory_space<vmem>>, vector<1x128x64xf32>
    %1 = vector.shape_cast %0 : vector<1x128x64xf32> to vector<128x64xf32>
    %2 = arith.truncf %1 : vector<128x64xf32> to vector<128x64xbf16>
    %c0_2 = arith.constant 0 : index
    %c0_3 = arith.constant 0 : index
    %c0_4 = arith.constant 0 : index
    %3 = vector.load %arg2[%c0_2, %c0_3, %c0_4] : memref<1x64x128xbf16, #tpu.memory_space<vmem>>, vector<1x64x128xbf16>
    %4 = vector.shape_cast %3 : vector<1x64x128xbf16> to vector<64x128xbf16>
    %cst = arith.constant dense<0.000000e+00> : vector<128x128xf32>
    %5 = tpu.matmul %2, %4, %cst {dimension_numbers = #tpu.dot_dimension_numbers<[1], [0], [0], [1], [0, 0, 1, 1], [], []>} : vector<128x64xbf16>, vector<64x128xbf16>, vector<128x128xf32> -> vector<128x128xf32>
    %cst_5 = arith.constant dense<0.000000e+00> : vector<128xf32>
    %6 = vector.multi_reduction <add>, %5, %cst_5 [0] : vector<128x128xf32> to vector<128xf32>
    %7 = vector.shape_cast %6 : vector<128xf32> to vector<1x128xf32>
    %cst_6 = arith.constant 7.812500e-03 : f32
    %8 = vector.broadcast %cst_6 : f32 to vector<1x128xf32>
    %9 = arith.mulf %7, %8 : vector<1x128xf32>
    %10 = vector.broadcast %9 : vector<1x128xf32> to vector<128x128xf32>
    %11 = arith.subf %5, %10 : vector<128x128xf32>
    %12 = arith.mulf %11, %11 : vector<128x128xf32>
    %cst_7 = arith.constant dense<0.000000e+00> : vector<128xf32>
    %13 = vector.multi_reduction <add>, %12, %cst_7 [0] : vector<128x128xf32> to vector<128xf32>
    %14 = vector.shape_cast %13 : vector<128xf32> to vector<1x128xf32>
    %cst_8 = arith.constant 7.812500e-03 : f32
    %15 = vector.broadcast %cst_8 : f32 to vector<1x128xf32>
    %16 = arith.mulf %14, %15 : vector<1x128xf32>
    %c0_9 = arith.constant 0 : index
    %c0_10 = arith.constant 0 : index
    %17 = vector.load %arg3[%c0_9, %c0_10] : memref<1x128xf32, #tpu.memory_space<vmem>>, vector<1x128xf32>
    %cst_11 = arith.constant 9.99999974E-6 : f32
    %18 = vector.broadcast %cst_11 : f32 to vector<1x128xf32>
    %19 = arith.addf %16, %18 : vector<1x128xf32>
    %20 = math.rsqrt %19 : vector<1x128xf32>
    %21 = arith.mulf %17, %20 : vector<1x128xf32>
    %22 = vector.broadcast %21 : vector<1x128xf32> to vector<128x128xf32>
    %23 = arith.mulf %11, %22 : vector<128x128xf32>
    %c0_12 = arith.constant 0 : index
    %c0_13 = arith.constant 0 : index
    %24 = vector.load %arg4[%c0_12, %c0_13] : memref<1x128xf32, #tpu.memory_space<vmem>>, vector<1x128xf32>
    %25 = vector.broadcast %24 : vector<1x128xf32> to vector<128x128xf32>
    %26 = arith.addf %23, %25 : vector<128x128xf32>
    %27 = arith.truncf %26 : vector<128x128xf32> to vector<128x128xbf16>
    %c0_14 = arith.constant 0 : index
    %c0_15 = arith.constant 0 : index
    %28 = vector.load %arg5[%c0_14, %c0_15] : memref<128x128xbf16, #tpu.memory_space<vmem>>, vector<128x128xbf16>
    tpu.vector_store %arg5[%c0_14, %c0_15], %27 {strides = array<i32>} : memref<128x128xbf16, #tpu.memory_space<vmem>>, vector<128x128xbf16>,
    return
  }
  func.func @transform_0(%arg0: i32) -> (i32, i32, i32) {
    %c0_i32 = arith.constant 0 : i32
    %c0_i32_0 = arith.constant 0 : i32
    %c0_i32_1 = arith.constant 0 : i32
    %c0_i32_2 = arith.constant 0 : i32
    return %c0_i32, %c0_i32_0, %c0_i32_1 : i32, i32, i32
  }
  func.func @transform_1(%arg0: i32) -> (i32, i32, i32) {
    %c0_i32 = arith.constant 0 : i32
    %c0_i32_0 = arith.constant 0 : i32
    %c0_i32_1 = arith.constant 0 : i32
    return %c0_i32, %c0_i32_0, %arg0 : i32, i32, i32
  }
  func.func @transform_2(%arg0: i32) -> (i32, i32) {
    %c0_i32 = arith.constant 0 : i32
    %c0_i32_0 = arith.constant 0 : i32
    return %c0_i32, %arg0 : i32, i32
  }
  func.func @transform_3(%arg0: i32) -> (i32, i32) {
    %c0_i32 = arith.constant 0 : i32
    %c0_i32_0 = arith.constant 0 : i32
    return %c0_i32, %arg0 : i32, i32
  }
  func.func @transform_4(%arg0: i32) -> (i32, i32) {
    %c0_i32 = arith.constant 0 : i32
    %c0_i32_0 = arith.constant 0 : i32
    return %c0_i32, %arg0 : i32, i32
  }
}

module attributes {stable_mosaic.version = 11 : i64} {
  func.func @_k_mask_res(%arg0: i32, %arg1: memref<1x230x128xf32, #tpu.memory_space<vmem>>, %arg2: memref<9x128x128xbf16, #tpu.memory_space<vmem>>, %arg3: memref<1x128xf32, #tpu.memory_space<vmem>>, %arg4: memref<1x128xf32, #tpu.memory_space<vmem>>, %arg5: memref<208x1xf32, #tpu.memory_space<vmem>>, %arg6: memref<208x128xbf16, #tpu.memory_space<vmem>>, %arg7: memref<208x128xf32, #tpu.memory_space<vmem>>) attributes {dimension_semantics = [#tpu.dimension_semantics<parallel>], iteration_bounds = array<i64: 1>, scalar_prefetch = 0 : i64, scratch_operands = 0 : i64, tpu.core_type = #tpu.core_type<tc>, window_params = [{pipeline_mode = #tpu.pipeline_mode<synchronous>, transform_indices = @transform_0, window_bounds = array<i64: 1, 230, 128>}, {transform_indices = @transform_1, window_bounds = array<i64: 9, 128, 128>}, {transform_indices = @transform_2, window_bounds = array<i64: 1, 128>}, {transform_indices = @transform_3, window_bounds = array<i64: 1, 128>}, {pipeline_mode = #tpu.pipeline_mode<synchronous>, transform_indices = @transform_4, window_bounds = array<i64: 208, 1>}, {transform_indices = @transform_5, window_bounds = array<i64: 208, 128>}, {transform_indices = @transform_6, window_bounds = array<i64: 208, 128>}]} {
    %c0 = arith.constant 0 : index
    %c0_0 = arith.constant 0 : index
    %c0_1 = arith.constant 0 : index
    %0 = vector.load %arg1[%c0, %c0_0, %c0_1] : memref<1x230x128xf32, #tpu.memory_space<vmem>>, vector<1x208x128xf32>
    %1 = vector.shape_cast %0 : vector<1x208x128xf32> to vector<208x128xf32>
    %2 = arith.truncf %1 : vector<208x128xf32> to vector<208x128xbf16>
    %c0_2 = arith.constant 0 : index
    %c0_3 = arith.constant 0 : index
    %c0_4 = arith.constant 0 : index
    %3 = vector.load %arg2[%c0_2, %c0_3, %c0_4] : memref<9x128x128xbf16, #tpu.memory_space<vmem>>, vector<1x128x128xbf16>
    %4 = vector.shape_cast %3 : vector<1x128x128xbf16> to vector<128x128xbf16>
    %cst = arith.constant dense<0.000000e+00> : vector<208x128xf32>
    %5 = tpu.matmul %2, %4, %cst {dimension_numbers = #tpu.dot_dimension_numbers<[1], [0], [0], [1], [0, 0, 1, 1], [], []>} : vector<208x128xbf16>, vector<128x128xbf16>, vector<208x128xf32> -> vector<208x128xf32>
    %c0_5 = arith.constant 0 : index
    %c1 = arith.constant 1 : index
    %c0_6 = arith.constant 0 : index
    %6 = vector.load %arg1[%c0_5, %c1, %c0_6] : memref<1x230x128xf32, #tpu.memory_space<vmem>>, vector<1x208x128xf32>
    %7 = vector.shape_cast %6 : vector<1x208x128xf32> to vector<208x128xf32>
    %8 = arith.truncf %7 : vector<208x128xf32> to vector<208x128xbf16>
    %c1_7 = arith.constant 1 : index
    %c0_8 = arith.constant 0 : index
    %c0_9 = arith.constant 0 : index
    %9 = vector.load %arg2[%c1_7, %c0_8, %c0_9] : memref<9x128x128xbf16, #tpu.memory_space<vmem>>, vector<1x128x128xbf16>
    %10 = vector.shape_cast %9 : vector<1x128x128xbf16> to vector<128x128xbf16>
    %cst_10 = arith.constant dense<0.000000e+00> : vector<208x128xf32>
    %11 = tpu.matmul %8, %10, %cst_10 {dimension_numbers = #tpu.dot_dimension_numbers<[1], [0], [0], [1], [0, 0, 1, 1], [], []>} : vector<208x128xbf16>, vector<128x128xbf16>, vector<208x128xf32> -> vector<208x128xf32>
    %12 = arith.addf %5, %11 : vector<208x128xf32>
    %c0_11 = arith.constant 0 : index
    %c2 = arith.constant 2 : index
    %c0_12 = arith.constant 0 : index
    %13 = vector.load %arg1[%c0_11, %c2, %c0_12] : memref<1x230x128xf32, #tpu.memory_space<vmem>>, vector<1x208x128xf32>
    %14 = vector.shape_cast %13 : vector<1x208x128xf32> to vector<208x128xf32>
    %15 = arith.truncf %14 : vector<208x128xf32> to vector<208x128xbf16>
    %c2_13 = arith.constant 2 : index
    %c0_14 = arith.constant 0 : index
    %c0_15 = arith.constant 0 : index
    %16 = vector.load %arg2[%c2_13, %c0_14, %c0_15] : memref<9x128x128xbf16, #tpu.memory_space<vmem>>, vector<1x128x128xbf16>
    %17 = vector.shape_cast %16 : vector<1x128x128xbf16> to vector<128x128xbf16>
    %cst_16 = arith.constant dense<0.000000e+00> : vector<208x128xf32>
    %18 = tpu.matmul %15, %17, %cst_16 {dimension_numbers = #tpu.dot_dimension_numbers<[1], [0], [0], [1], [0, 0, 1, 1], [], []>} : vector<208x128xbf16>, vector<128x128xbf16>, vector<208x128xf32> -> vector<208x128xf32>
    %19 = arith.addf %12, %18 : vector<208x128xf32>
    %c0_17 = arith.constant 0 : index
    %c10 = arith.constant 10 : index
    %c0_18 = arith.constant 0 : index
    %20 = vector.load %arg1[%c0_17, %c10, %c0_18] : memref<1x230x128xf32, #tpu.memory_space<vmem>>, vector<1x208x128xf32>
    %21 = vector.shape_cast %20 : vector<1x208x128xf32> to vector<208x128xf32>
    %22 = arith.truncf %21 : vector<208x128xf32> to vector<208x128xbf16>
    %c3 = arith.constant 3 : index
    %c0_19 = arith.constant 0 : index
    %c0_20 = arith.constant 0 : index
    %23 = vector.load %arg2[%c3, %c0_19, %c0_20] : memref<9x128x128xbf16, #tpu.memory_space<vmem>>, vector<1x128x128xbf16>
    %24 = vector.shape_cast %23 : vector<1x128x128xbf16> to vector<128x128xbf16>
    %cst_21 = arith.constant dense<0.000000e+00> : vector<208x128xf32>
    %25 = tpu.matmul %22, %24, %cst_21 {dimension_numbers = #tpu.dot_dimension_numbers<[1], [0], [0], [1], [0, 0, 1, 1], [], []>} : vector<208x128xbf16>, vector<128x128xbf16>, vector<208x128xf32> -> vector<208x128xf32>
    %26 = arith.addf %19, %25 : vector<208x128xf32>
    %c0_22 = arith.constant 0 : index
    %c11 = arith.constant 11 : index
    %c0_23 = arith.constant 0 : index
    %27 = vector.load %arg1[%c0_22, %c11, %c0_23] : memref<1x230x128xf32, #tpu.memory_space<vmem>>, vector<1x208x128xf32>
    %28 = vector.shape_cast %27 : vector<1x208x128xf32> to vector<208x128xf32>
    %29 = arith.truncf %28 : vector<208x128xf32> to vector<208x128xbf16>
    %c4 = arith.constant 4 : index
    %c0_24 = arith.constant 0 : index
    %c0_25 = arith.constant 0 : index
    %30 = vector.load %arg2[%c4, %c0_24, %c0_25] : memref<9x128x128xbf16, #tpu.memory_space<vmem>>, vector<1x128x128xbf16>
    %31 = vector.shape_cast %30 : vector<1x128x128xbf16> to vector<128x128xbf16>
    %cst_26 = arith.constant dense<0.000000e+00> : vector<208x128xf32>
    %32 = tpu.matmul %29, %31, %cst_26 {dimension_numbers = #tpu.dot_dimension_numbers<[1], [0], [0], [1], [0, 0, 1, 1], [], []>} : vector<208x128xbf16>, vector<128x128xbf16>, vector<208x128xf32> -> vector<208x128xf32>
    %33 = arith.addf %26, %32 : vector<208x128xf32>
    %c0_27 = arith.constant 0 : index
    %c12 = arith.constant 12 : index
    %c0_28 = arith.constant 0 : index
    %34 = vector.load %arg1[%c0_27, %c12, %c0_28] : memref<1x230x128xf32, #tpu.memory_space<vmem>>, vector<1x208x128xf32>
    %35 = vector.shape_cast %34 : vector<1x208x128xf32> to vector<208x128xf32>
    %36 = arith.truncf %35 : vector<208x128xf32> to vector<208x128xbf16>
    %c5 = arith.constant 5 : index
    %c0_29 = arith.constant 0 : index
    %c0_30 = arith.constant 0 : index
    %37 = vector.load %arg2[%c5, %c0_29, %c0_30] : memref<9x128x128xbf16, #tpu.memory_space<vmem>>, vector<1x128x128xbf16>
    %38 = vector.shape_cast %37 : vector<1x128x128xbf16> to vector<128x128xbf16>
    %cst_31 = arith.constant dense<0.000000e+00> : vector<208x128xf32>
    %39 = tpu.matmul %36, %38, %cst_31 {dimension_numbers = #tpu.dot_dimension_numbers<[1], [0], [0], [1], [0, 0, 1, 1], [], []>} : vector<208x128xbf16>, vector<128x128xbf16>, vector<208x128xf32> -> vector<208x128xf32>
    %40 = arith.addf %33, %39 : vector<208x128xf32>
    %c0_32 = arith.constant 0 : index
    %c20 = arith.constant 20 : index
    %c0_33 = arith.constant 0 : index
    %41 = vector.load %arg1[%c0_32, %c20, %c0_33] : memref<1x230x128xf32, #tpu.memory_space<vmem>>, vector<1x208x128xf32>
    %42 = vector.shape_cast %41 : vector<1x208x128xf32> to vector<208x128xf32>
    %43 = arith.truncf %42 : vector<208x128xf32> to vector<208x128xbf16>
    %c6 = arith.constant 6 : index
    %c0_34 = arith.constant 0 : index
    %c0_35 = arith.constant 0 : index
    %44 = vector.load %arg2[%c6, %c0_34, %c0_35] : memref<9x128x128xbf16, #tpu.memory_space<vmem>>, vector<1x128x128xbf16>
    %45 = vector.shape_cast %44 : vector<1x128x128xbf16> to vector<128x128xbf16>
    %cst_36 = arith.constant dense<0.000000e+00> : vector<208x128xf32>
    %46 = tpu.matmul %43, %45, %cst_36 {dimension_numbers = #tpu.dot_dimension_numbers<[1], [0], [0], [1], [0, 0, 1, 1], [], []>} : vector<208x128xbf16>, vector<128x128xbf16>, vector<208x128xf32> -> vector<208x128xf32>
    %47 = arith.addf %40, %46 : vector<208x128xf32>
    %c0_37 = arith.constant 0 : index
    %c21 = arith.constant 21 : index
    %c0_38 = arith.constant 0 : index
    %48 = vector.load %arg1[%c0_37, %c21, %c0_38] : memref<1x230x128xf32, #tpu.memory_space<vmem>>, vector<1x208x128xf32>
    %49 = vector.shape_cast %48 : vector<1x208x128xf32> to vector<208x128xf32>
    %50 = arith.truncf %49 : vector<208x128xf32> to vector<208x128xbf16>
    %c7 = arith.constant 7 : index
    %c0_39 = arith.constant 0 : index
    %c0_40 = arith.constant 0 : index
    %51 = vector.load %arg2[%c7, %c0_39, %c0_40] : memref<9x128x128xbf16, #tpu.memory_space<vmem>>, vector<1x128x128xbf16>
    %52 = vector.shape_cast %51 : vector<1x128x128xbf16> to vector<128x128xbf16>
    %cst_41 = arith.constant dense<0.000000e+00> : vector<208x128xf32>
    %53 = tpu.matmul %50, %52, %cst_41 {dimension_numbers = #tpu.dot_dimension_numbers<[1], [0], [0], [1], [0, 0, 1, 1], [], []>} : vector<208x128xbf16>, vector<128x128xbf16>, vector<208x128xf32> -> vector<208x128xf32>
    %54 = arith.addf %47, %53 : vector<208x128xf32>
    %c0_42 = arith.constant 0 : index
    %c22 = arith.constant 22 : index
    %c0_43 = arith.constant 0 : index
    %55 = vector.load %arg1[%c0_42, %c22, %c0_43] : memref<1x230x128xf32, #tpu.memory_space<vmem>>, vector<1x208x128xf32>
    %56 = vector.shape_cast %55 : vector<1x208x128xf32> to vector<208x128xf32>
    %57 = arith.truncf %56 : vector<208x128xf32> to vector<208x128xbf16>
    %c8 = arith.constant 8 : index
    %c0_44 = arith.constant 0 : index
    %c0_45 = arith.constant 0 : index
    %58 = vector.load %arg2[%c8, %c0_44, %c0_45] : memref<9x128x128xbf16, #tpu.memory_space<vmem>>, vector<1x128x128xbf16>
    %59 = vector.shape_cast %58 : vector<1x128x128xbf16> to vector<128x128xbf16>
    %cst_46 = arith.constant dense<0.000000e+00> : vector<208x128xf32>
    %60 = tpu.matmul %57, %59, %cst_46 {dimension_numbers = #tpu.dot_dimension_numbers<[1], [0], [0], [1], [0, 0, 1, 1], [], []>} : vector<208x128xbf16>, vector<128x128xbf16>, vector<208x128xf32> -> vector<208x128xf32>
    %61 = arith.addf %54, %60 : vector<208x128xf32>
    %c0_47 = arith.constant 0 : index
    %c0_48 = arith.constant 0 : index
    %62 = vector.load %arg5[%c0_47, %c0_48] : memref<208x1xf32, #tpu.memory_space<vmem>>, vector<208x1xf32>
    %63 = vector.broadcast %62 : vector<208x1xf32> to vector<208x128xf32>
    %64 = arith.mulf %61, %63 : vector<208x128xf32>
    %cst_49 = arith.constant dense<0.000000e+00> : vector<128xf32>
    %65 = vector.multi_reduction <add>, %64, %cst_49 [0] : vector<208x128xf32> to vector<128xf32>
    %66 = vector.shape_cast %65 : vector<128xf32> to vector<1x128xf32>
    %cst_50 = arith.constant 7.812500e-03 : f32
    %67 = vector.broadcast %cst_50 : f32 to vector<1x128xf32>
    %68 = arith.mulf %66, %67 : vector<1x128xf32>
    %69 = vector.broadcast %68 : vector<1x128xf32> to vector<208x128xf32>
    %70 = arith.subf %61, %69 : vector<208x128xf32>
    %71 = vector.broadcast %62 : vector<208x1xf32> to vector<208x128xf32>
    %72 = arith.mulf %70, %71 : vector<208x128xf32>
    %73 = arith.mulf %72, %72 : vector<208x128xf32>
    %cst_51 = arith.constant dense<0.000000e+00> : vector<128xf32>
    %74 = vector.multi_reduction <add>, %73, %cst_51 [0] : vector<208x128xf32> to vector<128xf32>
    %75 = vector.shape_cast %74 : vector<128xf32> to vector<1x128xf32>
    %cst_52 = arith.constant 7.812500e-03 : f32
    %76 = vector.broadcast %cst_52 : f32 to vector<1x128xf32>
    %77 = arith.mulf %75, %76 : vector<1x128xf32>
    %c0_53 = arith.constant 0 : index
    %c0_54 = arith.constant 0 : index
    %78 = vector.load %arg3[%c0_53, %c0_54] : memref<1x128xf32, #tpu.memory_space<vmem>>, vector<1x128xf32>
    %cst_55 = arith.constant 9.99999974E-6 : f32
    %79 = vector.broadcast %cst_55 : f32 to vector<1x128xf32>
    %80 = arith.addf %77, %79 : vector<1x128xf32>
    %81 = math.rsqrt %80 : vector<1x128xf32>
    %82 = arith.mulf %78, %81 : vector<1x128xf32>
    %83 = vector.broadcast %82 : vector<1x128xf32> to vector<208x128xf32>
    %84 = arith.mulf %72, %83 : vector<208x128xf32>
    %c0_56 = arith.constant 0 : index
    %c0_57 = arith.constant 0 : index
    %85 = vector.load %arg4[%c0_56, %c0_57] : memref<1x128xf32, #tpu.memory_space<vmem>>, vector<1x128xf32>
    %86 = vector.broadcast %85 : vector<1x128xf32> to vector<208x128xf32>
    %87 = arith.addf %84, %86 : vector<208x128xf32>
    %c0_58 = arith.constant 0 : index
    %c0_59 = arith.constant 0 : index
    %88 = vector.load %arg6[%c0_58, %c0_59] : memref<208x128xbf16, #tpu.memory_space<vmem>>, vector<208x128xbf16>
    %89 = arith.extf %88 : vector<208x128xbf16> to vector<208x128xf32>
    %90 = arith.addf %87, %89 : vector<208x128xf32>
    %cst_60 = arith.constant 0.000000e+00 : f32
    %91 = vector.broadcast %cst_60 : f32 to vector<208x128xf32>
    %92 = arith.maximumf %90, %91 : vector<208x128xf32>
    %c0_61 = arith.constant 0 : index
    %c0_62 = arith.constant 0 : index
    %93 = vector.load %arg7[%c0_61, %c0_62] : memref<208x128xf32, #tpu.memory_space<vmem>>, vector<208x128xf32>
    tpu.vector_store %arg7[%c0_61, %c0_62], %92 {strides = array<i32>} : memref<208x128xf32, #tpu.memory_space<vmem>>, vector<208x128xf32>,
    return
  }
  func.func @transform_0(%arg0: i32) -> (i32, i32, i32) {
    %c0_i32 = arith.constant 0 : i32
    %c0_i32_0 = arith.constant 0 : i32
    %c0_i32_1 = arith.constant 0 : i32
    %c0_i32_2 = arith.constant 0 : i32
    return %c0_i32, %c0_i32_0, %c0_i32_1 : i32, i32, i32
  }
  func.func @transform_1(%arg0: i32) -> (i32, i32, i32) {
    %c0_i32 = arith.constant 0 : i32
    %c0_i32_0 = arith.constant 0 : i32
    %c0_i32_1 = arith.constant 0 : i32
    return %c0_i32, %c0_i32_0, %arg0 : i32, i32, i32
  }
  func.func @transform_2(%arg0: i32) -> (i32, i32) {
    %c0_i32 = arith.constant 0 : i32
    %c0_i32_0 = arith.constant 0 : i32
    return %c0_i32, %arg0 : i32, i32
  }
  func.func @transform_3(%arg0: i32) -> (i32, i32) {
    %c0_i32 = arith.constant 0 : i32
    %c0_i32_0 = arith.constant 0 : i32
    return %c0_i32, %arg0 : i32, i32
  }
  func.func @transform_4(%arg0: i32) -> (i32, i32) {
    %c0_i32 = arith.constant 0 : i32
    %c0_i32_0 = arith.constant 0 : i32
    %c0_i32_1 = arith.constant 0 : i32
    return %c0_i32, %c0_i32_0 : i32, i32
  }
  func.func @transform_5(%arg0: i32) -> (i32, i32) {
    %c0_i32 = arith.constant 0 : i32
    %c0_i32_0 = arith.constant 0 : i32
    return %c0_i32, %arg0 : i32, i32
  }
  func.func @transform_6(%arg0: i32) -> (i32, i32) {
    %c0_i32 = arith.constant 0 : i32
    %c0_i32_0 = arith.constant 0 : i32
    return %c0_i32, %arg0 : i32, i32
  }
}

</mosaic_0001>

<bundles_post_ra>
// kernel: basic_block_forward.4
= control target key start
LH: loop header
LB: loop body
LE: loop exit
PB: predicated region body
PF: predicated region fallthrough
CT: control target
= control target key end

     0   :  { %vm74_vm0 = vcmask 523264   ;;  %s695_s1 = inlined_call_operand.vmem [shape: bf16[1,64,128], index: 1, kind: input, shape index: {}]   ;;  %s696_s0 = inlined_call_operand.vmem [shape: f32[1,128,64], index: 0, kind: input, shape index: {}]   ;;  %s697_s2 = inlined_call_operand.vmem [shape: f32[1,128], index: 2, kind: input, shape index: {}]   ;;  %s698_s3 = inlined_call_operand.vmem [shape: f32[1,128], index: 3, kind: input, shape index: {}]   ;;  %s699_s4 = inlined_call_operand.vmem [shape: bf16[128,128], index: 4, kind: output, shape index: {}]  }
   0x1   :  { %v541_v0 = vld [vmem:[%s695_s1 + $0x18] sm:$0xff]   ;;  %v542_v1 = vld [vmem:[%s695_s1 + $0x10] sm:$0xff]   ;;  %v543_v2 = vld [vmem:[%s695_s1 + $0x8] sm:$0xff]  }
   0x2   :  { %509 = vmatprep.subr.bf16.mxu0 %v541_v0  ;;  %533 = vmatprep.subr.bf16.mxu1 %v541_v0  ;;  %v18_v3 = vld [vmem:[%s696_s0] sm:$0xff]  ;;  %v19_v4 = vld [vmem:[%s696_s0 + $0x8] sm:$0xff]  ;;  %v20_v10 = vld [vmem:[%s696_s0 + $0x10] sm:$0xff] }
   0x3   :  { %510 = vmatpush3.bf16.msra.mxu0 %v541_v0  ;;  %537 = vmatpush3.bf16.msra.mxu1 %v541_v0  ;;  %v34_v5 = vpack.c.bf16 %v19_v4, %v18_v3  ;;  %v26_v6 = vld [vmem:[%s696_s0 + $0x40] sm:$0xff]  ;;  %v27_v7 = vld [vmem:[%s696_s0 + $0x48] sm:$0xff]  ;;  %v21_v11 = vld [vmem:[%s696_s0 + $0x18] sm:$0xff] }
   0x4   :  { %511 = vmatprep.subr.bf16.mxu0 %v542_v1  ;;  %534 = vmatprep.subr.bf16.mxu1 %v542_v1  ;;  %v544_v8 = vld [vmem:[%s695_s1] sm:$0xff]   ;;  %v38_v9 = vpack.c.bf16 %v27_v7, %v26_v6  ;;  %v28_v13 = vld [vmem:[%s696_s0 + $0x50] sm:$0xff]  ;;  %v29_v14 = vld [vmem:[%s696_s0 + $0x58] sm:$0xff]  ;;  %v35_v18 = vpack.c.bf16 %v21_v11, %v20_v10 }
   0x5   :  { %517 = vmatprep.mubr.msk.bf16.mxu0 %vm74_vm0, %v34_v5  ;;  %v22_v12 = vld [vmem:[%s696_s0 + $0x20] sm:$0xff]  ;;  %v23_v15 = vld [vmem:[%s696_s0 + $0x28] sm:$0xff]  ;;  %v39_v19 = vpack.c.bf16 %v29_v14, %v28_v13  ;;  %v24_v22 = vld [vmem:[%s696_s0 + $0x30] sm:$0xff] }
   0x6   :  { %525 = vmatprep.mubr.msk.bf16.mxu1 %vm74_vm0, %v38_v9  ;;  %v30_v16 = vld [vmem:[%s696_s0 + $0x60] sm:$0xff]  ;;  %v31_v17 = vld [vmem:[%s696_s0 + $0x68] sm:$0xff]  ;;  %v36_v20 = vpack.c.bf16 %v23_v15, %v22_v12  ;;  %v25_v23 = vld [vmem:[%s696_s0 + $0x38] sm:$0xff] }
   0x7   :  { %512 = vmatpush3.bf16.msra.mxu0 %v542_v1  ;;  %538 = vmatpush3.bf16.msra.mxu1 %v542_v1  ;;  %v40_v21 = vpack.c.bf16 %v31_v17, %v30_v16  ;;  %v32_v24 = vld [vmem:[%s696_s0 + $0x70] sm:$0xff]  ;;  %v33_v25 = vld [vmem:[%s696_s0 + $0x78] sm:$0xff]  ;;  %v37_v26 = vpack.c.bf16 %v25_v23, %v24_v22 }
   0x8   :  { %513 = vmatprep.subr.bf16.mxu0 %v543_v2  ;;  %535 = vmatprep.subr.bf16.mxu1 %v543_v2  ;;  %v41_v27 = vpack.c.bf16 %v33_v25, %v32_v24 }
   0xb   :  { %514 = vmatpush3.bf16.msra.mxu0 %v543_v2  ;;  %539 = vmatpush3.bf16.msra.mxu1 %v543_v2 }
   0xc   :  { %515 = vmatprep.subr.bf16.mxu0 %v544_v8  ;;  %536 = vmatprep.subr.bf16.mxu1 %v544_v8 }
   0xf   :  { %516 = vmatpush3.bf16.msra.mxu0 %v544_v8  ;;  %540 = vmatpush3.bf16.msra.mxu1 %v544_v8 }
  0x12   :  { %518 = vmatmul.mubr.msk.bf16.vlgmr.msra.gmra.mxu0 %vm74_vm0, %v35_v18  ;;  %526 = vmatmul.mubr.msk.bf16.vlgmr.msra.gmra.mxu1 %vm74_vm0, %v39_v19 }
  0x13   :  { %521 = vmatprep.mubr.msk.bf16.mxu0 %vm74_vm0, %v36_v20  ;;  %529 = vmatprep.mubr.msk.bf16.mxu1 %vm74_vm0, %v40_v21 }
  0x1a   :  { %522 = vmatmul.mubr.msk.bf16.gmra.mxu0 %vm74_vm0, %v37_v26  ;;  %530 = vmatmul.mubr.msk.bf16.gmra.mxu1 %vm74_vm0, %v41_v27 }
  0xd2   :  { %v519_v28 = vpop.f32.mrf.mxu0  ;;  %v527_v30 = vpop.f32.mrf.mxu1 }
  0xd4   :  { %v133_v29 = vpop.f32.mrf.mxu0  ;;  %v165_v33 = vpop.f32.mrf.mxu1 }
  0xd6   :  { %v520_v31 = vpop.f32.mrf.mxu0  ;;  %v528_v38 = vpop.f32.mrf.mxu1 }
  0xd8   :  { %v136_v32 = vpop.f32.mrf.mxu0  ;;  %v168_v43 = vpop.f32.mrf.mxu1 }
  0xd9   :  { %v196_v34 = vadd.f32 %v136_v32, %v133_v29 }
  0xda   :  { %v523_v35 = vpop.f32.mrf.mxu0  ;;  %v531_v46 = vpop.f32.mrf.mxu1 }
  0xdb   :  { %v197_v36 = vadd.f32 %v519_v28, %v196_v34 }
  0xdc   :  { %v149_v37 = vpop.f32.mrf.mxu0  ;;  %v181_v49 = vpop.f32.mrf.mxu1 }
  0xdd   :  { %v198_v39 = vadd.f32 %v520_v31, %v197_v36 }
  0xde   :  { %v524_v40 = vpop.f32.mrf.mxu0  ;;  %v532_v52 = vpop.f32.mrf.mxu1 }
  0xdf   :  { %v199_v41 = vadd.f32 %v198_v39, %v149_v37 }
  0xe0   :  { %v152_v42 = vpop.f32.mrf.mxu0  ;;  %v184_v55 = vpop.f32.mrf.mxu1 }
  0xe1   :  { %v200_v44 = vadd.f32 %v199_v41, %v152_v42 }
  0xe3   :  { %v201_v45 = vadd.f32 %v523_v35, %v200_v44 }
  0xe5   :  { %v202_v47 = vadd.f32 %v524_v40, %v201_v45 }
  0xe7   :  { %v203_v48 = vadd.f32 %v202_v47, %v165_v33 }
  0xe9   :  { %v204_v50 = vadd.f32 %v203_v48, %v168_v43 }
  0xeb   :  { %v205_v51 = vadd.f32 %v527_v30, %v204_v50 }
  0xed   :  { %v206_v53 = vadd.f32 %v528_v38, %v205_v51 }
  0xef   :  { %v207_v54 = vadd.f32 %v206_v53, %v181_v49 }
  0xf1   :  { %v208_v56 = vadd.f32 %v207_v54, %v184_v55 }
  0xf3   :  { %v209_v57 = vadd.f32 %v531_v46, %v208_v56 }
  0xf5   :  { %v210_v58 = vadd.f32 %v532_v52, %v209_v57 }
  0xf7   :  { %v211_v59 = vrot.slane %v210_v58, 4 }
  0xf9   :  { %v212_v60 = vadd.f32 %v211_v59, %v210_v58 }
  0xfb   :  { %v213_v61 = vrot.slane %v212_v60, 2 }
  0xfd   :  { %v214_v62 = vadd.f32 %v213_v61, %v212_v60 }
  0xff   :  { %v215_v63 = vrot.slane %v214_v62, 1 }
 0x101   :  { %v216_v0 = vadd.f32 %v215_v63, %v214_v62 }
 0x103   :  { %v217_v1 = vmul.f32 0.0078125, %v216_v0 }
 0x105   :  { %v640_v2 = vsub.f32 %v133_v29, %v217_v1  ;;  %v642_v3 = vsub.f32 %v136_v32, %v217_v1  ;;  %v644_v4 = vsub.f32 %v519_v28, %v217_v1  ;;  %v650_v7 = vsub.f32 %v520_v31, %v217_v1 }
 0x106   :  { %v652_v8 = vsub.f32 %v149_v37, %v217_v1  ;;  %v223_v11 = vsub.f32 %v152_v42, %v217_v1  ;;  %v224_v14 = vsub.f32 %v523_v35, %v217_v1  ;;  %v225_v17 = vsub.f32 %v524_v40, %v217_v1 }
 0x107   :  { %v234_v5 = vmul.f32 %v640_v2, %v640_v2  ;;  %v235_v6 = vmul.f32 %v642_v3, %v642_v3  ;;  %v236_v9 = vmul.f32 %v644_v4, %v644_v4  ;;  %v237_v12 = vmul.f32 %v650_v7, %v650_v7 }
 0x108   :  { %v238_v15 = vmul.f32 %v652_v8, %v652_v8  ;;  %v239_v18 = vmul.f32 %v223_v11, %v223_v11  ;;  %v226_v20 = vsub.f32 %v165_v33, %v217_v1  ;;  %v240_v21 = vmul.f32 %v224_v14, %v224_v14 }
 0x109   :  { %v250_v10 = vadd.f32 %v235_v6, %v234_v5  ;;  %v227_v23 = vsub.f32 %v168_v43, %v217_v1  ;;  %v241_v24 = vmul.f32 %v225_v17, %v225_v17  ;;  %v228_v26 = vsub.f32 %v527_v30, %v217_v1 }
 0x10a   :  { %v242_v27 = vmul.f32 %v226_v20, %v226_v20  ;;  %v229_v29 = vsub.f32 %v528_v38, %v217_v1  ;;  %v230_v34 = vsub.f32 %v181_v49, %v217_v1  ;;  %v231_v37 = vsub.f32 %v184_v55, %v217_v1 }
 0x10b   :  { %v251_v13 = vadd.f32 %v250_v10, %v236_v9  ;;  %v243_v31 = vmul.f32 %v227_v23, %v227_v23  ;;  %v244_v35 = vmul.f32 %v228_v26, %v228_v26  ;;  %v232_v41 = vsub.f32 %v531_v46, %v217_v1 }
 0x10c   :  { %v245_v39 = vmul.f32 %v229_v29, %v229_v29  ;;  %v246_v42 = vmul.f32 %v230_v34, %v230_v34  ;;  %v233_v44 = vsub.f32 %v532_v52, %v217_v1  ;;  %v247_v45 = vmul.f32 %v231_v37, %v231_v37  ;;  %v272_v52 = vld [vmem:[%s697_s2] sm:$0x1] }
 0x10d   :  { %v252_v16 = vadd.f32 %v251_v13, %v237_v12  ;;  %v248_v47 = vmul.f32 %v232_v41, %v232_v41  ;;  %v277_v46 = vlaneseq }
 0x10e   :  { %v249_v30 = vmul.f32 %v233_v44, %v233_v44 }
 0x10f   :  { %v253_v19 = vadd.f32 %v252_v16, %v238_v15  ;;  %v278_v59 = vshrl.u32 %v277_v46, 7  ;;  %v417_v15 = vld [vmem:[%s698_s3] ss:$0 sm:$0xff] }
 0x111   :  { %v254_v22 = vadd.f32 %v253_v19, %v239_v18  ;;  %v279_v60 = vsub.s32 0, %v278_v59 }
 0x113   :  { %v255_v25 = vadd.f32 %v254_v22, %v240_v21 }
 0x115   :  { %v256_v28 = vadd.f32 %v255_v25, %v241_v24 }
 0x117   :  { %v257_v32 = vadd.f32 %v256_v28, %v242_v27 }
 0x119   :  { %v258_v36 = vadd.f32 %v257_v32, %v243_v31 }
 0x11b   :  { %v259_v40 = vadd.f32 %v258_v36, %v244_v35 }
 0x11d   :  { %v260_v33 = vadd.f32 %v259_v40, %v245_v39 }
 0x11f   :  { %v261_v43 = vadd.f32 %v260_v33, %v246_v42 }
 0x121   :  { %v262_v48 = vadd.f32 %v261_v43, %v247_v45 }
 0x123   :  { %v263_v50 = vadd.f32 %v262_v48, %v248_v47 }
 0x125   :  { %v264_v51 = vadd.f32 %v263_v50, %v249_v30 }
 0x127   :  { %v265_v38 = vrot.slane %v264_v51, 4 }
 0x129   :  { %v266_v53 = vadd.f32 %v265_v38, %v264_v51 }
 0x12b   :  { %v267_v54 = vrot.slane %v266_v53, 2 }
 0x12d   :  { %v268_v49 = vadd.f32 %v267_v54, %v266_v53 }
 0x12f   :  { %v269_v56 = vrot.slane %v268_v49, 1 }
 0x131   :  { %v270_v57 = vadd.f32 %v269_v56, %v268_v49 }
 0x133   :  { %v271_v55 = vmul.f32 0.0078125, %v270_v57 }
 0x135   :  { %v273_v58 = vadd.f32 1e-05, %v271_v55 }
 0x137   :  { %545 = vrsqrt.f32 %v273_v58 }
 0x144   :  { %v546_v61 = vpop.eup %545 }
 0x145   :  { %v275_v62 = vmul.f32 %v546_v61, %v272_v52 }
 0x147   :  { %v280_v63 = vrot.slane %v275_v62, %v279_v60 }
 0x149   :  { %v282_v0 = vmul.f32 %v280_v63, %v640_v2  ;;  %v283_v1 = vmul.f32 %v280_v63, %v642_v3  ;;  %v284_v5 = vmul.f32 %v280_v63, %v644_v4  ;;  %v285_v6 = vmul.f32 %v280_v63, %v650_v7 }
 0x14a   :  { %v286_v9 = vmul.f32 %v280_v63, %v652_v8  ;;  %v287_v10 = vmul.f32 %v280_v63, %v223_v11  ;;  %v288_v12 = vmul.f32 %v280_v63, %v224_v14  ;;  %v289_v13 = vmul.f32 %v280_v63, %v225_v17 }
 0x14b   :  { %v290_v16 = vmul.f32 %v280_v63, %v226_v20  ;;  %v291_v18 = vmul.f32 %v280_v63, %v227_v23  ;;  %v292_v19 = vmul.f32 %v280_v63, %v228_v26  ;;  %v293_v21 = vmul.f32 %v280_v63, %v229_v29 }
 0x14c   :  { %v294_v2 = vmul.f32 %v280_v63, %v230_v34  ;;  %v295_v22 = vmul.f32 %v280_v63, %v231_v37  ;;  %v296_v3 = vmul.f32 %v280_v63, %v232_v41  ;;  %v297_v24 = vmul.f32 %v280_v63, %v233_v44 }
 0x14d   :  { %v305_v4 = vadd.f32 %v417_v15, %v282_v0  ;;  %v306_v25 = vadd.f32 %v417_v15, %v283_v1  ;;  %v307_v7 = vadd.f32 %v417_v15, %v284_v5  ;;  %v308_v27 = vadd.f32 %v417_v15, %v285_v6 }
 0x14e   :  { %v309_v8 = vadd.f32 %v417_v15, %v286_v9  ;;  %v310_v11 = vadd.f32 %v417_v15, %v287_v10  ;;  %v311_v14 = vadd.f32 %v417_v15, %v288_v12  ;;  %v312_v17 = vadd.f32 %v417_v15, %v289_v13 }
 0x14f   :  { %v313_v28 = vadd.f32 %v417_v15, %v290_v16  ;;  %v314_v31 = vadd.f32 %v417_v15, %v291_v18  ;;  %v315_v32 = vadd.f32 %v417_v15, %v292_v19  ;;  %v316_v35 = vadd.f32 %v417_v15, %v293_v21 }
 0x150   :  { %v317_v20 = vadd.f32 %v417_v15, %v294_v2  ;;  %v318_v23 = vadd.f32 %v417_v15, %v295_v22  ;;  %v319_v26 = vadd.f32 %v417_v15, %v296_v3  ;;  %v320_v29 = vadd.f32 %v417_v15, %v297_v24 }
 0x151   :  { %v453_v34 = vpack.c.bf16 %v306_v25, %v305_v4  ;;  %v458_v36 = vpack.c.bf16 %v308_v27, %v307_v7  ;;  %v463_v37 = vpack.c.bf16 %v310_v11, %v309_v8  ;;  %v468_v39 = vpack.c.bf16 %v312_v17, %v311_v14 }
 0x152   :  { %v473_v40 = vpack.c.bf16 %v314_v31, %v313_v28  ;;  %v478_v41 = vpack.c.bf16 %v316_v35, %v315_v32  ;;  %v483_v42 = vpack.c.bf16 %v318_v23, %v317_v20  ;;  %v488_v33 = vpack.c.bf16 %v320_v29, %v319_v26 }
 0x153   :  { %454 = vst [vmem:[%s699_s4] sm:$0xff] %v453_v34   ;;  %490 = vst [vmem:[%s699_s4 + $0x8] sm:$0xff] %v458_v36  }
 0x154   :  { %491 = vst [vmem:[%s699_s4 + $0x10] sm:$0xff] %v463_v37   ;;  %492 = vst [vmem:[%s699_s4 + $0x18] sm:$0xff] %v468_v39  }
 0x155   :  { %493 = vst [vmem:[%s699_s4 + $0x20] sm:$0xff] %v473_v40   ;;  %494 = vst [vmem:[%s699_s4 + $0x28] sm:$0xff] %v478_v41  }
 0x156   :  { %495 = vst [vmem:[%s699_s4 + $0x30] sm:$0xff] %v483_v42   ;;  %496 = vst [vmem:[%s699_s4 + $0x38] sm:$0xff] %v488_v33  }

// kernel: basic_block_forward.3
= control target key start
LH: loop header
LB: loop body
LE: loop exit
PB: predicated region body
PF: predicated region fallthrough
CT: control target
= control target key end

     0   :  { %v3704_v0 = vmov 0.0   ;;  %vm3705_vm0 = vmmov 0   ;;  %vm129_vm1 = vcmask 523264   ;;  %s5436_s1 = inlined_call_operand.vmem [shape: bf16[9,64,128], index: 1, kind: input, shape index: {}]   ;;  %s5437_s0 = inlined_call_operand.vmem [shape: f32[4,186,64], index: 0, kind: input, shape index: {}]   ;;  %s5438_s4 = inlined_call_operand.vmem [shape: f32[176,1], index: 4, kind: input, shape index: {}]   ;;  %s5439_s2 = inlined_call_operand.vmem [shape: f32[1,128], index: 2, kind: input, shape index: {}]   ;;  %s5440_s3 = inlined_call_operand.vmem [shape: f32[1,128], index: 3, kind: input, shape index: {}]   ;;  %s5441_s5 = inlined_call_operand.vmem [shape: bf16[176,128], index: 5, kind: output, shape index: {}]  }
   0x1   :  { %3185 = vmatprep.subr.bf16.mxu0 %v3704_v0  ;;  %3653 = vmatprep.subr.bf16.mxu1 %v3704_v0  ;;  %v3666_v1 = vld [vmem:[%s5436_s1 + $0x38] sm:$0xff]   ;;  %v3667_v2 = vld [vmem:[%s5436_s1 + $0x30] sm:$0xff]   ;;  %v3668_v3 = vld [vmem:[%s5436_s1 + $0x28] sm:$0xff]  }
   0x2   :  { %3193 = vmatprep.mubr.msk.bf16.mxu0 %vm3705_vm0, %v3704_v0  ;;  %3217 = vmatprep.mubr.msk.bf16.mxu1 %vm3705_vm0, %v3704_v0  ;;  %v3669_v4 = vld [vmem:[%s5436_s1 + $0x20] sm:$0xff]   ;;  %v2632_v6 = vld [vmem:[%s5437_s0 + $0xc8] sm:$0xff]  ;;  %v3670_v11 = vld [vmem:[%s5436_s1 + $0x58] sm:$0xff]  }
   0x3   :  { %3186 = vmatpush3.bf16.msra.mxu0 %v3666_v1  ;;  %3657 = vmatpush3.bf16.msra.mxu1 %v3666_v1  ;;  %v2631_v5 = vld [vmem:[%s5437_s0 + $0xc0] sm:$0xff]  ;;  %v2644_v8 = vld [vmem:[%s5437_s0 + $0x128] sm:$0xff]  ;;  %v3671_v12 = vld [vmem:[%s5436_s1 + $0x18] sm:$0xff]  }
   0x4   :  { %3187 = vmatprep.subr.bf16.mxu0 %v3704_v0  ;;  %3654 = vmatprep.subr.bf16.mxu1 %v3704_v0  ;;  %v2643_v7 = vld [vmem:[%s5437_s0 + $0x120] sm:$0xff]  ;;  %v85_v9 = vpack.c.bf16 %v2632_v6, %v2631_v5  ;;  %v2633_v13 = vld [vmem:[%s5437_s0 + $0xd0] sm:$0xff]  ;;  %v2634_v14 = vld [vmem:[%s5437_s0 + $0xd8] sm:$0xff] }
   0x5   :  { %v91_v10 = vpack.c.bf16 %v2644_v8, %v2643_v7  ;;  %v2645_v15 = vld [vmem:[%s5437_s0 + $0x130] sm:$0xff]  ;;  %v2646_v16 = vld [vmem:[%s5437_s0 + $0x138] sm:$0xff]  ;;  %v86_v19 = vpack.c.bf16 %v2634_v14, %v2633_v13  ;;  %v3674_v21 = vld [vmem:[%s5436_s1 + $0x48] sm:$0xff]  }
   0x6   :  { %v3672_v17 = vld [vmem:[%s5436_s1 + $0x50] sm:$0xff]   ;;  %v92_v20 = vpack.c.bf16 %v2646_v16, %v2645_v15  ;;  %v3675_v22 = vld [vmem:[%s5436_s1 + $0x8] sm:$0xff]   ;;  %v2635_v23 = vld [vmem:[%s5437_s0 + $0xe0] sm:$0xff] }
   0x7   :  { %3188 = vmatpush3.bf16.msra.mxu0 %v3667_v2  ;;  %3658 = vmatpush3.bf16.msra.mxu1 %v3667_v2  ;;  %v3673_v18 = vld [vmem:[%s5436_s1 + $0x10] sm:$0xff]   ;;  %v2636_v24 = vld [vmem:[%s5437_s0 + $0xe8] sm:$0xff]  ;;  %v2647_v25 = vld [vmem:[%s5437_s0 + $0x140] sm:$0xff] }
   0x8   :  { %3189 = vmatprep.subr.bf16.mxu0 %v3704_v0  ;;  %3655 = vmatprep.subr.bf16.mxu1 %v3704_v0  ;;  %v2648_v26 = vld [vmem:[%s5437_s0 + $0x148] sm:$0xff]  ;;  %v3676_v27 = vld [vmem:[%s5436_s1] sm:$0xff]   ;;  %v87_v29 = vpack.c.bf16 %v2636_v24, %v2635_v23  ;;  %v2637_v31 = vld [vmem:[%s5437_s0 + $0xf0] sm:$0xff] }
   0x9   :  { %v3677_v28 = vld [vmem:[%s5436_s1 + $0x40] sm:$0xff]   ;;  %v93_v30 = vpack.c.bf16 %v2648_v26, %v2647_v25  ;;  %v2638_v32 = vld [vmem:[%s5437_s0 + $0xf8] sm:$0xff]  ;;  %v2649_v33 = vld [vmem:[%s5437_s0 + $0x150] sm:$0xff] }
   0xa   :  { %v2650_v34 = vld [vmem:[%s5437_s0 + $0x158] sm:$0xff]  ;;  %v88_v35 = vpack.c.bf16 %v2638_v32, %v2637_v31  ;;  %v2639_v37 = vld [vmem:[%s5437_s0 + $0x100] sm:$0xff]  ;;  %v2640_v38 = vld [vmem:[%s5437_s0 + $0x108] sm:$0xff] }
   0xb   :  { %3190 = vmatpush3.bf16.msra.mxu0 %v3668_v3  ;;  %3659 = vmatpush3.bf16.msra.mxu1 %v3668_v3  ;;  %v94_v36 = vpack.c.bf16 %v2650_v34, %v2649_v33  ;;  %v2651_v39 = vld [vmem:[%s5437_s0 + $0x160] sm:$0xff]  ;;  %v2652_v40 = vld [vmem:[%s5437_s0 + $0x168] sm:$0xff]  ;;  %v89_v41 = vpack.c.bf16 %v2640_v38, %v2639_v37  ;;  %v2641_v43 = vld [vmem:[%s5437_s0 + $0x110] sm:$0xff] }
   0xc   :  { %3191 = vmatprep.subr.bf16.mxu0 %v3704_v0  ;;  %3656 = vmatprep.subr.bf16.mxu1 %v3704_v0  ;;  %v95_v42 = vpack.c.bf16 %v2652_v40, %v2651_v39  ;;  %v2642_v44 = vld [vmem:[%s5437_s0 + $0x118] sm:$0xff]  ;;  %v21_v45 = vld [vmem:[%s5437_s0] sm:$0xff]  ;;  %v22_v46 = vld [vmem:[%s5437_s0 + $0x8] sm:$0xff] }
   0xd   :  { %v90_v47 = vpack.c.bf16 %v2642_v44, %v2641_v43  ;;  %v43_v48 = vpack.c.bf16 %v22_v46, %v21_v45  ;;  %v3678_v49 = vld [vmem:[%s5436_s1 + $0x78] sm:$0xff]   ;;  %v23_v50 = vld [vmem:[%s5437_s0 + $0x10] sm:$0xff]  ;;  %v462_v52 = vld [vmem:[%s5437_s0 + $0x1] sm:$0xff] }
   0xe   :  { %v24_v51 = vld [vmem:[%s5437_s0 + $0x18] sm:$0xff]  ;;  %v3918_v53 = vld [vmem:[%s5437_s0 + $0x9] sm:$0xff]  ;;  %v25_v59 = vld [vmem:[%s5437_s0 + $0x20] sm:$0xff] }
   0xf   :  { %3192 = vmatpush3.bf16.msra.mxu0 %v3669_v4  ;;  %3660 = vmatpush3.bf16.msra.mxu1 %v3669_v4  ;;  %v3680_v54 = vld [vmem:[%s5436_s1 + $0x70] sm:$0xff]   ;;  %v44_v55 = vpack.c.bf16 %v24_v51, %v23_v50  ;;  %v484_v56 = vpack.c.bf16 %v3918_v53, %v462_v52  ;;  %v3679_v57 = vld [vmem:[%s5436_s1 + $0x98] sm:$0xff]   ;;  %v3682_v58 = vld [vmem:[%s5436_s1 + $0x68] sm:$0xff]  }
  0x10   :  { %3289 = vmatprep.subr.bf16.mxu0 %v3704_v0  ;;  %3237 = vmatprep.subr.bf16.mxu1 %v3704_v0  ;;  %v26_v60 = vld [vmem:[%s5437_s0 + $0x28] sm:$0xff]  ;;  %v3945_v61 = vld [vmem:[%s5437_s0 + $0x11] sm:$0xff]  ;;  %v3950_v62 = vld [vmem:[%s5437_s0 + $0x19] sm:$0xff] }
  0x11   :  { %v3681_v63 = vld [vmem:[%s5436_s1 + $0x90] sm:$0xff]   ;;  %v3684_v1 = vld [vmem:[%s5436_s1 + $0x60] sm:$0xff]   ;;  %v45_v2 = vpack.c.bf16 %v26_v60, %v25_v59  ;;  %v485_v3 = vpack.c.bf16 %v3950_v62, %v3945_v61  ;;  %v3683_v4 = vld [vmem:[%s5436_s1 + $0x88] sm:$0xff]  }
  0x12   :  { %3194 = vmatmul.mubr.msk.bf16.vlgmr.msra.gmra.mxu0 %vm129_vm1, %v85_v9  ;;  %3218 = vmatmul.mubr.msk.bf16.vlgmr.msra.gmra.mxu1 %vm129_vm1, %v91_v10  ;;  %v27_v5 = vld [vmem:[%s5437_s0 + $0x30] sm:$0xff]  ;;  %v28_v6 = vld [vmem:[%s5437_s0 + $0x38] sm:$0xff]  ;;  %v3983_v7 = vld [vmem:[%s5437_s0 + $0x21] sm:$0xff] }
  0x13   :  { %3290 = vmatpush3.bf16.msra.mxu0 %v3670_v11  ;;  %3197 = vmatprep.mubr.msk.bf16.mxu0 %vm3705_vm0, %v3704_v0  ;;  %v3988_v8 = vld [vmem:[%s5437_s0 + $0x29] sm:$0xff]  ;;  %v3685_v9 = vld [vmem:[%s5436_s1 + $0x80] sm:$0xff]   ;;  %v46_v10 = vpack.c.bf16 %v28_v6, %v27_v5  ;;  %v4013_v14 = vld [vmem:[%s5437_s0 + $0x31] sm:$0xff] }
  0x14   :  { %3221 = vmatprep.mubr.msk.bf16.mxu1 %vm3705_vm0, %v3704_v0  ;;  %3238 = vmatpush3.bf16.msra.mxu1 %v3671_v12  ;;  %v486_v11 = vpack.c.bf16 %v3988_v8, %v3983_v7  ;;  %v29_v12 = vld [vmem:[%s5437_s0 + $0x40] sm:$0xff]  ;;  %v30_v13 = vld [vmem:[%s5437_s0 + $0x48] sm:$0xff]  ;;  %v4061_v26 = vld [vmem:[%s5437_s0 + $0x51] sm:$0xff] }
  0x15   :  { %3291 = vmatprep.subr.bf16.mxu0 %v3704_v0  ;;  %3239 = vmatprep.subr.bf16.mxu1 %v3704_v0  ;;  %v4018_v15 = vld [vmem:[%s5437_s0 + $0x39] sm:$0xff]  ;;  %v47_v16 = vpack.c.bf16 %v30_v13, %v29_v12  ;;  %v34_v25 = vld [vmem:[%s5437_s0 + $0x68] sm:$0xff]  ;;  %v4109_v38 = vld [vmem:[%s5437_s0 + $0x71] sm:$0xff] }
  0x16   :  { %v33_v24 = vld [vmem:[%s5437_s0 + $0x60] sm:$0xff]  ;;  %v36_v31 = vld [vmem:[%s5437_s0 + $0x78] sm:$0xff]  ;;  %v4090_v33 = vld [vmem:[%s5437_s0 + $0x69] sm:$0xff] }
  0x17   :  { %3292 = vmatpush3.bf16.msra.mxu0 %v3672_v17  ;;  %v487_v17 = vpack.c.bf16 %v4018_v15, %v4013_v14  ;;  %v4085_v32 = vld [vmem:[%s5437_s0 + $0x61] sm:$0xff]  ;;  %v4114_v39 = vld [vmem:[%s5437_s0 + $0x79] sm:$0xff]  ;;  %v4138_v45 = vld [vmem:[%s5437_s0 + $0x89] sm:$0xff] }
  0x18   :  { %3240 = vmatpush3.bf16.msra.mxu1 %v3673_v18  ;;  %3293 = vmatprep.subr.bf16.mxu0 %v3704_v0  ;;  %v31_v18 = vld [vmem:[%s5437_s0 + $0x50] sm:$0xff]  ;;  %v38_v37 = vld [vmem:[%s5437_s0 + $0x88] sm:$0xff]  ;;  %v40_v43 = vld [vmem:[%s5437_s0 + $0x98] sm:$0xff] }
  0x19   :  { %3241 = vmatprep.subr.bf16.mxu1 %v3704_v0  ;;  %v4133_v44 = vld [vmem:[%s5437_s0 + $0x81] sm:$0xff]  ;;  %v4157_v50 = vld [vmem:[%s5437_s0 + $0x91] sm:$0xff]  ;;  %v4162_v51 = vld [vmem:[%s5437_s0 + $0x99] sm:$0xff] }
  0x1a   :  { %3198 = vmatmul.mubr.msk.bf16.gmra.mxu0 %vm129_vm1, %v86_v19  ;;  %3222 = vmatmul.mubr.msk.bf16.gmra.mxu1 %vm129_vm1, %v92_v20  ;;  %v32_v19 = vld [vmem:[%s5437_s0 + $0x58] sm:$0xff]  ;;  %v4037_v20 = vld [vmem:[%s5437_s0 + $0x41] sm:$0xff]  ;;  %v3688_v5 = vld [vmem:[%s5436_s1 + $0xb0] sm:$0xff]  }
  0x1b   :  { %3201 = vmatprep.mubr.msk.bf16.mxu0 %vm3705_vm0, %v3704_v0  ;;  %3225 = vmatprep.mubr.msk.bf16.mxu1 %vm3705_vm0, %v3704_v0  ;;  %v2718_v12 = vld [vmem:[%s5437_s0 + $0x1a0] sm:$0xff]  ;;  %v2719_v13 = vld [vmem:[%s5437_s0 + $0x1a8] sm:$0xff] }
  0x1c   :  { %3294 = vmatpush3.bf16.msra.mxu0 %v3674_v21  ;;  %3242 = vmatpush3.bf16.msra.mxu1 %v3675_v22  ;;  %v4042_v21 = vld [vmem:[%s5437_s0 + $0x49] sm:$0xff]  ;;  %v48_v22 = vpack.c.bf16 %v32_v19, %v31_v18  ;;  %v3692_v19 = vld [vmem:[%s5436_s1 + $0xa0] sm:$0xff]  }
  0x1d   :  { %3243 = vmatprep.subr.bf16.mxu1 %v3704_v0  ;;  %3295 = vmatprep.subr.bf16.mxu0 %v3704_v0  ;;  %v488_v23 = vpack.c.bf16 %v4042_v21, %v4037_v20  ;;  %v3689_v18 = vld [vmem:[%s5436_s1 + $0xd0] sm:$0xff]  }
  0x20   :  { %3244 = vmatpush3.bf16.msra.mxu1 %v3676_v27  ;;  %3296 = vmatpush3.bf16.msra.mxu0 %v3677_v28  ;;  %v4066_v27 = vld [vmem:[%s5437_s0 + $0x59] sm:$0xff]  ;;  %v49_v28 = vpack.c.bf16 %v34_v25, %v33_v24  ;;  %v3691_v24 = vld [vmem:[%s5436_s1 + $0xc8] sm:$0xff]   ;;  %v2720_v25 = vld [vmem:[%s5437_s0 + $0x1b0] sm:$0xff] }
  0x21   :  { %3341 = vmatprep.subr.bf16.mxu1 %v3704_v0  ;;  %3393 = vmatprep.subr.bf16.mxu0 %v3704_v0 }
  0x22   :  { %3202 = vmatmul.mubr.msk.bf16.gmra.mxu0 %vm129_vm1, %v87_v29  ;;  %3226 = vmatmul.mubr.msk.bf16.gmra.mxu1 %vm129_vm1, %v93_v30  ;;  %v489_v29 = vpack.c.bf16 %v4066_v27, %v4061_v26  ;;  %v35_v30 = vld [vmem:[%s5437_s0 + $0x70] sm:$0xff] }
  0x23   :  { %3205 = vmatprep.mubr.msk.bf16.mxu0 %vm3705_vm0, %v3704_v0  ;;  %3229 = vmatprep.mubr.msk.bf16.mxu1 %vm3705_vm0, %v3704_v0  ;;  %v50_v34 = vpack.c.bf16 %v36_v31, %v35_v30  ;;  %v2764_v30 = vld [vmem:[%s5437_s0 + $0x268] sm:$0xff]  ;;  %v3693_v31 = vld [vmem:[%s5436_s1 + $0xc0] sm:$0xff]  }
  0x2a   :  { %3206 = vmatmul.mubr.msk.bf16.gmra.mxu0 %vm129_vm1, %v88_v35  ;;  %3230 = vmatmul.mubr.msk.bf16.gmra.mxu1 %vm129_vm1, %v94_v36  ;;  %v490_v35 = vpack.c.bf16 %v4090_v33, %v4085_v32  ;;  %v37_v36 = vld [vmem:[%s5437_s0 + $0x80] sm:$0xff] }
  0x2b   :  { %3209 = vmatprep.mubr.msk.bf16.mxu0 %vm3705_vm0, %v3704_v0  ;;  %3233 = vmatprep.mubr.msk.bf16.mxu1 %vm3705_vm0, %v3704_v0  ;;  %v51_v40 = vpack.c.bf16 %v38_v37, %v37_v36  ;;  %v2722_v36 = vld [vmem:[%s5437_s0 + $0x1c0] sm:$0xff]  ;;  %v2723_v37 = vld [vmem:[%s5437_s0 + $0x1c8] sm:$0xff] }
  0x32   :  { %3210 = vmatmul.mubr.msk.bf16.gmra.mxu0 %vm129_vm1, %v89_v41  ;;  %3234 = vmatmul.mubr.msk.bf16.gmra.mxu1 %vm129_vm1, %v95_v42  ;;  %v491_v41 = vpack.c.bf16 %v4114_v39, %v4109_v38  ;;  %v39_v42 = vld [vmem:[%s5437_s0 + $0x90] sm:$0xff] }
  0x33   :  { %3213 = vmatprep.mubr.msk.bf16.mxu0 %vm3705_vm0, %v3704_v0  ;;  %3245 = vmatprep.mubr.msk.bf16.mxu1 %vm3705_vm0, %v3704_v0  ;;  %v52_v46 = vpack.c.bf16 %v40_v43, %v39_v42  ;;  %v731_v42 = vpack.c.bf16 %v2723_v37, %v2722_v36 }
  0x3a   :  { %3214 = vmatmul.mubr.msk.bf16.gmra.mxu0 %vm129_vm1, %v90_v47  ;;  %3246 = vmatmul.mubr.msk.bf16.vlgmr.msra.gmra.mxu1 %vm129_vm1, %v43_v48  ;;  %v492_v47 = vpack.c.bf16 %v4138_v45, %v4133_v44  ;;  %v41_v48 = vld [vmem:[%s5437_s0 + $0xa0] sm:$0xff] }
  0x3b   :  { %3249 = vmatprep.mubr.msk.bf16.mxu1 %vm3705_vm0, %v3704_v0  ;;  %3297 = vmatprep.mubr.msk.bf16.mxu0 %vm3705_vm0, %v3704_v0 }
  0x3c   :  { %3342 = vmatpush3.bf16.msra.mxu1 %v3678_v49  ;;  %v42_v49 = vld [vmem:[%s5437_s0 + $0xa8] sm:$0xff] }
  0x3d   :  { %3343 = vmatprep.subr.bf16.mxu1 %v3704_v0  ;;  %v53_v52 = vpack.c.bf16 %v42_v49, %v41_v48  ;;  %v2767_v48 = vld [vmem:[%s5437_s0 + $0x280] sm:$0xff]  ;;  %v2768_v49 = vld [vmem:[%s5437_s0 + $0x288] sm:$0xff] }
  0x40   :  { %3344 = vmatpush3.bf16.msra.mxu1 %v3680_v54  ;;  %v493_v54 = vpack.c.bf16 %v4162_v51, %v4157_v50 }
  0x41   :  { %3345 = vmatprep.subr.bf16.mxu1 %v3704_v0 }
  0x42   :  { %3250 = vmatmul.mubr.msk.bf16.gmra.mxu1 %vm129_vm1, %v44_v55  ;;  %3298 = vmatmul.mubr.msk.bf16.vlgmr.msra.gmra.mxu0 %vm129_vm1, %v484_v56  ;;  %v4171_v55 = vld [vmem:[%s5437_s0 + $0xa1] sm:$0xff]  ;;  %v4180_v56 = vld [vmem:[%s5437_s0 + $0xa9] sm:$0xff] }
  0x43   :  { %3394 = vmatpush3.bf16.msra.mxu0 %v3679_v57  ;;  %3253 = vmatprep.mubr.msk.bf16.mxu1 %vm3705_vm0, %v3704_v0  ;;  %v2714_v57 = vld [vmem:[%s5437_s0 + $0x180] sm:$0xff]  ;;  %v494_v59 = vpack.c.bf16 %v4180_v56, %v4171_v55 }
  0x44   :  { %3301 = vmatprep.mubr.msk.bf16.mxu0 %vm3705_vm0, %v3704_v0  ;;  %3395 = vmatprep.subr.bf16.mxu0 %v3704_v0 }
  0x45   :  { %3346 = vmatpush3.bf16.msra.mxu1 %v3682_v58  ;;  %v2715_v58 = vld [vmem:[%s5437_s0 + $0x188] sm:$0xff] }
  0x46   :  { %3347 = vmatprep.subr.bf16.mxu1 %v3704_v0  ;;  %v727_v60 = vpack.c.bf16 %v2715_v58, %v2714_v57  ;;  %v2726_v57 = vld [vmem:[%s5437_s0 + $0x1e0] sm:$0xff]  ;;  %v2727_v58 = vld [vmem:[%s5437_s0 + $0x1e8] sm:$0xff] }
  0x47   :  { %3396 = vmatpush3.bf16.msra.mxu0 %v3681_v63  ;;  %v3686_v63 = vld [vmem:[%s5436_s1 + $0xb8] sm:$0xff]  }
  0x48   :  { %3397 = vmatprep.subr.bf16.mxu0 %v3704_v0 }
  0x49   :  { %3348 = vmatpush3.bf16.msra.mxu1 %v3684_v1  ;;  %v2716_v1 = vld [vmem:[%s5437_s0 + $0x190] sm:$0xff] }
  0x4a   :  { %3254 = vmatmul.mubr.msk.bf16.gmra.mxu1 %vm129_vm1, %v45_v2  ;;  %3302 = vmatmul.mubr.msk.bf16.gmra.mxu0 %vm129_vm1, %v485_v3  ;;  %v2717_v2 = vld [vmem:[%s5437_s0 + $0x198] sm:$0xff]  ;;  %v2759_v3 = vld [vmem:[%s5437_s0 + $0x240] sm:$0xff] }
  0x4b   :  { %3257 = vmatprep.mubr.msk.bf16.mxu1 %vm3705_vm0, %v3704_v0  ;;  %3305 = vmatprep.mubr.msk.bf16.mxu0 %vm3705_vm0, %v3704_v0  ;;  %v728_v6 = vpack.c.bf16 %v2717_v2, %v2716_v1  ;;  %v2728_v2 = vld [vmem:[%s5437_s0 + $0x1f0] sm:$0xff] }
  0x4c   :  { %3398 = vmatpush3.bf16.msra.mxu0 %v3683_v4  ;;  %3445 = vmatprep.subr.bf16.mxu1 %v3704_v0  ;;  %v2760_v4 = vld [vmem:[%s5437_s0 + $0x248] sm:$0xff] }
  0x4d   :  { %3399 = vmatprep.subr.bf16.mxu0 %v3704_v0 }
  0x50   :  { %3400 = vmatpush3.bf16.msra.mxu0 %v3685_v9  ;;  %v970_v9 = vpack.c.bf16 %v2760_v4, %v2759_v3  ;;  %v2729_v3 = vld [vmem:[%s5437_s0 + $0x1f8] sm:$0xff]  ;;  %v2771_v4 = vld [vmem:[%s5437_s0 + $0x2a0] sm:$0xff] }
  0x51   :  { %3497 = vmatprep.subr.bf16.mxu0 %v3704_v0 }
  0x52   :  { %3258 = vmatmul.mubr.msk.bf16.gmra.mxu1 %vm129_vm1, %v46_v10  ;;  %3306 = vmatmul.mubr.msk.bf16.gmra.mxu0 %vm129_vm1, %v486_v11  ;;  %v3687_v10 = vld [vmem:[%s5436_s1 + $0xd8] sm:$0xff]   ;;  %v3690_v11 = vld [vmem:[%s5436_s1 + $0xa8] sm:$0xff]  }
  0x53   :  { %3261 = vmatprep.mubr.msk.bf16.mxu1 %vm3705_vm0, %v3704_v0  ;;  %3309 = vmatprep.mubr.msk.bf16.mxu0 %vm3705_vm0, %v3704_v0 }
  0x5a   :  { %3262 = vmatmul.mubr.msk.bf16.gmra.mxu1 %vm129_vm1, %v47_v16  ;;  %3310 = vmatmul.mubr.msk.bf16.gmra.mxu0 %vm129_vm1, %v487_v17  ;;  %v2761_v16 = vld [vmem:[%s5437_s0 + $0x250] sm:$0xff]  ;;  %v2762_v17 = vld [vmem:[%s5437_s0 + $0x258] sm:$0xff] }
  0x5b   :  { %3265 = vmatprep.mubr.msk.bf16.mxu1 %vm3705_vm0, %v3704_v0  ;;  %3313 = vmatprep.mubr.msk.bf16.mxu0 %vm3705_vm0, %v3704_v0 }
  0x62   :  { %3266 = vmatmul.mubr.msk.bf16.gmra.mxu1 %vm129_vm1, %v48_v22  ;;  %3314 = vmatmul.mubr.msk.bf16.gmra.mxu0 %vm129_vm1, %v488_v23  ;;  %v729_v22 = vpack.c.bf16 %v2719_v13, %v2718_v12  ;;  %v971_v23 = vpack.c.bf16 %v2762_v17, %v2761_v16  ;;  %v2773_v12 = vld [vmem:[%s5437_s0 + $0x2b0] sm:$0xff]  ;;  %v2774_v13 = vld [vmem:[%s5437_s0 + $0x2b8] sm:$0xff] }
  0x63   :  { %3269 = vmatprep.mubr.msk.bf16.mxu1 %vm3705_vm0, %v3704_v0  ;;  %3317 = vmatprep.mubr.msk.bf16.mxu0 %vm3705_vm0, %v3704_v0  ;;  %v977_v17 = vpack.c.bf16 %v2774_v13, %v2773_v12 }
  0x6a   :  { %3270 = vmatmul.mubr.msk.bf16.gmra.mxu1 %vm129_vm1, %v49_v28  ;;  %3318 = vmatmul.mubr.msk.bf16.gmra.mxu0 %vm129_vm1, %v489_v29  ;;  %v2721_v28 = vld [vmem:[%s5437_s0 + $0x1b8] sm:$0xff]  ;;  %v2763_v29 = vld [vmem:[%s5437_s0 + $0x260] sm:$0xff] }
  0x6b   :  { %3273 = vmatprep.mubr.msk.bf16.mxu1 %vm3705_vm0, %v3704_v0  ;;  %3321 = vmatprep.mubr.msk.bf16.mxu0 %vm3705_vm0, %v3704_v0 }
  0x72   :  { %3274 = vmatmul.mubr.msk.bf16.gmra.mxu1 %vm129_vm1, %v50_v34  ;;  %3322 = vmatmul.mubr.msk.bf16.gmra.mxu0 %vm129_vm1, %v490_v35  ;;  %v730_v34 = vpack.c.bf16 %v2721_v28, %v2720_v25  ;;  %v972_v35 = vpack.c.bf16 %v2764_v30, %v2763_v29  ;;  %v2776_v25 = vld [vmem:[%s5437_s0 + $0x2c8] sm:$0xff] }
  0x73   :  { %3277 = vmatprep.mubr.msk.bf16.mxu1 %vm3705_vm0, %v3704_v0  ;;  %3325 = vmatprep.mubr.msk.bf16.mxu0 %vm3705_vm0, %v3704_v0 }
  0x7a   :  { %3278 = vmatmul.mubr.msk.bf16.gmra.mxu1 %vm129_vm1, %v51_v40  ;;  %3326 = vmatmul.mubr.msk.bf16.gmra.mxu0 %vm129_vm1, %v491_v41  ;;  %v2765_v40 = vld [vmem:[%s5437_s0 + $0x270] sm:$0xff]  ;;  %v2766_v41 = vld [vmem:[%s5437_s0 + $0x278] sm:$0xff] }
  0x7b   :  { %3281 = vmatprep.mubr.msk.bf16.mxu1 %vm3705_vm0, %v3704_v0  ;;  %3329 = vmatprep.mubr.msk.bf16.mxu0 %vm3705_vm0, %v3704_v0  ;;  %v973_v43 = vpack.c.bf16 %v2766_v41, %v2765_v40 }
  0x82   :  { %3282 = vmatmul.mubr.msk.bf16.gmra.mxu1 %vm129_vm1, %v52_v46  ;;  %3330 = vmatmul.mubr.msk.bf16.gmra.mxu0 %vm129_vm1, %v492_v47  ;;  %v2724_v46 = vld [vmem:[%s5437_s0 + $0x1d0] sm:$0xff]  ;;  %v2725_v47 = vld [vmem:[%s5437_s0 + $0x1d8] sm:$0xff] }
  0x83   :  { %3285 = vmatprep.mubr.msk.bf16.mxu1 %vm3705_vm0, %v3704_v0  ;;  %3333 = vmatprep.mubr.msk.bf16.mxu0 %vm3705_vm0, %v3704_v0 }
  0x8a   :  { %3286 = vmatmul.mubr.msk.bf16.gmra.mxu1 %vm129_vm1, %v53_v52  ;;  %3334 = vmatmul.mubr.msk.bf16.gmra.mxu0 %vm129_vm1, %v493_v54  ;;  %v732_v52 = vpack.c.bf16 %v2725_v47, %v2724_v46  ;;  %v974_v54 = vpack.c.bf16 %v2768_v49, %v2767_v48  ;;  %v2777_v46 = vld [vmem:[%s5437_s0 + $0x2d0] sm:$0xff]  ;;  %v2778_v47 = vld [vmem:[%s5437_s0 + $0x2d8] sm:$0xff] }
  0x8b   :  { %3337 = vmatprep.mubr.msk.bf16.mxu0 %vm3705_vm0, %v3704_v0  ;;  %3349 = vmatprep.mubr.msk.bf16.mxu1 %vm3705_vm0, %v3704_v0 }
  0x92   :  { %3338 = vmatmul.mubr.msk.bf16.gmra.mxu0 %vm129_vm1, %v494_v59  ;;  %3350 = vmatmul.mubr.msk.bf16.vlgmr.msra.gmra.mxu1 %vm129_vm1, %v727_v60  ;;  %v2769_v59 = vld [vmem:[%s5437_s0 + $0x290] sm:$0xff]  ;;  %v2770_v60 = vld [vmem:[%s5437_s0 + $0x298] sm:$0xff] }
  0x93   :  { %3353 = vmatprep.mubr.msk.bf16.mxu1 %vm3705_vm0, %v3704_v0  ;;  %3401 = vmatprep.mubr.msk.bf16.mxu0 %vm3705_vm0, %v3704_v0  ;;  %v975_v1 = vpack.c.bf16 %v2770_v60, %v2769_v59 }
  0x94   :  { %3446 = vmatpush3.bf16.msra.mxu1 %v3686_v63  ;;  %v733_v63 = vpack.c.bf16 %v2727_v58, %v2726_v57  ;;  %v979_v58 = vpack.c.bf16 %v2778_v47, %v2777_v46  ;;  %v3695_v46 = vld [vmem:[%s5436_s1 + $0x118] sm:$0xff]  }
  0x95   :  { %3447 = vmatprep.subr.bf16.mxu1 %v3704_v0 }
  0x98   :  { %3448 = vmatpush3.bf16.msra.mxu1 %v3688_v5  ;;  %v2772_v5 = vld [vmem:[%s5437_s0 + $0x2a8] sm:$0xff] }
  0x99   :  { %3449 = vmatprep.subr.bf16.mxu1 %v3704_v0 }
  0x9a   :  { %3354 = vmatmul.mubr.msk.bf16.gmra.mxu1 %vm129_vm1, %v728_v6  ;;  %3402 = vmatmul.mubr.msk.bf16.vlgmr.msra.gmra.mxu0 %vm129_vm1, %v970_v9  ;;  %v734_v6 = vpack.c.bf16 %v2729_v3, %v2728_v2  ;;  %v976_v9 = vpack.c.bf16 %v2772_v5, %v2771_v4  ;;  %v2779_v2 = vld [vmem:[%s5437_s0 + $0x2e0] sm:$0xff]  ;;  %v2780_v3 = vld [vmem:[%s5437_s0 + $0x2e8] sm:$0xff] }
  0x9b   :  { %3498 = vmatpush3.bf16.msra.mxu0 %v3687_v10  ;;  %3357 = vmatprep.mubr.msk.bf16.mxu1 %vm3705_vm0, %v3704_v0  ;;  %v2730_v10 = vld [vmem:[%s5437_s0 + $0x200] sm:$0xff]  ;;  %v2805_v5 = vld [vmem:[%s5437_s0 + $0x189] sm:$0xff]  ;;  %v980_v12 = vpack.c.bf16 %v2780_v3, %v2779_v2 }
  0x9c   :  { %3405 = vmatprep.mubr.msk.bf16.mxu0 %vm3705_vm0, %v3704_v0  ;;  %3499 = vmatprep.subr.bf16.mxu0 %v3704_v0  ;;  %v2804_v4 = vld [vmem:[%s5437_s0 + $0x181] sm:$0xff] }
  0x9d   :  { %3450 = vmatpush3.bf16.msra.mxu1 %v3690_v11  ;;  %v2731_v11 = vld [vmem:[%s5437_s0 + $0x208] sm:$0xff]  ;;  %v1212_v13 = vpack.c.bf16 %v2805_v5, %v2804_v4  ;;  %v3700_v3 = vld [vmem:[%s5436_s1 + $0xe0] sm:$0xff]  }
  0x9e   :  { %3451 = vmatprep.subr.bf16.mxu1 %v3704_v0  ;;  %v735_v16 = vpack.c.bf16 %v2731_v11, %v2730_v10 }
  0x9f   :  { %3500 = vmatpush3.bf16.msra.mxu0 %v3689_v18 }
  0xa0   :  { %3501 = vmatprep.subr.bf16.mxu0 %v3704_v0 }
  0xa1   :  { %3452 = vmatpush3.bf16.msra.mxu1 %v3692_v19 }
  0xa2   :  { %3358 = vmatmul.mubr.msk.bf16.gmra.mxu1 %vm129_vm1, %v729_v22  ;;  %3406 = vmatmul.mubr.msk.bf16.gmra.mxu0 %vm129_vm1, %v971_v23  ;;  %v2732_v22 = vld [vmem:[%s5437_s0 + $0x210] sm:$0xff]  ;;  %v2733_v23 = vld [vmem:[%s5437_s0 + $0x218] sm:$0xff] }
  0xa3   :  { %3361 = vmatprep.mubr.msk.bf16.mxu1 %vm3705_vm0, %v3704_v0  ;;  %3409 = vmatprep.mubr.msk.bf16.mxu0 %vm3705_vm0, %v3704_v0 }
  0xa4   :  { %3502 = vmatpush3.bf16.msra.mxu0 %v3691_v24  ;;  %3549 = vmatprep.subr.bf16.mxu1 %v3704_v0  ;;  %v2775_v24 = vld [vmem:[%s5437_s0 + $0x2c0] sm:$0xff] }
  0xa5   :  { %3503 = vmatprep.subr.bf16.mxu0 %v3704_v0 }
  0xa8   :  { %3504 = vmatpush3.bf16.msra.mxu0 %v3693_v31 }
  0xa9   :  { %3601 = vmatprep.subr.bf16.mxu0 %v3704_v0 }
  0xaa   :  { %3362 = vmatmul.mubr.msk.bf16.gmra.mxu1 %vm129_vm1, %v730_v34  ;;  %3410 = vmatmul.mubr.msk.bf16.gmra.mxu0 %vm129_vm1, %v972_v35  ;;  %v736_v34 = vpack.c.bf16 %v2733_v23, %v2732_v22  ;;  %v978_v35 = vpack.c.bf16 %v2776_v25, %v2775_v24  ;;  %v3694_v22 = vld [vmem:[%s5436_s1 + $0xf8] sm:$0xff]  }
  0xab   :  { %3365 = vmatprep.mubr.msk.bf16.mxu1 %vm3705_vm0, %v3704_v0  ;;  %3413 = vmatprep.mubr.msk.bf16.mxu0 %vm3705_vm0, %v3704_v0  ;;  %v2806_v25 = vld [vmem:[%s5437_s0 + $0x191] sm:$0xff] }
  0xb2   :  { %3366 = vmatmul.mubr.msk.bf16.gmra.mxu1 %vm129_vm1, %v731_v42  ;;  %3414 = vmatmul.mubr.msk.bf16.gmra.mxu0 %vm129_vm1, %v973_v43  ;;  %v2734_v42 = vld [vmem:[%s5437_s0 + $0x220] sm:$0xff]  ;;  %v2735_v43 = vld [vmem:[%s5437_s0 + $0x228] sm:$0xff] }
  0xb3   :  { %3369 = vmatprep.mubr.msk.bf16.mxu1 %vm3705_vm0, %v3704_v0  ;;  %3417 = vmatprep.mubr.msk.bf16.mxu0 %vm3705_vm0, %v3704_v0  ;;  %v737_v57 = vpack.c.bf16 %v2735_v43, %v2734_v42  ;;  %v1454_v43 = vpack.c.bf16 %v3945_v61, %v3918_v53  ;;  %v2808_v53 = vld [vmem:[%s5437_s0 + $0x1a1] sm:$0xff]  ;;  %v2809_v61 = vld [vmem:[%s5437_s0 + $0x1a9] sm:$0xff] }
  0xba   :  { %3370 = vmatmul.mubr.msk.bf16.gmra.mxu1 %vm129_vm1, %v732_v52  ;;  %3418 = vmatmul.mubr.msk.bf16.gmra.mxu0 %vm129_vm1, %v974_v54 }
  0xbb   :  { %3373 = vmatprep.mubr.msk.bf16.mxu1 %vm3705_vm0, %v3704_v0  ;;  %3421 = vmatprep.mubr.msk.bf16.mxu0 %vm3705_vm0, %v3704_v0 }
  0xc2   :  { %3374 = vmatmul.mubr.msk.bf16.gmra.mxu1 %vm129_vm1, %v733_v63  ;;  %3422 = vmatmul.mubr.msk.bf16.gmra.mxu0 %vm129_vm1, %v975_v1 }
  0xc3   :  { %3377 = vmatprep.mubr.msk.bf16.mxu1 %vm3705_vm0, %v3704_v0  ;;  %3425 = vmatprep.mubr.msk.bf16.mxu0 %vm3705_vm0, %v3704_v0 }
  0xca   :  { %3378 = vmatmul.mubr.msk.bf16.gmra.mxu1 %vm129_vm1, %v734_v6  ;;  %3426 = vmatmul.mubr.msk.bf16.gmra.mxu0 %vm129_vm1, %v976_v9 }
  0xcb   :  { %3381 = vmatprep.mubr.msk.bf16.mxu1 %vm3705_vm0, %v3704_v0  ;;  %3429 = vmatprep.mubr.msk.bf16.mxu0 %vm3705_vm0, %v3704_v0 }
  0xd2   :  { %v4366_v18 = vpop.f32.mrf.mxu0  ;;  %v4368_v19 = vpop.f32.mrf.mxu1  ;;  %3382 = vmatmul.mubr.msk.bf16.gmra.mxu1 %vm129_vm1, %v735_v16  ;;  %3430 = vmatmul.mubr.msk.bf16.gmra.mxu0 %vm129_vm1, %v977_v17 }
  0xd3   :  { %3385 = vmatprep.mubr.msk.bf16.mxu1 %vm3705_vm0, %v3704_v0  ;;  %3433 = vmatprep.mubr.msk.bf16.mxu0 %vm3705_vm0, %v3704_v0 }
  0xd4   :  { %v3195_v28 = vpop.f32.mrf.mxu0  ;;  %v3219_v29 = vpop.f32.mrf.mxu1 }
  0xd5   :  { %v2807_v28 = vld [vmem:[%s5437_s0 + $0x199] sm:$0xff] }
  0xd6   :  { %v4388_v30 = vpop.f32.mrf.mxu0  ;;  %v4390_v31 = vpop.f32.mrf.mxu1  ;;  %v1213_v42 = vpack.c.bf16 %v2807_v28, %v2806_v25  ;;  %v2811_v25 = vld [vmem:[%s5437_s0 + $0x1b9] sm:$0xff] }
  0xd8   :  { %v3196_v36 = vpop.f32.mrf.mxu0  ;;  %v3220_v37 = vpop.f32.mrf.mxu1 }
  0xda   :  { %v4392_v40 = vpop.f32.mrf.mxu0  ;;  %v4394_v41 = vpop.f32.mrf.mxu1  ;;  %3386 = vmatmul.mubr.msk.bf16.gmra.mxu1 %vm129_vm1, %v736_v34  ;;  %3434 = vmatmul.mubr.msk.bf16.gmra.mxu0 %vm129_vm1, %v978_v35  ;;  %v3696_v35 = vld [vmem:[%s5436_s1 + $0xf0] sm:$0xff]  }
  0xdb   :  { %3389 = vmatprep.mubr.msk.bf16.mxu1 %vm3705_vm0, %v3704_v0  ;;  %3437 = vmatprep.mubr.msk.bf16.mxu0 %vm3705_vm0, %v3704_v0 }
  0xdc   :  { %v3199_v48 = vpop.f32.mrf.mxu0  ;;  %v3223_v49 = vpop.f32.mrf.mxu1 }
  0xdd   :  { %v3698_v49 = vld [vmem:[%s5436_s1 + $0xe8] sm:$0xff]  }
  0xde   :  { %v4414_v52 = vpop.f32.mrf.mxu0  ;;  %v4416_v54 = vpop.f32.mrf.mxu1 }
  0xe0   :  { %v3200_v59 = vpop.f32.mrf.mxu0  ;;  %v3224_v60 = vpop.f32.mrf.mxu1 }
  0xe1   :  { %v3697_v59 = vld [vmem:[%s5436_s1 + $0x110] sm:$0xff]  }
  0xe2   :  { %v4418_v63 = vpop.f32.mrf.mxu0  ;;  %v4420_v1 = vpop.f32.mrf.mxu1  ;;  %3390 = vmatmul.mubr.msk.bf16.gmra.mxu1 %vm129_vm1, %v737_v57  ;;  %3438 = vmatmul.mubr.msk.bf16.gmra.mxu0 %vm129_vm1, %v979_v58 }
  0xe3   :  { %3441 = vmatprep.mubr.msk.bf16.mxu0 %vm3705_vm0, %v3704_v0  ;;  %3453 = vmatprep.mubr.msk.bf16.mxu1 %vm3705_vm0, %v3704_v0 }
  0xe4   :  { %v3203_v6 = vpop.f32.mrf.mxu0  ;;  %v3227_v9 = vpop.f32.mrf.mxu1 }
  0xe5   :  { %v1214_v6 = vpack.c.bf16 %v2809_v61, %v2808_v53  ;;  %v1455_v9 = vpack.c.bf16 %v3983_v7, %v3950_v62  ;;  %v2810_v7 = vld [vmem:[%s5437_s0 + $0x1b1] sm:$0xff] }
  0xe6   :  { %v4440_v10 = vpop.f32.mrf.mxu0  ;;  %v4442_v11 = vpop.f32.mrf.mxu1 }
  0xe8   :  { %v3204_v16 = vpop.f32.mrf.mxu0  ;;  %v3228_v17 = vpop.f32.mrf.mxu1 }
  0xe9   :  { %v3699_v16 = vld [vmem:[%s5436_s1 + $0x108] sm:$0xff]  }
  0xea   :  { %v4447_v23 = vpop.f32.mrf.mxu0  ;;  %v4449_v24 = vpop.f32.mrf.mxu1  ;;  %3442 = vmatmul.mubr.msk.bf16.gmra.mxu0 %vm129_vm1, %v980_v12  ;;  %3454 = vmatmul.mubr.msk.bf16.vlgmr.msra.gmra.mxu1 %vm129_vm1, %v1212_v13 }
  0xeb   :  { %3457 = vmatprep.mubr.msk.bf16.mxu1 %vm3705_vm0, %v3704_v0  ;;  %3505 = vmatprep.mubr.msk.bf16.mxu0 %vm3705_vm0, %v3704_v0 }
  0xec   :  { %v3207_v29 = vpop.f32.mrf.mxu0  ;;  %v3231_v34 = vpop.f32.mrf.mxu1  ;;  %3550 = vmatpush3.bf16.msra.mxu1 %v3694_v22 }
  0xed   :  { %3551 = vmatprep.subr.bf16.mxu1 %v3704_v0 }
  0xee   :  { %v4467_v36 = vpop.f32.mrf.mxu0  ;;  %v4469_v37 = vpop.f32.mrf.mxu1 }
  0xf0   :  { %v3208_v47 = vpop.f32.mrf.mxu0  ;;  %v3232_v48 = vpop.f32.mrf.mxu1  ;;  %3552 = vmatpush3.bf16.msra.mxu1 %v3696_v35 }
  0xf1   :  { %3553 = vmatprep.subr.bf16.mxu1 %v3704_v0 }
  0xf2   :  { %v4480_v57 = vpop.f32.mrf.mxu0  ;;  %v4482_v58 = vpop.f32.mrf.mxu1  ;;  %3458 = vmatmul.mubr.msk.bf16.gmra.mxu1 %vm129_vm1, %v1213_v42  ;;  %3506 = vmatmul.mubr.msk.bf16.vlgmr.msra.gmra.mxu0 %vm129_vm1, %v1454_v43  ;;  %v1215_v42 = vpack.c.bf16 %v2811_v25, %v2810_v7  ;;  %v1456_v43 = vpack.c.bf16 %v4013_v14, %v3988_v8  ;;  %v2812_v8 = vld [vmem:[%s5437_s0 + $0x1c1] sm:$0xff]  ;;  %v2813_v14 = vld [vmem:[%s5437_s0 + $0x1c9] sm:$0xff] }
  0xf3   :  { %3602 = vmatpush3.bf16.msra.mxu0 %v3695_v46  ;;  %3461 = vmatprep.mubr.msk.bf16.mxu1 %vm3705_vm0, %v3704_v0 }
  0xf4   :  { %v3211_v60 = vpop.f32.mrf.mxu0  ;;  %v3235_v2 = vpop.f32.mrf.mxu1  ;;  %3509 = vmatprep.mubr.msk.bf16.mxu0 %vm3705_vm0, %v3704_v0  ;;  %3603 = vmatprep.subr.bf16.mxu0 %v3704_v0 }
  0xf5   :  { %3554 = vmatpush3.bf16.msra.mxu1 %v3698_v49 }
  0xf6   :  { %v4503_v4 = vpop.f32.mrf.mxu0  ;;  %v4505_v5 = vpop.f32.mrf.mxu1  ;;  %3555 = vmatprep.subr.bf16.mxu1 %v3704_v0 }
  0xf7   :  { %3604 = vmatpush3.bf16.msra.mxu0 %v3697_v59 }
  0xf8   :  { %v3212_v12 = vpop.f32.mrf.mxu0  ;;  %v3236_v13 = vpop.f32.mrf.mxu1  ;;  %3605 = vmatprep.subr.bf16.mxu0 %v3704_v0 }
  0xf9   :  { %3556 = vmatpush3.bf16.msra.mxu1 %v3700_v3  ;;  %v1216_v3 = vpack.c.bf16 %v2813_v14, %v2812_v8  ;;  %v2817_v8 = vld [vmem:[%s5437_s0 + $0x1e9] sm:$0xff] }
  0xfa   :  { %v4514_v17 = vpop.f32.mrf.mxu0  ;;  %v375_v22 = vpop.f32.mrf.mxu1  ;;  %3462 = vmatmul.mubr.msk.bf16.gmra.mxu1 %vm129_vm1, %v1214_v6  ;;  %3510 = vmatmul.mubr.msk.bf16.gmra.mxu0 %vm129_vm1, %v1455_v9  ;;  %v1457_v6 = vpack.c.bf16 %v4037_v20, %v4018_v15  ;;  %v2814_v15 = vld [vmem:[%s5437_s0 + $0x1d1] sm:$0xff]  ;;  %v2815_v20 = vld [vmem:[%s5437_s0 + $0x1d9] sm:$0xff] }
  0xfb   :  { %v376_v62 = vadd.f32 %v375_v22, %v4366_v18  ;;  %3465 = vmatprep.mubr.msk.bf16.mxu1 %vm3705_vm0, %v3704_v0  ;;  %3513 = vmatprep.mubr.msk.bf16.mxu0 %vm3705_vm0, %v3704_v0  ;;  %v3701_v18 = vld [vmem:[%s5436_s1 + $0x100] sm:$0xff]  }
  0xfc   :  { %v3215_v28 = vpop.f32.mrf.mxu0  ;;  %v3247_v29 = vpop.f32.mrf.mxu1  ;;  %3606 = vmatpush3.bf16.msra.mxu0 %v3699_v16 }
  0xfd   :  { %3607 = vmatprep.subr.bf16.mxu0 %v3704_v0 }
  0xfe   :  { %v4533_v34 = vpop.f32.mrf.mxu0  ;;  %v378_v35 = vpop.f32.mrf.mxu1 }
  0xff   :  { %v379_v46 = vadd.f32 %v378_v35, %v4388_v30  ;;  %v1458_v35 = vpack.c.bf16 %v4061_v26, %v4042_v21 }
 0x100   :  { %v3216_v47 = vpop.f32.mrf.mxu0  ;;  %v3248_v48 = vpop.f32.mrf.mxu1  ;;  %3608 = vmatpush3.bf16.msra.mxu0 %v3701_v18  ;;  %v1217_v18 = vpack.c.bf16 %v2815_v20, %v2814_v15 }
 0x101   :  { %v3706_v48 = vmov 0  }
 0x102   :  { %v383_v49 = vpop.f32.mrf.mxu1  ;;  %v595_v53 = vpop.f32.mrf.mxu0  ;;  %3466 = vmatmul.mubr.msk.bf16.gmra.mxu1 %vm129_vm1, %v1215_v42  ;;  %3514 = vmatmul.mubr.msk.bf16.gmra.mxu0 %vm129_vm1, %v1456_v43 }
 0x103   :  { %v384_v61 = vadd.f32 %v383_v49, %v4392_v40  ;;  %v4541_v59 = vadd.f32 %v595_v53, %v376_v62  ;;  %3469 = vmatprep.mubr.msk.bf16.mxu1 %vm3705_vm0, %v3704_v0  ;;  %3517 = vmatprep.mubr.msk.bf16.mxu0 %vm3705_vm0, %v3704_v0  ;;  %v2158_v49 = vld [vmem:[%s5438_s4] sm:$0xff] }
 0x104   :  { %v3251_v30 = vpop.f32.mrf.mxu1  ;;  %v3299_v60 = vpop.f32.mrf.mxu0  ;;  %3664 = vset.pattern.permute.xlu0 %v3706_v48  ;;  %3665 = vset.pattern.permute.xlu1 %v3706_v48 }
 0x105   :  { %2182 = vperm.xlu0 %3664, %v2158_v49   ;;  %v2160_v60 = vld [vmem:[%s5438_s4 + $0x10] sm:$0xff] }
 0x106   :  { %v386_v2 = vpop.f32.mrf.mxu1  ;;  %v598_v40 = vpop.f32.mrf.mxu0  ;;  %2192 = vperm.xlu1 %3665, %v2160_v60   ;;  %v2168_v60 = vld [vmem:[%s5438_s4 + $0x50] sm:$0xff] }
 0x107   :  { %v387_v9 = vadd.f32 %v386_v2, %v4414_v52  ;;  %v4556_v12 = vadd.f32 %v598_v40, %v379_v46 }
 0x108   :  { %v3252_v13 = vpop.f32.mrf.mxu1  ;;  %v3300_v16 = vpop.f32.mrf.mxu0 }
 0x10a   :  { %v391_v22 = vpop.f32.mrf.mxu1  ;;  %v603_v62 = vpop.f32.mrf.mxu0  ;;  %3470 = vmatmul.mubr.msk.bf16.gmra.mxu1 %vm129_vm1, %v1216_v3  ;;  %3518 = vmatmul.mubr.msk.bf16.gmra.mxu0 %vm129_vm1, %v1457_v6  ;;  %v1459_v6 = vpack.c.bf16 %v4085_v32, %v4066_v27 }
 0x10b   :  { %v392_v7 = vadd.f32 %v391_v22, %v4418_v63  ;;  %v4561_v25 = vadd.f32 %v603_v62, %v384_v61  ;;  %3473 = vmatprep.mubr.msk.bf16.mxu1 %vm3705_vm0, %v3704_v0  ;;  %3521 = vmatprep.mubr.msk.bf16.mxu0 %vm3705_vm0, %v3704_v0  ;;  %v2161_v62 = vld [vmem:[%s5438_s4 + $0x18] sm:$0xff] }
 0x10c   :  { %v3255_v52 = vpop.f32.mrf.mxu1  ;;  %v3303_v28 = vpop.f32.mrf.mxu0  ;;  %2197 = vperm.xlu1 %3665, %v2161_v62  }
 0x10d   :  { %v2819_v52 = vld [vmem:[%s5437_s0 + $0x1f9] sm:$0xff] }
 0x10e   :  { %v394_v29 = vpop.f32.mrf.mxu1  ;;  %v606_v63 = vpop.f32.mrf.mxu0 }
 0x10f   :  { %v395_v42 = vadd.f32 %v394_v29, %v4440_v10  ;;  %v4576_v43 = vadd.f32 %v606_v63, %v387_v9  ;;  %v2816_v10 = vld [vmem:[%s5437_s0 + $0x1e1] sm:$0xff]  ;;  %v2164_v63 = vld [vmem:[%s5438_s4 + $0x30] sm:$0xff] }
 0x110   :  { %v3256_v46 = vpop.f32.mrf.mxu1  ;;  %v3304_v47 = vpop.f32.mrf.mxu0  ;;  %v1218_v3 = vpack.c.bf16 %v2817_v8, %v2816_v10 }
 0x111   :  { %v1460_v46 = vpack.c.bf16 %v4109_v38, %v4090_v33 }
 0x112   :  { %v399_v53 = vpop.f32.mrf.mxu1  ;;  %v611_v61 = vpop.f32.mrf.mxu0  ;;  %3474 = vmatmul.mubr.msk.bf16.gmra.mxu1 %vm129_vm1, %v1217_v18  ;;  %3522 = vmatmul.mubr.msk.bf16.gmra.mxu0 %vm129_vm1, %v1458_v35 }
 0x113   :  { %v400_v21 = vadd.f32 %v399_v53, %v4447_v23  ;;  %v4584_v26 = vadd.f32 %v611_v61, %v392_v7  ;;  %3477 = vmatprep.mubr.msk.bf16.mxu1 %vm3705_vm0, %v3704_v0  ;;  %3525 = vmatprep.mubr.msk.bf16.mxu0 %vm3705_vm0, %v3704_v0  ;;  %v2159_v23 = vld [vmem:[%s5438_s4 + $0x8] sm:$0xff]  ;;  %v2162_v7 = vld [vmem:[%s5438_s4 + $0x20] sm:$0xff]  ;;  %v2165_v61 = vld [vmem:[%s5438_s4 + $0x38] sm:$0xff] }
 0x114   :  { %v3259_v14 = vpop.f32.mrf.mxu1  ;;  %v3307_v30 = vpop.f32.mrf.mxu0  ;;  %2187 = vperm.xlu0 %3664, %v2159_v23  }
 0x115   :  { %v2821_v14 = vld [vmem:[%s5437_s0 + $0x209] sm:$0xff] }
 0x116   :  { %v402_v2 = vpop.f32.mrf.mxu1  ;;  %v614_v40 = vpop.f32.mrf.mxu0 }
 0x117   :  { %v403_v9 = vadd.f32 %v402_v2, %v4467_v36  ;;  %v4605_v13 = vadd.f32 %v614_v40, %v395_v42  ;;  %v2818_v36 = vld [vmem:[%s5437_s0 + $0x1f1] sm:$0xff] }
 0x118   :  { %v3260_v16 = vpop.f32.mrf.mxu1  ;;  %v3308_v22 = vpop.f32.mrf.mxu0  ;;  %2202 = vperm.xlu0 %3664, %v2162_v7   ;;  %v1219_v42 = vpack.c.bf16 %v2819_v52, %v2818_v36  ;;  %v2169_v7 = vld [vmem:[%s5438_s4 + $0x58] sm:$0xff] }
 0x11a   :  { %v407_v15 = vpop.f32.mrf.mxu1  ;;  %v619_v20 = vpop.f32.mrf.mxu0  ;;  %3478 = vmatmul.mubr.msk.bf16.gmra.mxu1 %vm129_vm1, %v1218_v3  ;;  %3526 = vmatmul.mubr.msk.bf16.gmra.mxu0 %vm129_vm1, %v1459_v6  ;;  %v1461_v6 = vpack.c.bf16 %v4133_v44, %v4114_v39  ;;  %v2822_v44 = vld [vmem:[%s5437_s0 + $0x211] sm:$0xff] }
 0x11b   :  { %v408_v27 = vadd.f32 %v407_v15, %v4480_v57  ;;  %v4616_v32 = vadd.f32 %v619_v20, %v400_v21  ;;  %3481 = vmatprep.mubr.msk.bf16.mxu1 %vm3705_vm0, %v3704_v0  ;;  %3529 = vmatprep.mubr.msk.bf16.mxu0 %vm3705_vm0, %v3704_v0  ;;  %v2163_v57 = vld [vmem:[%s5438_s4 + $0x28] sm:$0xff]  ;;  %v2166_v21 = vld [vmem:[%s5438_s4 + $0x40] sm:$0xff] }
 0x11c   :  { %v3263_v28 = vpop.f32.mrf.mxu1  ;;  %v3311_v29 = vpop.f32.mrf.mxu0  ;;  %2207 = vperm.xlu1 %3665, %v2163_v57   ;;  %2212 = vperm.xlu0 %3664, %v2164_v63   ;;  %v2170_v15 = vld [vmem:[%s5438_s4 + $0x60] sm:$0xff] }
 0x11d   :  { %v2171_v28 = vld [vmem:[%s5438_s4 + $0x68] sm:$0xff]  ;;  %v2172_v29 = vld [vmem:[%s5438_s4 + $0x70] sm:$0xff] }
 0x11e   :  { %v410_v18 = vpop.f32.mrf.mxu1  ;;  %v622_v35 = vpop.f32.mrf.mxu0 }
 0x11f   :  { %v411_v47 = vadd.f32 %v410_v18, %v4503_v4  ;;  %v4637_v48 = vadd.f32 %v622_v35, %v403_v9  ;;  %v2820_v4 = vld [vmem:[%s5437_s0 + $0x201] sm:$0xff]  ;;  %v1462_v35 = vpack.c.bf16 %v4157_v50, %v4138_v45 }
 0x120   :  { %v3264_v49 = vpop.f32.mrf.mxu1  ;;  %v3312_v53 = vpop.f32.mrf.mxu0  ;;  %2217 = vperm.xlu1 %3665, %v2165_v61   ;;  %2222 = vperm.xlu0 %3664, %v2166_v21   ;;  %v1220_v3 = vpack.c.bf16 %v2821_v14, %v2820_v4  ;;  %v2824_v50 = vld [vmem:[%s5437_s0 + $0x221] sm:$0xff]  ;;  %v2176_v14 = vld [vmem:[%s5438_s4 + $0x90] sm:$0xff] }
 0x121   :  { %v2173_v49 = vld [vmem:[%s5438_s4 + $0x78] sm:$0xff]  ;;  %v2174_v53 = vld [vmem:[%s5438_s4 + $0x80] sm:$0xff]  ;;  %v2175_v4 = vld [vmem:[%s5438_s4 + $0x88] sm:$0xff] }
 0x122   :  { %v415_v10 = vpop.f32.mrf.mxu1  ;;  %v627_v8 = vpop.f32.mrf.mxu0  ;;  %3482 = vmatmul.mubr.msk.bf16.gmra.mxu1 %vm129_vm1, %v1219_v42  ;;  %3530 = vmatmul.mubr.msk.bf16.gmra.mxu0 %vm129_vm1, %v1460_v46 }
 0x123   :  { %v416_v33 = vadd.f32 %v415_v10, %v4514_v17  ;;  %v4648_v38 = vadd.f32 %v627_v8, %v408_v27  ;;  %3485 = vmatprep.mubr.msk.bf16.mxu1 %vm3705_vm0, %v3704_v0  ;;  %3533 = vmatprep.mubr.msk.bf16.mxu0 %vm3705_vm0, %v3704_v0  ;;  %v2167_v17 = vld [vmem:[%s5438_s4 + $0x48] sm:$0xff] }
 0x124   :  { %v3267_v30 = vpop.f32.mrf.mxu1  ;;  %v3315_v23 = vpop.f32.mrf.mxu0  ;;  %2227 = vperm.xlu1 %3665, %v2167_v17   ;;  %2232 = vperm.xlu0 %3664, %v2168_v60  }
 0x126   :  { %v418_v2 = vpop.f32.mrf.mxu1  ;;  %v630_v40 = vpop.f32.mrf.mxu0 }
 0x127   :  { %v419_v9 = vadd.f32 %v418_v2, %v4533_v34  ;;  %v4669_v16 = vadd.f32 %v630_v40, %v411_v47  ;;  %v2823_v34 = vld [vmem:[%s5437_s0 + $0x219] sm:$0xff]  ;;  %v1463_v2 = vpack.c.bf16 %v4171_v55, %v4162_v51  ;;  %v1453_v55 = vld [vmem:[%s5437_s0 + $0xb1] sm:$0xff] }
 0x128   :  { %v3268_v22 = vpop.f32.mrf.mxu1  ;;  %v3316_v62 = vpop.f32.mrf.mxu0  ;;  %2237 = vperm.xlu1 %3665, %v2169_v7   ;;  %2242 = vperm.xlu0 %3664, %v2170_v15   ;;  %v1221_v18 = vpack.c.bf16 %v2823_v34, %v2822_v44  ;;  %v2873_v15 = vld [vmem:[%s5437_s0 + $0xd1] sm:$0xff]  ;;  %v2179_v44 = vld [vmem:[%s5438_s4 + $0xa8] sm:$0xff] }
 0x12a   :  { %v423_v20 = vpop.f32.mrf.mxu1  ;;  %v635_v27 = vpop.f32.mrf.mxu0  ;;  %3486 = vmatmul.mubr.msk.bf16.gmra.mxu1 %vm129_vm1, %v1220_v3  ;;  %3534 = vmatmul.mubr.msk.bf16.gmra.mxu0 %vm129_vm1, %v1461_v6 }
 0x12b   :  { %v4679_v39 = vadd.f32 %v635_v27, %v416_v33  ;;  %3489 = vmatprep.mubr.msk.bf16.mxu1 %vm3705_vm0, %v3704_v0  ;;  %3537 = vmatprep.mubr.msk.bf16.mxu0 %vm3705_vm0, %v3704_v0  ;;  %v424_v61 = vadd.f32 %v423_v20, %v4368_v19  ;;  %v2825_v19 = vld [vmem:[%s5437_s0 + $0x229] sm:$0xff] }
 0x12c   :  { %v3271_v36 = vpop.f32.mrf.mxu1  ;;  %v3319_v52 = vpop.f32.mrf.mxu0  ;;  %2247 = vperm.xlu1 %3665, %v2171_v28   ;;  %2252 = vperm.xlu0 %3664, %v2172_v29   ;;  %v1222_v60 = vpack.c.bf16 %v2825_v19, %v2824_v50  ;;  %v1464_v28 = vpack.c.bf16 %v1453_v55, %v4180_v56  ;;  %v2875_v56 = vld [vmem:[%s5437_s0 + $0xe1] sm:$0xff] }
 0x12e   :  { %v426_v57 = vpop.f32.mrf.mxu1  ;;  %v638_v63 = vpop.f32.mrf.mxu0 }
 0x12f   :  { %v4699_v42 = vadd.f32 %v638_v63, %v419_v9  ;;  %v427_v30 = vadd.f32 %v426_v57, %v4390_v31  ;;  %v2177_v9 = vld [vmem:[%s5438_s4 + $0x98] sm:$0xff]  ;;  %v2178_v31 = vld [vmem:[%s5438_s4 + $0xa0] sm:$0xff] }
 0x130   :  { %v3272_v46 = vpop.f32.mrf.mxu1  ;;  %v3320_v47 = vpop.f32.mrf.mxu0  ;;  %2257 = vperm.xlu1 %3665, %v2173_v49   ;;  %2262 = vperm.xlu0 %3664, %v2174_v53   ;;  %v1917_v53 = vld [vmem:[%s5437_s0 + $0x12] sm:$0xff] }
 0x132   :  { %v431_v21 = vpop.f32.mrf.mxu1  ;;  %v643_v10 = vpop.f32.mrf.mxu0  ;;  %3490 = vmatmul.mubr.msk.bf16.gmra.mxu1 %vm129_vm1, %v1221_v18  ;;  %3538 = vmatmul.mubr.msk.bf16.gmra.mxu0 %vm129_vm1, %v1462_v35 }
 0x133   :  { %v4710_v45 = vadd.f32 %v643_v10, %v424_v61  ;;  %3493 = vmatprep.mubr.msk.bf16.mxu1 %vm3705_vm0, %v3704_v0  ;;  %3541 = vmatprep.mubr.msk.bf16.mxu0 %vm3705_vm0, %v3704_v0  ;;  %v432_v22 = vadd.f32 %v431_v21, %v4394_v41  ;;  %v2872_v41 = vld [vmem:[%s5437_s0 + $0xc9] sm:$0xff] }
 0x134   :  { %v3275_v8 = vpop.f32.mrf.mxu1  ;;  %v3323_v33 = vpop.f32.mrf.mxu0  ;;  %2267 = vperm.xlu1 %3665, %v2175_v4   ;;  %2272 = vperm.xlu0 %3664, %v2176_v14   ;;  %v1696_v29 = vpack.c.bf16 %v2873_v15, %v2872_v41 }
 0x136   :  { %v434_v23 = vpop.f32.mrf.mxu1  ;;  %v646_v17 = vpop.f32.mrf.mxu0 }
 0x137   :  { %v4731_v40 = vadd.f32 %v646_v17, %v427_v30  ;;  %v435_v34 = vadd.f32 %v434_v23, %v4416_v54  ;;  %v2874_v54 = vld [vmem:[%s5437_s0 + $0xd9] sm:$0xff] }
 0x138   :  { %v3276_v3 = vpop.f32.mrf.mxu1  ;;  %v3324_v6 = vpop.f32.mrf.mxu0  ;;  %2277 = vperm.xlu1 %3665, %v2177_v9   ;;  %2282 = vperm.xlu0 %3664, %v2178_v31   ;;  %v1697_v8 = vpack.c.bf16 %v2875_v56, %v2874_v54 }
 0x139   :  { %v1918_v3 = vld [vmem:[%s5437_s0 + $0x1a] sm:$0xff]  ;;  %v1919_v6 = vld [vmem:[%s5437_s0 + $0x22] sm:$0xff] }
 0x13a   :  { %v439_v62 = vpop.f32.mrf.mxu1  ;;  %v651_v7 = vpop.f32.mrf.mxu0  ;;  %3494 = vmatmul.mubr.msk.bf16.gmra.mxu1 %vm129_vm1, %v1222_v60  ;;  %3542 = vmatmul.mubr.msk.bf16.gmra.mxu0 %vm129_vm1, %v1463_v2  ;;  %v1939_v41 = vpack.c.bf16 %v1919_v6, %v1918_v3 }
 0x13b   :  { %v4742_v51 = vadd.f32 %v651_v7, %v432_v22  ;;  %3545 = vmatprep.mubr.msk.bf16.mxu0 %vm3705_vm0, %v3704_v0  ;;  %3557 = vmatprep.mubr.msk.bf16.mxu1 %vm3705_vm0, %v3704_v0  ;;  %v440_v35 = vadd.f32 %v439_v62, %v4420_v1  ;;  %v1916_v1 = vld [vmem:[%s5437_s0 + $0xa] sm:$0xff] }
 0x13c   :  { %v3279_v20 = vpop.f32.mrf.mxu1  ;;  %v3327_v27 = vpop.f32.mrf.mxu0  ;;  %2287 = vperm.xlu1 %3665, %v2179_v44   ;;  %v1938_v33 = vpack.c.bf16 %v1917_v53, %v1916_v1 }
 0x13e   :  { %v442_v36 = vpop.f32.mrf.mxu1  ;;  %v654_v52 = vpop.f32.mrf.mxu0 }
 0x13f   :  { %v4762_v57 = vadd.f32 %v654_v52, %v435_v34  ;;  %v443_v10 = vadd.f32 %v442_v36, %v4442_v11  ;;  %v2876_v11 = vld [vmem:[%s5437_s0 + $0xe9] sm:$0xff] }
 0x140   :  { %v3280_v63 = vpop.f32.mrf.mxu1  ;;  %v3328_v18 = vpop.f32.mrf.mxu0 }
 0x141   :  { %v1921_v63 = vld [vmem:[%s5437_s0 + $0x32] sm:$0xff] }
 0x142   :  { %v447_v46 = vpop.f32.mrf.mxu1  ;;  %v659_v47 = vpop.f32.mrf.mxu0  ;;  %3546 = vmatmul.mubr.msk.bf16.gmra.mxu0 %vm129_vm1, %v1464_v28  ;;  %3558 = vmatmul.mubr.msk.bf16.vlgmr.msra.gmra.mxu1 %vm129_vm1, %v1696_v29  ;;  %v1920_v29 = vld [vmem:[%s5437_s0 + $0x2a] sm:$0xff] }
 0x143   :  { %v4770_v49 = vadd.f32 %v659_v47, %v440_v35  ;;  %3561 = vmatprep.mubr.msk.bf16.mxu1 %vm3705_vm0, %v3704_v0  ;;  %3609 = vmatprep.mubr.msk.bf16.mxu0 %vm3705_vm0, %v3704_v0  ;;  %v448_v23 = vadd.f32 %v447_v46, %v4449_v24  ;;  %v2877_v24 = vld [vmem:[%s5437_s0 + $0xf1] sm:$0xff]  ;;  %v1940_v56 = vpack.c.bf16 %v1921_v63, %v1920_v29 }
 0x144   :  { %v3283_v61 = vpop.f32.mrf.mxu1  ;;  %v3331_v21 = vpop.f32.mrf.mxu0  ;;  %v1698_v55 = vpack.c.bf16 %v2877_v24, %v2876_v11 }
 0x146   :  { %v450_v50 = vpop.f32.mrf.mxu1  ;;  %v662_v19 = vpop.f32.mrf.mxu0 }
 0x147   :  { %v4786_v4 = vadd.f32 %v662_v19, %v443_v10  ;;  %v451_v22 = vadd.f32 %v450_v50, %v4469_v37  ;;  %v2878_v37 = vld [vmem:[%s5437_s0 + $0xf9] sm:$0xff] }
 0x148   :  { %v3284_v14 = vpop.f32.mrf.mxu1  ;;  %v3332_v30 = vpop.f32.mrf.mxu0 }
 0x14a   :  { %v455_v17 = vpop.f32.mrf.mxu1  ;;  %v667_v60 = vpop.f32.mrf.mxu0  ;;  %3562 = vmatmul.mubr.msk.bf16.gmra.mxu1 %vm129_vm1, %v1697_v8  ;;  %3610 = vmatmul.mubr.msk.bf16.vlgmr.msra.gmra.mxu0 %vm129_vm1, %v1938_v33  ;;  %v1922_v33 = vld [vmem:[%s5437_s0 + $0x3a] sm:$0xff] }
 0x14b   :  { %v4794_v2 = vadd.f32 %v667_v60, %v448_v23  ;;  %3565 = vmatprep.mubr.msk.bf16.mxu1 %vm3705_vm0, %v3704_v0  ;;  %3613 = vmatprep.mubr.msk.bf16.mxu0 %vm3705_vm0, %v3704_v0  ;;  %v456_v44 = vadd.f32 %v455_v17, %v4482_v58  ;;  %v2879_v58 = vld [vmem:[%s5437_s0 + $0x101] sm:$0xff] }
 0x14c   :  { %v3287_v9 = vpop.f32.mrf.mxu1  ;;  %v3335_v31 = vpop.f32.mrf.mxu0  ;;  %v1699_v54 = vpack.c.bf16 %v2879_v58, %v2878_v37 }
 0x14e   :  { %v458_v62 = vpop.f32.mrf.mxu1  ;;  %v670_v7 = vpop.f32.mrf.mxu0 }
 0x14f   :  { %v4810_v15 = vadd.f32 %v670_v7, %v451_v22  ;;  %v459_v35 = vadd.f32 %v458_v62, %v4505_v5  ;;  %v2880_v5 = vld [vmem:[%s5437_s0 + $0x109] sm:$0xff]  ;;  %v2882_v62 = vld [vmem:[%s5437_s0 + $0x119] sm:$0xff] }
 0x150   :  { %v3288_v20 = vpop.f32.mrf.mxu1  ;;  %v3336_v27 = vpop.f32.mrf.mxu0 }
 0x152   :  { %v675_v34 = vpop.f32.mrf.mxu0  ;;  %v838_v36 = vpop.f32.mrf.mxu1  ;;  %3566 = vmatmul.mubr.msk.bf16.gmra.mxu1 %vm129_vm1, %v1698_v55  ;;  %3614 = vmatmul.mubr.msk.bf16.gmra.mxu0 %vm129_vm1, %v1939_v41  ;;  %v1924_v41 = vld [vmem:[%s5437_s0 + $0x4a] sm:$0xff] }
 0x153   :  { %v4818_v52 = vadd.f32 %v675_v34, %v456_v44  ;;  %v925_v28 = vadd.f32 %v838_v36, %v4541_v59  ;;  %3569 = vmatprep.mubr.msk.bf16.mxu1 %vm3705_vm0, %v3704_v0  ;;  %3617 = vmatprep.mubr.msk.bf16.mxu0 %vm3705_vm0, %v3704_v0 }
 0x154   :  { %v3339_v18 = vpop.f32.mrf.mxu0  ;;  %v3351_v59 = vpop.f32.mrf.mxu1 }
 0x156   :  { %v678_v46 = vpop.f32.mrf.mxu0  ;;  %v841_v47 = vpop.f32.mrf.mxu1 }
 0x157   :  { %v4835_v1 = vadd.f32 %v678_v46, %v459_v35  ;;  %v926_v53 = vadd.f32 %v841_v47, %v4556_v12  ;;  %v2881_v12 = vld [vmem:[%s5437_s0 + $0x111] sm:$0xff]  ;;  %v2884_v35 = vld [vmem:[%s5437_s0 + $0x129] sm:$0xff] }
 0x158   :  { %v3340_v61 = vpop.f32.mrf.mxu0  ;;  %v3352_v21 = vpop.f32.mrf.mxu1  ;;  %v1700_v60 = vpack.c.bf16 %v2881_v12, %v2880_v5 }
 0x15a   :  { %v846_v10 = vpop.f32.mrf.mxu1  ;;  %v1081_v50 = vpop.f32.mrf.mxu0  ;;  %3570 = vmatmul.mubr.msk.bf16.gmra.mxu1 %vm129_vm1, %v1699_v54  ;;  %3618 = vmatmul.mubr.msk.bf16.gmra.mxu0 %vm129_vm1, %v1940_v56  ;;  %v1926_v54 = vld [vmem:[%s5437_s0 + $0x5a] sm:$0xff] }
 0x15b   :  { %v927_v19 = vadd.f32 %v846_v10, %v4561_v25  ;;  %v4844_v8 = vadd.f32 %v1081_v50, %v925_v28  ;;  %3573 = vmatprep.mubr.msk.bf16.mxu1 %vm3705_vm0, %v3704_v0  ;;  %3621 = vmatprep.mubr.msk.bf16.mxu0 %vm3705_vm0, %v3704_v0  ;;  %v1923_v25 = vld [vmem:[%s5437_s0 + $0x42] sm:$0xff] }
 0x15c   :  { %v3355_v14 = vpop.f32.mrf.mxu1  ;;  %v3403_v30 = vpop.f32.mrf.mxu0  ;;  %v1941_v11 = vpack.c.bf16 %v1923_v25, %v1922_v33 }
 0x15d   :  { %v2886_v30 = vld [vmem:[%s5437_s0 + $0x139] sm:$0xff] }
 0x15e   :  { %v849_v23 = vpop.f32.mrf.mxu1  ;;  %v1084_v17 = vpop.f32.mrf.mxu0 }
 0x15f   :  { %v928_v24 = vadd.f32 %v849_v23, %v4576_v43  ;;  %v4860_v3 = vadd.f32 %v1084_v17, %v926_v53  ;;  %v2883_v43 = vld [vmem:[%s5437_s0 + $0x121] sm:$0xff] }
 0x160   :  { %v3356_v6 = vpop.f32.mrf.mxu1  ;;  %v3404_v9 = vpop.f32.mrf.mxu0  ;;  %v1701_v36 = vpack.c.bf16 %v2883_v43, %v2882_v62 }
 0x162   :  { %v854_v31 = vpop.f32.mrf.mxu1  ;;  %v1089_v22 = vpop.f32.mrf.mxu0  ;;  %3574 = vmatmul.mubr.msk.bf16.gmra.mxu1 %vm129_vm1, %v1700_v60  ;;  %3622 = vmatmul.mubr.msk.bf16.gmra.mxu0 %vm129_vm1, %v1941_v11  ;;  %v1928_v60 = vld [vmem:[%s5437_s0 + $0x6a] sm:$0xff] }
 0x163   :  { %v929_v7 = vadd.f32 %v854_v31, %v4584_v26  ;;  %v4868_v55 = vadd.f32 %v1089_v22, %v927_v19  ;;  %3577 = vmatprep.mubr.msk.bf16.mxu1 %vm3705_vm0, %v3704_v0  ;;  %3625 = vmatprep.mubr.msk.bf16.mxu0 %vm3705_vm0, %v3704_v0  ;;  %v1925_v26 = vld [vmem:[%s5437_s0 + $0x52] sm:$0xff] }
 0x164   :  { %v3359_v20 = vpop.f32.mrf.mxu1  ;;  %v3407_v27 = vpop.f32.mrf.mxu0  ;;  %v1942_v37 = vpack.c.bf16 %v1925_v26, %v1924_v41 }
 0x165   :  { %v2888_v27 = vld [vmem:[%s5437_s0 + $0x149] sm:$0xff] }
 0x166   :  { %v857_v44 = vpop.f32.mrf.mxu1  ;;  %v1092_v34 = vpop.f32.mrf.mxu0 }
 0x167   :  { %v930_v28 = vadd.f32 %v857_v44, %v4605_v13  ;;  %v4884_v58 = vadd.f32 %v1092_v34, %v928_v24  ;;  %v2885_v13 = vld [vmem:[%s5437_s0 + $0x131] sm:$0xff] }
 0x168   :  { %v3360_v29 = vpop.f32.mrf.mxu1  ;;  %v3408_v63 = vpop.f32.mrf.mxu0  ;;  %v1702_v10 = vpack.c.bf16 %v2885_v13, %v2884_v35 }
 0x16a   :  { %v862_v18 = vpop.f32.mrf.mxu1  ;;  %v1097_v59 = vpop.f32.mrf.mxu0  ;;  %3578 = vmatmul.mubr.msk.bf16.gmra.mxu1 %vm129_vm1, %v1701_v36  ;;  %3626 = vmatmul.mubr.msk.bf16.gmra.mxu0 %vm129_vm1, %v1942_v37  ;;  %v1930_v36 = vld [vmem:[%s5437_s0 + $0x7a] sm:$0xff] }
 0x16b   :  { %v931_v46 = vadd.f32 %v862_v18, %v4616_v32  ;;  %v4892_v47 = vadd.f32 %v1097_v59, %v929_v7  ;;  %3581 = vmatprep.mubr.msk.bf16.mxu1 %vm3705_vm0, %v3704_v0  ;;  %3629 = vmatprep.mubr.msk.bf16.mxu0 %vm3705_vm0, %v3704_v0  ;;  %v1927_v32 = vld [vmem:[%s5437_s0 + $0x62] sm:$0xff] }
 0x16c   :  { %v3363_v56 = vpop.f32.mrf.mxu1  ;;  %v3411_v53 = vpop.f32.mrf.mxu0  ;;  %v1943_v50 = vpack.c.bf16 %v1927_v32, %v1926_v54 }
 0x16d   :  { %v2890_v53 = vld [vmem:[%s5437_s0 + $0x159] sm:$0xff] }
 0x16e   :  { %v865_v61 = vpop.f32.mrf.mxu1  ;;  %v1100_v21 = vpop.f32.mrf.mxu0 }
 0x16f   :  { %v932_v5 = vadd.f32 %v865_v61, %v4637_v48  ;;  %v4908_v19 = vadd.f32 %v1100_v21, %v930_v28  ;;  %v2887_v48 = vld [vmem:[%s5437_s0 + $0x141] sm:$0xff] }
 0x170   :  { %v3364_v12 = vpop.f32.mrf.mxu1  ;;  %v3412_v33 = vpop.f32.mrf.mxu0  ;;  %v1703_v31 = vpack.c.bf16 %v2887_v48, %v2886_v30 }
 0x172   :  { %v870_v25 = vpop.f32.mrf.mxu1  ;;  %v1105_v14 = vpop.f32.mrf.mxu0  ;;  %3582 = vmatmul.mubr.msk.bf16.gmra.mxu1 %vm129_vm1, %v1702_v10  ;;  %3630 = vmatmul.mubr.msk.bf16.gmra.mxu0 %vm129_vm1, %v1943_v50  ;;  %v1932_v10 = vld [vmem:[%s5437_s0 + $0x8a] sm:$0xff] }
 0x173   :  { %v933_v23 = vadd.f32 %v870_v25, %v4648_v38  ;;  %v4916_v17 = vadd.f32 %v1105_v14, %v931_v46  ;;  %3585 = vmatprep.mubr.msk.bf16.mxu1 %vm3705_vm0, %v3704_v0  ;;  %3633 = vmatprep.mubr.msk.bf16.mxu0 %vm3705_vm0, %v3704_v0  ;;  %v1929_v38 = vld [vmem:[%s5437_s0 + $0x72] sm:$0xff] }
 0x174   :  { %v3367_v11 = vpop.f32.mrf.mxu1  ;;  %v3415_v24 = vpop.f32.mrf.mxu0  ;;  %v1944_v22 = vpack.c.bf16 %v1929_v38, %v1928_v60 }
 0x175   :  { %v2892_v24 = vld [vmem:[%s5437_s0 + $0x169] sm:$0xff] }
 0x176   :  { %v873_v6 = vpop.f32.mrf.mxu1  ;;  %v1108_v9 = vpop.f32.mrf.mxu0 }
 0x177   :  { %v934_v62 = vadd.f32 %v873_v6, %v4669_v16  ;;  %v4932_v7 = vadd.f32 %v1108_v9, %v932_v5  ;;  %v2889_v16 = vld [vmem:[%s5437_s0 + $0x151] sm:$0xff] }
 0x178   :  { %v3368_v43 = vpop.f32.mrf.mxu1  ;;  %v3416_v41 = vpop.f32.mrf.mxu0  ;;  %v1704_v18 = vpack.c.bf16 %v2889_v16, %v2888_v27 }
 0x17a   :  { %v878_v26 = vpop.f32.mrf.mxu1  ;;  %v1113_v20 = vpop.f32.mrf.mxu0  ;;  %3586 = vmatmul.mubr.msk.bf16.gmra.mxu1 %vm129_vm1, %v1703_v31  ;;  %3634 = vmatmul.mubr.msk.bf16.gmra.mxu0 %vm129_vm1, %v1944_v22  ;;  %v1934_v31 = vld [vmem:[%s5437_s0 + $0x9a] sm:$0xff] }
 0x17b   :  { %v935_v44 = vadd.f32 %v878_v26, %v4679_v39  ;;  %v4940_v34 = vadd.f32 %v1113_v20, %v933_v23  ;;  %3589 = vmatprep.mubr.msk.bf16.mxu1 %vm3705_vm0, %v3704_v0  ;;  %3637 = vmatprep.mubr.msk.bf16.mxu0 %vm3705_vm0, %v3704_v0  ;;  %v1931_v39 = vld [vmem:[%s5437_s0 + $0x82] sm:$0xff] }
 0x17c   :  { %v3371_v37 = vpop.f32.mrf.mxu1  ;;  %v3419_v28 = vpop.f32.mrf.mxu0  ;;  %v1945_v59 = vpack.c.bf16 %v1931_v39, %v1930_v36 }
 0x17e   :  { %v881_v29 = vpop.f32.mrf.mxu1  ;;  %v1116_v63 = vpop.f32.mrf.mxu0 }
 0x17f   :  { %v936_v35 = vadd.f32 %v881_v29, %v4699_v42  ;;  %v4956_v46 = vadd.f32 %v1116_v63, %v934_v62  ;;  %v2891_v42 = vld [vmem:[%s5437_s0 + $0x161] sm:$0xff]  ;;  %v1937_v63 = vld [vmem:[%s5437_s0 + $0xb2] sm:$0xff] }
 0x180   :  { %v3372_v13 = vpop.f32.mrf.mxu1  ;;  %v3420_v54 = vpop.f32.mrf.mxu0  ;;  %v1705_v25 = vpack.c.bf16 %v2891_v42, %v2890_v53 }
 0x182   :  { %v886_v32 = vpop.f32.mrf.mxu1  ;;  %v1121_v56 = vpop.f32.mrf.mxu0  ;;  %3590 = vmatmul.mubr.msk.bf16.gmra.mxu1 %vm129_vm1, %v1704_v18  ;;  %3638 = vmatmul.mubr.msk.bf16.gmra.mxu0 %vm129_vm1, %v1945_v59 }
 0x183   :  { %v937_v61 = vadd.f32 %v886_v32, %v4710_v45  ;;  %v4964_v21 = vadd.f32 %v1121_v56, %v935_v44  ;;  %3593 = vmatprep.mubr.msk.bf16.mxu1 %vm3705_vm0, %v3704_v0  ;;  %3641 = vmatprep.mubr.msk.bf16.mxu0 %vm3705_vm0, %v3704_v0  ;;  %v1933_v45 = vld [vmem:[%s5437_s0 + $0x92] sm:$0xff] }
 0x184   :  { %v3375_v50 = vpop.f32.mrf.mxu1  ;;  %v3423_v5 = vpop.f32.mrf.mxu0  ;;  %v1946_v14 = vpack.c.bf16 %v1933_v45, %v1932_v10 }
 0x186   :  { %v889_v12 = vpop.f32.mrf.mxu1  ;;  %v1124_v33 = vpop.f32.mrf.mxu0 }
 0x187   :  { %v938_v30 = vadd.f32 %v889_v12, %v4731_v40  ;;  %v4980_v23 = vadd.f32 %v1124_v33, %v936_v35  ;;  %v2893_v40 = vld [vmem:[%s5437_s0 + $0x171] sm:$0xff] }
 0x188   :  { %v3376_v48 = vpop.f32.mrf.mxu1  ;;  %v3424_v60 = vpop.f32.mrf.mxu0  ;;  %v1706_v26 = vpack.c.bf16 %v2893_v40, %v2892_v24 }
 0x18a   :  { %v894_v38 = vpop.f32.mrf.mxu1  ;;  %v1129_v11 = vpop.f32.mrf.mxu0  ;;  %3594 = vmatmul.mubr.msk.bf16.gmra.mxu1 %vm129_vm1, %v1705_v25  ;;  %3642 = vmatmul.mubr.msk.bf16.gmra.mxu0 %vm129_vm1, %v1946_v14 }
 0x18b   :  { %v939_v6 = vadd.f32 %v894_v38, %v4742_v51  ;;  %v4988_v9 = vadd.f32 %v1129_v11, %v937_v61  ;;  %3597 = vmatprep.mubr.msk.bf16.mxu1 %vm3705_vm0, %v3704_v0  ;;  %3645 = vmatprep.mubr.msk.bf16.mxu0 %vm3705_vm0, %v3704_v0  ;;  %v1935_v51 = vld [vmem:[%s5437_s0 + $0xa2] sm:$0xff] }
 0x18c   :  { %v3379_v22 = vpop.f32.mrf.mxu1  ;;  %v3427_v62 = vpop.f32.mrf.mxu0  ;;  %v1947_v20 = vpack.c.bf16 %v1935_v51, %v1934_v31 }
 0x18e   :  { %v897_v43 = vpop.f32.mrf.mxu1  ;;  %v1132_v41 = vpop.f32.mrf.mxu0 }
 0x18f   :  { %v940_v27 = vadd.f32 %v897_v43, %v4762_v57  ;;  %v5004_v44 = vadd.f32 %v1132_v41, %v938_v30  ;;  %v1936_v57 = vld [vmem:[%s5437_s0 + $0xaa] sm:$0xff] }
 0x190   :  { %v3380_v16 = vpop.f32.mrf.mxu1  ;;  %v3428_v36 = vpop.f32.mrf.mxu0  ;;  %v1948_v54 = vpack.c.bf16 %v1937_v63, %v1936_v57 }
 0x192   :  { %v902_v39 = vpop.f32.mrf.mxu1  ;;  %v1137_v37 = vpop.f32.mrf.mxu0  ;;  %3598 = vmatmul.mubr.msk.bf16.gmra.mxu1 %vm129_vm1, %v1706_v26  ;;  %3646 = vmatmul.mubr.msk.bf16.gmra.mxu0 %vm129_vm1, %v1947_v20 }
 0x193   :  { %v941_v28 = vadd.f32 %v902_v39, %v4770_v49  ;;  %v5009_v29 = vadd.f32 %v1137_v37, %v939_v6  ;;  %3649 = vmatprep.mubr.msk.bf16.mxu0 %vm3705_vm0, %v3704_v0 }
 0x194   :  { %v3383_v18 = vpop.f32.mrf.mxu1  ;;  %v3431_v59 = vpop.f32.mrf.mxu0 }
 0x196   :  { %v905_v35 = vpop.f32.mrf.mxu1  ;;  %v1140_v13 = vpop.f32.mrf.mxu0 }
 0x197   :  { %v942_v49 = vadd.f32 %v905_v35, %v4786_v4  ;;  %v5020_v32 = vadd.f32 %v1140_v13, %v940_v27 }
 0x198   :  { %v3384_v56 = vpop.f32.mrf.mxu1  ;;  %v3432_v53 = vpop.f32.mrf.mxu0 }
 0x19a   :  { %v910_v0 = vpop.f32.mrf.mxu1  ;;  %v1145_v61 = vpop.f32.mrf.mxu0  ;;  %3650 = vmatmul.mubr.msk.bf16.gmra.mxu0 %vm129_vm1, %v1948_v54 }
 0x19b   :  { %v943_v42 = vadd.f32 %v910_v0, %v4794_v2  ;;  %v5024_v10 = vadd.f32 %v1145_v61, %v941_v28 }
 0x19c   :  { %v3387_v45 = vpop.f32.mrf.mxu1  ;;  %v3435_v50 = vpop.f32.mrf.mxu0 }
 0x19e   :  { %v913_v5 = vpop.f32.mrf.mxu1  ;;  %v1148_v12 = vpop.f32.mrf.mxu0 }
 0x19f   :  { %v944_v33 = vadd.f32 %v913_v5, %v4810_v15  ;;  %v5027_v25 = vadd.f32 %v1148_v12, %v942_v49 }
 0x1a0   :  { %v3388_v4 = vpop.f32.mrf.mxu1  ;;  %v3436_v14 = vpop.f32.mrf.mxu0 }
 0x1a2   :  { %v918_v30 = vpop.f32.mrf.mxu1  ;;  %v1153_v48 = vpop.f32.mrf.mxu0 }
 0x1a3   :  { %v945_v60 = vadd.f32 %v918_v30, %v4818_v52  ;;  %v5030_v38 = vadd.f32 %v1153_v48, %v943_v42 }
 0x1a4   :  { %v3391_v11 = vpop.f32.mrf.mxu1  ;;  %v3439_v2 = vpop.f32.mrf.mxu0 }
 0x1a6   :  { %v921_v24 = vpop.f32.mrf.mxu1  ;;  %v1156_v6 = vpop.f32.mrf.mxu0 }
 0x1a7   :  { %v946_v40 = vadd.f32 %v921_v24, %v4835_v1  ;;  %v5033_v31 = vadd.f32 %v1156_v6, %v944_v33 }
 0x1a8   :  { %v3392_v51 = vpop.f32.mrf.mxu1  ;;  %v3440_v15 = vpop.f32.mrf.mxu0 }
 0x1aa   :  { %v1161_v22 = vpop.f32.mrf.mxu0  ;;  %v1323_v62 = vpop.f32.mrf.mxu1 }
 0x1ab   :  { %v5035_v43 = vadd.f32 %v1161_v22, %v945_v60  ;;  %v1410_v41 = vadd.f32 %v1323_v62, %v4844_v8 }
 0x1ac   :  { %v3443_v26 = vpop.f32.mrf.mxu0  ;;  %v3455_v52 = vpop.f32.mrf.mxu1 }
 0x1ae   :  { %v1164_v20 = vpop.f32.mrf.mxu0  ;;  %v1326_v27 = vpop.f32.mrf.mxu1 }
 0x1af   :  { %v5038_v16 = vadd.f32 %v1164_v20, %v946_v40  ;;  %v1411_v36 = vadd.f32 %v1326_v27, %v4860_v3 }
 0x1b0   :  { %v3444_v39 = vpop.f32.mrf.mxu0  ;;  %v3456_v1 = vpop.f32.mrf.mxu1 }
 0x1b2   :  { %v1331_v37 = vpop.f32.mrf.mxu1  ;;  %v1565_v28 = vpop.f32.mrf.mxu0 }
 0x1b3   :  { %v1412_v57 = vadd.f32 %v1331_v37, %v4868_v55  ;;  %v5042_v63 = vadd.f32 %v1565_v28, %v1410_v41 }
 0x1b4   :  { %v3459_v18 = vpop.f32.mrf.mxu1  ;;  %v3507_v59 = vpop.f32.mrf.mxu0 }
 0x1b6   :  { %v1334_v35 = vpop.f32.mrf.mxu1  ;;  %v1568_v8 = vpop.f32.mrf.mxu0 }
 0x1b7   :  { %v1413_v13 = vadd.f32 %v1334_v35, %v4884_v58  ;;  %v5045_v54 = vadd.f32 %v1568_v8, %v1411_v36 }
 0x1b8   :  { %v3460_v49 = vpop.f32.mrf.mxu1  ;;  %v3508_v56 = vpop.f32.mrf.mxu0 }
 0x1ba   :  { %v1339_v53 = vpop.f32.mrf.mxu1  ;;  %v1573_v3 = vpop.f32.mrf.mxu0 }
 0x1bb   :  { %v1414_v0 = vadd.f32 %v1339_v53, %v4892_v47  ;;  %v5048_v61 = vadd.f32 %v1573_v3, %v1412_v57 }
 0x1bc   :  { %v3463_v42 = vpop.f32.mrf.mxu1  ;;  %v3511_v55 = vpop.f32.mrf.mxu0 }
 0x1be   :  { %v1342_v45 = vpop.f32.mrf.mxu1  ;;  %v1576_v50 = vpop.f32.mrf.mxu0 }
 0x1bf   :  { %v1415_v5 = vadd.f32 %v1342_v45, %v4908_v19  ;;  %v5051_v12 = vadd.f32 %v1576_v50, %v1413_v13 }
 0x1c0   :  { %v3464_v33 = vpop.f32.mrf.mxu1  ;;  %v3512_v58 = vpop.f32.mrf.mxu0 }
 0x1c2   :  { %v1347_v4 = vpop.f32.mrf.mxu1  ;;  %v1581_v14 = vpop.f32.mrf.mxu0 }
 0x1c3   :  { %v1416_v30 = vadd.f32 %v1347_v4, %v4916_v17  ;;  %v5054_v48 = vadd.f32 %v1581_v14, %v1414_v0 }
 0x1c4   :  { %v3467_v60 = vpop.f32.mrf.mxu1  ;;  %v3515_v47 = vpop.f32.mrf.mxu0 }
 0x1c6   :  { %v1350_v11 = vpop.f32.mrf.mxu1  ;;  %v1584_v2 = vpop.f32.mrf.mxu0 }
 0x1c7   :  { %v1417_v24 = vadd.f32 %v1350_v11, %v4932_v7  ;;  %v5057_v6 = vadd.f32 %v1584_v2, %v1415_v5 }
 0x1c8   :  { %v3468_v40 = vpop.f32.mrf.mxu1  ;;  %v3516_v19 = vpop.f32.mrf.mxu0 }
 0x1ca   :  { %v1355_v51 = vpop.f32.mrf.mxu1  ;;  %v1589_v15 = vpop.f32.mrf.mxu0 }
 0x1cb   :  { %v1418_v22 = vadd.f32 %v1355_v51, %v4940_v34  ;;  %v5060_v62 = vadd.f32 %v1589_v15, %v1416_v30 }
 0x1cc   :  { %v3471_v41 = vpop.f32.mrf.mxu1  ;;  %v3519_v17 = vpop.f32.mrf.mxu0 }
 0x1ce   :  { %v1358_v26 = vpop.f32.mrf.mxu1  ;;  %v1592_v52 = vpop.f32.mrf.mxu0 }
 0x1cf   :  { %v1419_v20 = vadd.f32 %v1358_v26, %v4956_v46  ;;  %v5063_v27 = vadd.f32 %v1592_v52, %v1417_v24 }
 0x1d0   :  { %v3472_v36 = vpop.f32.mrf.mxu1  ;;  %v3520_v7 = vpop.f32.mrf.mxu0 }
 0x1d2   :  { %v1363_v39 = vpop.f32.mrf.mxu1  ;;  %v1597_v1 = vpop.f32.mrf.mxu0 }
 0x1d3   :  { %v1420_v37 = vadd.f32 %v1363_v39, %v4964_v21  ;;  %v5066_v28 = vadd.f32 %v1597_v1, %v1418_v22 }
 0x1d4   :  { %v3475_v57 = vpop.f32.mrf.mxu1  ;;  %v3523_v34 = vpop.f32.mrf.mxu0 }
 0x1d6   :  { %v1366_v18 = vpop.f32.mrf.mxu1  ;;  %v1600_v59 = vpop.f32.mrf.mxu0 }
 0x1d7   :  { %v1421_v35 = vadd.f32 %v1366_v18, %v4980_v23  ;;  %v5069_v8 = vadd.f32 %v1600_v59, %v1419_v20 }
 0x1d8   :  { %v3476_v13 = vpop.f32.mrf.mxu1  ;;  %v3524_v46 = vpop.f32.mrf.mxu0 }
 0x1da   :  { %v1371_v49 = vpop.f32.mrf.mxu1  ;;  %v1605_v56 = vpop.f32.mrf.mxu0 }
 0x1db   :  { %v1422_v53 = vadd.f32 %v1371_v49, %v4988_v9  ;;  %v5072_v3 = vadd.f32 %v1605_v56, %v1420_v37 }
 0x1dc   :  { %v3479_v0 = vpop.f32.mrf.mxu1  ;;  %v3527_v21 = vpop.f32.mrf.mxu0 }
 0x1de   :  { %v1374_v42 = vpop.f32.mrf.mxu1  ;;  %v1608_v55 = vpop.f32.mrf.mxu0 }
 0x1df   :  { %v1423_v45 = vadd.f32 %v1374_v42, %v5004_v44  ;;  %v5075_v50 = vadd.f32 %v1608_v55, %v1421_v35 }
 0x1e0   :  { %v3480_v5 = vpop.f32.mrf.mxu1  ;;  %v3528_v23 = vpop.f32.mrf.mxu0 }
 0x1e2   :  { %v1379_v33 = vpop.f32.mrf.mxu1  ;;  %v1613_v58 = vpop.f32.mrf.mxu0 }
 0x1e3   :  { %v1424_v4 = vadd.f32 %v1379_v33, %v5009_v29  ;;  %v5078_v14 = vadd.f32 %v1613_v58, %v1422_v53 }
 0x1e4   :  { %v3483_v30 = vpop.f32.mrf.mxu1  ;;  %v3531_v9 = vpop.f32.mrf.mxu0 }
 0x1e6   :  { %v1382_v60 = vpop.f32.mrf.mxu1  ;;  %v1616_v47 = vpop.f32.mrf.mxu0 }
 0x1e7   :  { %v1425_v11 = vadd.f32 %v1382_v60, %v5020_v32  ;;  %v5081_v2 = vadd.f32 %v1616_v47, %v1423_v45 }
 0x1e8   :  { %v3484_v24 = vpop.f32.mrf.mxu1  ;;  %v3532_v44 = vpop.f32.mrf.mxu0 }
 0x1ea   :  { %v1387_v40 = vpop.f32.mrf.mxu1  ;;  %v1621_v19 = vpop.f32.mrf.mxu0 }
 0x1eb   :  { %v1426_v51 = vadd.f32 %v1387_v40, %v5024_v10  ;;  %v5084_v15 = vadd.f32 %v1621_v19, %v1424_v4 }
 0x1ec   :  { %v3487_v22 = vpop.f32.mrf.mxu1  ;;  %v3535_v29 = vpop.f32.mrf.mxu0 }
 0x1ee   :  { %v1390_v41 = vpop.f32.mrf.mxu1  ;;  %v1624_v17 = vpop.f32.mrf.mxu0 }
 0x1ef   :  { %v1427_v26 = vadd.f32 %v1390_v41, %v5027_v25  ;;  %v5087_v52 = vadd.f32 %v1624_v17, %v1425_v11  ;;  %v5107_v11 = vpop.permute.xlu0 %2182 }
 0x1f0   :  { %v3488_v20 = vpop.f32.mrf.mxu1  ;;  %v3536_v32 = vpop.f32.mrf.mxu0 }
 0x1f2   :  { %v1395_v36 = vpop.f32.mrf.mxu1  ;;  %v1629_v7 = vpop.f32.mrf.mxu0 }
 0x1f3   :  { %v1428_v39 = vadd.f32 %v1395_v36, %v5030_v38  ;;  %v5090_v1 = vadd.f32 %v1629_v7, %v1426_v51  ;;  %v5112_v29 = vpop.permute.xlu0 %2187  ;;  %v5120_v7 = vpop.permute.xlu1 %2192 }
 0x1f4   :  { %v3491_v37 = vpop.f32.mrf.mxu1  ;;  %v3539_v10 = vpop.f32.mrf.mxu0 }
 0x1f6   :  { %v1398_v57 = vpop.f32.mrf.mxu1  ;;  %v1632_v34 = vpop.f32.mrf.mxu0 }
 0x1f7   :  { %v1429_v18 = vadd.f32 %v1398_v57, %v5033_v31  ;;  %v5093_v59 = vadd.f32 %v1632_v34, %v1427_v26 }
 0x1f8   :  { %v3492_v35 = vpop.f32.mrf.mxu1  ;;  %v3540_v25 = vpop.f32.mrf.mxu0 }
 0x1fa   :  { %v1403_v13 = vpop.f32.mrf.mxu1  ;;  %v1637_v46 = vpop.f32.mrf.mxu0 }
 0x1fb   :  { %v1430_v49 = vadd.f32 %v1403_v13, %v5035_v43  ;;  %v5096_v56 = vadd.f32 %v1637_v46, %v1428_v39 }
 0x1fc   :  { %v3495_v53 = vpop.f32.mrf.mxu1  ;;  %v3543_v38 = vpop.f32.mrf.mxu0 }
 0x1fe   :  { %v1406_v0 = vpop.f32.mrf.mxu1  ;;  %v1640_v21 = vpop.f32.mrf.mxu0 }
 0x1ff   :  { %v1431_v42 = vadd.f32 %v1406_v0, %v5038_v16  ;;  %v5099_v55 = vadd.f32 %v1640_v21, %v1429_v18 }
 0x200   :  { %v3496_v45 = vpop.f32.mrf.mxu1  ;;  %v3544_v31 = vpop.f32.mrf.mxu0 }
 0x202   :  { %v1645_v5 = vpop.f32.mrf.mxu0  ;;  %v1807_v23 = vpop.f32.mrf.mxu1 }
 0x203   :  { %v5101_v33 = vadd.f32 %v1645_v5, %v1430_v49  ;;  %v1894_v58 = vadd.f32 %v1807_v23, %v5042_v63  ;;  %v5127_v49 = vpop.permute.xlu1 %2197 }
 0x204   :  { %v3547_v4 = vpop.f32.mrf.mxu0  ;;  %v3559_v43 = vpop.f32.mrf.mxu1 }
 0x206   :  { %v1648_v30 = vpop.f32.mrf.mxu0  ;;  %v1810_v9 = vpop.f32.mrf.mxu1 }
 0x207   :  { %v5104_v60 = vadd.f32 %v1648_v30, %v1431_v42  ;;  %v1895_v47 = vadd.f32 %v1810_v9, %v5045_v54 }
 0x208   :  { %v3548_v16 = vpop.f32.mrf.mxu0  ;;  %v3560_v24 = vpop.f32.mrf.mxu1 }
 0x20a   :  { %v1815_v44 = vpop.f32.mrf.mxu1  ;;  %v2049_v40 = vpop.f32.mrf.mxu0 }
 0x20b   :  { %v1896_v19 = vadd.f32 %v1815_v44, %v5048_v61  ;;  %v5110_v51 = vadd.f32 %v2049_v40, %v1894_v58 }
 0x20c   :  { %v3563_v22 = vpop.f32.mrf.mxu1  ;;  %v3611_v63 = vpop.f32.mrf.mxu0 }
 0x20d   :  { %v2290_v32 = vmul.f32 %v5107_v11, %v5110_v51 }
 0x20e   :  { %v1818_v41 = vpop.f32.mrf.mxu1  ;;  %v2052_v17 = vpop.f32.mrf.mxu0 }
 0x20f   :  { %v5114_v26 = vadd.f32 %v2052_v17, %v1895_v47  ;;  %v1897_v18 = vadd.f32 %v1818_v41, %v5051_v12  ;;  %v5134_v12 = vpop.permute.xlu0 %2202 }
 0x210   :  { %v3564_v20 = vpop.f32.mrf.mxu1  ;;  %v3612_v54 = vpop.f32.mrf.mxu0 }
 0x211   :  { %v2291_v36 = vmul.f32 %v5112_v29, %v5114_v26 }
 0x212   :  { %v1823_v61 = vpop.f32.mrf.mxu1  ;;  %v2057_v39 = vpop.f32.mrf.mxu0 }
 0x213   :  { %v2312_v37 = vadd.f32 %v2291_v36, %v2290_v32  ;;  %v5122_v10 = vadd.f32 %v2057_v39, %v1896_v19  ;;  %v1898_v21 = vadd.f32 %v1823_v61, %v5054_v48  ;;  %v5141_v48 = vpop.permute.xlu1 %2207 }
 0x214   :  { %v3567_v57 = vpop.f32.mrf.mxu1  ;;  %v3615_v34 = vpop.f32.mrf.mxu0 }
 0x215   :  { %v2292_v35 = vmul.f32 %v5120_v7, %v5122_v10 }
 0x216   :  { %v1826_v25 = vpop.f32.mrf.mxu1  ;;  %v2060_v13 = vpop.f32.mrf.mxu0 }
 0x217   :  { %v2313_v46 = vadd.f32 %v2312_v37, %v2292_v35  ;;  %v5129_v53 = vadd.f32 %v2060_v13, %v1897_v18  ;;  %v1899_v43 = vadd.f32 %v1826_v25, %v5057_v6  ;;  %v5148_v6 = vpop.permute.xlu0 %2212 }
 0x218   :  { %v3568_v38 = vpop.f32.mrf.mxu1  ;;  %v3616_v0 = vpop.f32.mrf.mxu0 }
 0x219   :  { %v2293_v42 = vmul.f32 %v5127_v49, %v5129_v53 }
 0x21a   :  { %v1831_v45 = vpop.f32.mrf.mxu1  ;;  %v2065_v31 = vpop.f32.mrf.mxu0 }
 0x21b   :  { %v2314_v5 = vadd.f32 %v2313_v46, %v2293_v42  ;;  %v5136_v23 = vadd.f32 %v2065_v31, %v1898_v21  ;;  %v1900_v19 = vadd.f32 %v1831_v45, %v5060_v62  ;;  %v5155_v62 = vpop.permute.xlu1 %2217 }
 0x21c   :  { %v3571_v58 = vpop.f32.mrf.mxu1  ;;  %v3619_v4 = vpop.f32.mrf.mxu0 }
 0x21d   :  { %v2294_v30 = vmul.f32 %v5134_v12, %v5136_v23 }
 0x21e   :  { %v1834_v9 = vpop.f32.mrf.mxu1  ;;  %v2068_v47 = vpop.f32.mrf.mxu0 }
 0x21f   :  { %v2315_v16 = vadd.f32 %v2314_v5, %v2294_v30  ;;  %v5143_v24 = vadd.f32 %v2068_v47, %v1899_v43  ;;  %v1901_v36 = vadd.f32 %v1834_v9, %v5063_v27  ;;  %v5162_v27 = vpop.permute.xlu0 %2222 }
 0x220   :  { %v3572_v44 = vpop.f32.mrf.mxu1  ;;  %v3620_v40 = vpop.f32.mrf.mxu0 }
 0x221   :  { %v2295_v22 = vmul.f32 %v5141_v48, %v5143_v24 }
 0x222   :  { %v1839_v63 = vpop.f32.mrf.mxu1  ;;  %v2073_v41 = vpop.f32.mrf.mxu0 }
 0x223   :  { %v2316_v17 = vadd.f32 %v2315_v16, %v2295_v22  ;;  %v5150_v20 = vadd.f32 %v2073_v41, %v1900_v19  ;;  %v1902_v25 = vadd.f32 %v1839_v63, %v5066_v28  ;;  %v5169_v28 = vpop.permute.xlu1 %2227 }
 0x224   :  { %v3575_v54 = vpop.f32.mrf.mxu1  ;;  %v3623_v32 = vpop.f32.mrf.mxu0 }
 0x225   :  { %v2296_v61 = vmul.f32 %v5148_v6, %v5150_v20 }
 0x226   :  { %v1842_v39 = vpop.f32.mrf.mxu1  ;;  %v2076_v37 = vpop.f32.mrf.mxu0 }
 0x227   :  { %v2317_v57 = vadd.f32 %v2316_v17, %v2296_v61  ;;  %v5157_v34 = vadd.f32 %v2076_v37, %v1901_v36  ;;  %v1903_v31 = vadd.f32 %v1842_v39, %v5069_v8  ;;  %v5176_v8 = vpop.permute.xlu0 %2232 }
 0x228   :  { %v3576_v18 = vpop.f32.mrf.mxu1  ;;  %v3624_v35 = vpop.f32.mrf.mxu0 }
 0x229   :  { %v2297_v13 = vmul.f32 %v5155_v62, %v5157_v34 }
 0x22a   :  { %v1847_v46 = vpop.f32.mrf.mxu1  ;;  %v2081_v38 = vpop.f32.mrf.mxu0 }
 0x22b   :  { %v2318_v0 = vadd.f32 %v2317_v57, %v2297_v13  ;;  %v5164_v21 = vadd.f32 %v2081_v38, %v1902_v25  ;;  %v1904_v16 = vadd.f32 %v1847_v46, %v5072_v3  ;;  %v5183_v3 = vpop.permute.xlu1 %2237 }
 0x22c   :  { %v3579_v42 = vpop.f32.mrf.mxu1  ;;  %v3627_v45 = vpop.f32.mrf.mxu0 }
 0x22d   :  { %v2298_v5 = vmul.f32 %v5162_v27, %v5164_v21 }
 0x22e   :  { %v1850_v58 = vpop.f32.mrf.mxu1  ;;  %v2084_v4 = vpop.f32.mrf.mxu0 }
 0x22f   :  { %v2319_v43 = vadd.f32 %v2318_v0, %v2298_v5  ;;  %v5171_v30 = vadd.f32 %v2084_v4, %v1903_v31  ;;  %v1905_v54 = vadd.f32 %v1850_v58, %v5075_v50  ;;  %v5190_v50 = vpop.permute.xlu0 %2242 }
 0x230   :  { %v3580_v9 = vpop.f32.mrf.mxu1  ;;  %v3628_v47 = vpop.f32.mrf.mxu0 }
 0x231   :  { %v2299_v44 = vmul.f32 %v5169_v28, %v5171_v30 }
 0x232   :  { %v1855_v40 = vpop.f32.mrf.mxu1  ;;  %v2089_v19 = vpop.f32.mrf.mxu0 }
 0x233   :  { %v2320_v22 = vadd.f32 %v2319_v43, %v2299_v44  ;;  %v5178_v63 = vadd.f32 %v2089_v19, %v1904_v16  ;;  %v1906_v35 = vadd.f32 %v1855_v40, %v5078_v14  ;;  %v5197_v14 = vpop.permute.xlu1 %2247 }
 0x234   :  { %v3583_v41 = vpop.f32.mrf.mxu1  ;;  %v3631_v17 = vpop.f32.mrf.mxu0 }
 0x235   :  { %v2300_v32 = vmul.f32 %v5176_v8, %v5178_v63 }
 0x236   :  { %v1858_v36 = vpop.f32.mrf.mxu1  ;;  %v2092_v61 = vpop.f32.mrf.mxu0 }
 0x237   :  { %v2321_v39 = vadd.f32 %v2320_v22, %v2300_v32  ;;  %v5185_v37 = vadd.f32 %v2092_v61, %v1905_v54  ;;  %v1907_v31 = vadd.f32 %v1858_v36, %v5081_v2  ;;  %v5204_v2 = vpop.permute.xlu0 %2252 }
 0x238   :  { %v3584_v57 = vpop.f32.mrf.mxu1  ;;  %v3632_v18 = vpop.f32.mrf.mxu0 }
 0x239   :  { %v2301_v25 = vmul.f32 %v5183_v3, %v5185_v37 }
 0x23a   :  { %v1863_v13 = vpop.f32.mrf.mxu1  ;;  %v2097_v46 = vpop.f32.mrf.mxu0 }
 0x23b   :  { %v2322_v38 = vadd.f32 %v2321_v39, %v2301_v25  ;;  %v5192_v0 = vadd.f32 %v2097_v46, %v1906_v35  ;;  %v1908_v44 = vadd.f32 %v1863_v13, %v5084_v15  ;;  %v5211_v15 = vpop.permute.xlu1 %2257 }
 0x23c   :  { %v3587_v42 = vpop.f32.mrf.mxu1  ;;  %v3635_v45 = vpop.f32.mrf.mxu0 }
 0x23d   :  { %v2302_v5 = vmul.f32 %v5190_v50, %v5192_v0 }
 0x23e   :  { %v1866_v58 = vpop.f32.mrf.mxu1  ;;  %v2100_v4 = vpop.f32.mrf.mxu0 }
 0x23f   :  { %v2323_v43 = vadd.f32 %v2322_v38, %v2302_v5  ;;  %v5199_v9 = vadd.f32 %v2100_v4, %v1907_v31  ;;  %v1909_v36 = vadd.f32 %v1866_v58, %v5087_v52  ;;  %v5218_v52 = vpop.permute.xlu0 %2262 }
 0x240   :  { %v3588_v47 = vpop.f32.mrf.mxu1  ;;  %v3636_v16 = vpop.f32.mrf.mxu0 }
 0x241   :  { %v2303_v40 = vmul.f32 %v5197_v14, %v5199_v9 }
 0x242   :  { %v1871_v19 = vpop.f32.mrf.mxu1  ;;  %v2105_v22 = vpop.f32.mrf.mxu0 }
 0x243   :  { %v2324_v41 = vadd.f32 %v2323_v43, %v2303_v40  ;;  %v5206_v17 = vadd.f32 %v2105_v22, %v1908_v44  ;;  %v1910_v46 = vadd.f32 %v1871_v19, %v5090_v1  ;;  %v5225_v1 = vpop.permute.xlu1 %2267 }
 0x244   :  { %v3591_v54 = vpop.f32.mrf.mxu1  ;;  %v3639_v32 = vpop.f32.mrf.mxu0 }
 0x245   :  { %v2304_v61 = vmul.f32 %v5204_v2, %v5206_v17 }
 0x246   :  { %v1874_v39 = vpop.f32.mrf.mxu1  ;;  %v2108_v57 = vpop.f32.mrf.mxu0 }
 0x247   :  { %v2325_v18 = vadd.f32 %v2324_v41, %v2304_v61  ;;  %v5213_v35 = vadd.f32 %v2108_v57, %v1909_v36  ;;  %v1911_v43 = vadd.f32 %v1874_v39, %v5093_v59  ;;  %v5232_v59 = vpop.permute.xlu0 %2272 }
 0x248   :  { %v3592_v25 = vpop.f32.mrf.mxu1  ;;  %v3640_v13 = vpop.f32.mrf.mxu0 }
 0x249   :  { %v2305_v38 = vmul.f32 %v5211_v15, %v5213_v35 }
 0x24a   :  { %v1879_v42 = vpop.f32.mrf.mxu1  ;;  %v2113_v45 = vpop.f32.mrf.mxu0 }
 0x24b   :  { %v2326_v31 = vadd.f32 %v2325_v18, %v2305_v38  ;;  %v5220_v5 = vadd.f32 %v2113_v45, %v1910_v46  ;;  %v1912_v54 = vadd.f32 %v1879_v42, %v5096_v56  ;;  %v5239_v56 = vpop.permute.xlu1 %2277 }
 0x24c   :  { %v3595_v58 = vpop.f32.mrf.mxu1  ;;  %v3643_v4 = vpop.f32.mrf.mxu0 }
 0x24d   :  { %v2306_v47 = vmul.f32 %v5218_v52, %v5220_v5 }
 0x24e   :  { %v1882_v16 = vpop.f32.mrf.mxu1  ;;  %v2116_v44 = vpop.f32.mrf.mxu0 }
 0x24f   :  { %v2327_v40 = vadd.f32 %v2326_v31, %v2306_v47  ;;  %v5227_v19 = vadd.f32 %v2116_v44, %v1911_v43  ;;  %v1913_v13 = vadd.f32 %v1882_v16, %v5099_v55  ;;  %v5248_v16 = vpop.permute.xlu0 %2282 }
 0x250   :  { %v3596_v22 = vpop.f32.mrf.mxu1  ;;  %v3644_v41 = vpop.f32.mrf.mxu0 }
 0x251   :  { %v2307_v32 = vmul.f32 %v5225_v1, %v5227_v19 }
 0x252   :  { %v1887_v36 = vpop.f32.mrf.mxu1  ;;  %v2121_v61 = vpop.f32.mrf.mxu0 }
 0x253   :  { %v2328_v39 = vadd.f32 %v2327_v40, %v2307_v32  ;;  %v5234_v57 = vadd.f32 %v2121_v61, %v1912_v54  ;;  %v1914_v43 = vadd.f32 %v1887_v36, %v5101_v33  ;;  %v5255_v33 = vpop.permute.xlu1 %2287 }
 0x254   :  { %v3599_v18 = vpop.f32.mrf.mxu1  ;;  %v3647_v25 = vpop.f32.mrf.mxu0 }
 0x255   :  { %v2308_v46 = vmul.f32 %v5232_v59, %v5234_v57 }
 0x256   :  { %v1890_v38 = vpop.f32.mrf.mxu1  ;;  %v2124_v45 = vpop.f32.mrf.mxu0 }
 0x257   :  { %v2329_v42 = vadd.f32 %v2328_v39, %v2308_v46  ;;  %v5241_v31 = vadd.f32 %v2124_v45, %v1913_v13  ;;  %v1915_v41 = vadd.f32 %v1890_v38, %v5104_v60 }
 0x258   :  { %v3648_v58 = vpop.f32.mrf.mxu0  ;;  %v3600_v4 = vpop.f32.mrf.mxu1 }
 0x259   :  { %v2309_v47 = vmul.f32 %v5239_v56, %v5241_v31 }
 0x25a   :  { %v2129_v44 = vpop.f32.mrf.mxu0 }
 0x25b   :  { %v2330_v40 = vadd.f32 %v2329_v42, %v2309_v47  ;;  %v5246_v55 = vadd.f32 %v2129_v44, %v1914_v43 }
 0x25c   :  { %v3651_v22 = vpop.f32.mrf.mxu0 }
 0x25d   :  { %v2310_v54 = vmul.f32 %v5248_v16, %v5246_v55 }
 0x25e   :  { %v2132_v32 = vpop.f32.mrf.mxu0 }
 0x25f   :  { %v2331_v61 = vadd.f32 %v2330_v40, %v2310_v54  ;;  %v5253_v39 = vadd.f32 %v2132_v32, %v1915_v41 }
 0x260   :  { %v3652_v36 = vpop.f32.mrf.mxu0 }
 0x261   :  { %v2311_v18 = vmul.f32 %v5255_v33, %v5253_v39 }
 0x263   :  { %v2332_v25 = vadd.f32 %v2331_v61, %v2311_v18 }
 0x265   :  { %v2333_v13 = vrot.slane %v2332_v25, 4 }
 0x267   :  { %v2334_v46 = vadd.f32 %v2333_v13, %v2332_v25 }
 0x269   :  { %v2335_v45 = vrot.slane %v2334_v46, 2 }
 0x26b   :  { %v2336_v42 = vadd.f32 %v2335_v45, %v2334_v46 }
 0x26d   :  { %v2337_v58 = vrot.slane %v2336_v42, 1 }
 0x26f   :  { %v2338_v60 = vadd.f32 %v2337_v58, %v2336_v42 }
 0x271   :  { %v5259_v38 = vmul.f32 0.0078125, %v2338_v60 }
 0x273   :  { %v2340_v4 = vsub.f32 %v5110_v51, %v5259_v38  ;;  %v2341_v43 = vsub.f32 %v5114_v26, %v5259_v38  ;;  %v2342_v47 = vsub.f32 %v5122_v10, %v5259_v38  ;;  %v2343_v44 = vsub.f32 %v5129_v53, %v5259_v38 }
 0x274   :  { %v2344_v40 = vsub.f32 %v5136_v23, %v5259_v38  ;;  %v2345_v22 = vsub.f32 %v5143_v24, %v5259_v38  ;;  %v2346_v41 = vsub.f32 %v5150_v20, %v5259_v38  ;;  %v2347_v51 = vsub.f32 %v5157_v34, %v5259_v38 }
 0x275   :  { %v2348_v26 = vsub.f32 %v5164_v21, %v5259_v38  ;;  %v2349_v10 = vsub.f32 %v5171_v30, %v5259_v38  ;;  %v2350_v53 = vsub.f32 %v5178_v63, %v5259_v38  ;;  %v2351_v23 = vsub.f32 %v5185_v37, %v5259_v38 }
 0x276   :  { %v2352_v24 = vsub.f32 %v5192_v0, %v5259_v38  ;;  %v2353_v20 = vsub.f32 %v5199_v9, %v5259_v38  ;;  %v2354_v34 = vsub.f32 %v5206_v17, %v5259_v38  ;;  %v2355_v21 = vsub.f32 %v5213_v35, %v5259_v38 }
 0x277   :  { %v2356_v30 = vsub.f32 %v5220_v5, %v5259_v38  ;;  %v2357_v63 = vsub.f32 %v5227_v19, %v5259_v38  ;;  %v2358_v37 = vsub.f32 %v5234_v57, %v5259_v38  ;;  %v2359_v0 = vsub.f32 %v5241_v31, %v5259_v38 }
 0x278   :  { %v2360_v9 = vsub.f32 %v5246_v55, %v5259_v38  ;;  %v2361_v17 = vsub.f32 %v5253_v39, %v5259_v38  ;;  %v5306_v35 = vmul.f32 %v2340_v4, %v5107_v11  ;;  %v5309_v5 = vmul.f32 %v2341_v43, %v5112_v29 }
 0x279   :  { %v5312_v19 = vmul.f32 %v2342_v47, %v5120_v7  ;;  %v5319_v55 = vmul.f32 %v2343_v44, %v5127_v49  ;;  %v5322_v54 = vmul.f32 %v2344_v40, %v5134_v12  ;;  %v5327_v32 = vmul.f32 %v2345_v22, %v5141_v48 }
 0x27a   :  { %v2384_v57 = vmul.f32 %v5306_v35, %v5306_v35  ;;  %v2385_v31 = vmul.f32 %v5309_v5, %v5309_v5  ;;  %v5332_v39 = vmul.f32 %v2346_v41, %v5148_v6  ;;  %v5337_v12 = vmul.f32 %v2347_v51, %v5155_v62 }
 0x27b   :  { %v2386_v11 = vmul.f32 %v5312_v19, %v5312_v19  ;;  %v2387_v7 = vmul.f32 %v5319_v55, %v5319_v55  ;;  %v2388_v49 = vmul.f32 %v5322_v54, %v5322_v54  ;;  %v2389_v18 = vmul.f32 %v5327_v32, %v5327_v32 }
 0x27c   :  { %v2406_v29 = vadd.f32 %v2385_v31, %v2384_v57  ;;  %v5342_v48 = vmul.f32 %v2348_v26, %v5162_v27  ;;  %v2390_v13 = vmul.f32 %v5332_v39, %v5332_v39  ;;  %v5347_v6 = vmul.f32 %v2349_v10, %v5169_v28 }
 0x27d   :  { %v2391_v45 = vmul.f32 %v5337_v12, %v5337_v12  ;;  %v5352_v62 = vmul.f32 %v2350_v53, %v5176_v8  ;;  %v5357_v27 = vmul.f32 %v2351_v23, %v5183_v3  ;;  %v5362_v28 = vmul.f32 %v2352_v24, %v5190_v50 }
 0x27e   :  { %v2407_v61 = vadd.f32 %v2406_v29, %v2386_v11  ;;  %v2392_v58 = vmul.f32 %v5342_v48, %v5342_v48  ;;  %v2393_v38 = vmul.f32 %v5347_v6, %v5347_v6  ;;  %v5367_v8 = vmul.f32 %v2353_v20, %v5197_v14 }
 0x27f   :  { %v2394_v43 = vmul.f32 %v5352_v62, %v5352_v62  ;;  %v2395_v44 = vmul.f32 %v5357_v27, %v5357_v27  ;;  %v2376_v3 = vmul.f32 %v2354_v34, %v5204_v2  ;;  %v2396_v22 = vmul.f32 %v5362_v28, %v5362_v28 }
 0x280   :  { %v2408_v36 = vadd.f32 %v2407_v61, %v2387_v7  ;;  %v2377_v50 = vmul.f32 %v2355_v21, %v5211_v15  ;;  %v2397_v51 = vmul.f32 %v5367_v8, %v5367_v8  ;;  %v2378_v10 = vmul.f32 %v2356_v30, %v5218_v52 }
 0x281   :  { %v2398_v14 = vmul.f32 %v2376_v3, %v2376_v3  ;;  %v2379_v23 = vmul.f32 %v2357_v63, %v5225_v1  ;;  %v2380_v2 = vmul.f32 %v2358_v37, %v5232_v59  ;;  %v2381_v31 = vmul.f32 %v2359_v0, %v5239_v56 }
 0x282   :  { %v2409_v25 = vadd.f32 %v2408_v36, %v2388_v49  ;;  %v2399_v24 = vmul.f32 %v2377_v50, %v2377_v50  ;;  %v2400_v34 = vmul.f32 %v2378_v10, %v2378_v10  ;;  %v2382_v21 = vmul.f32 %v2360_v9, %v5248_v16 }
 0x283   :  { %v2401_v11 = vmul.f32 %v2379_v23, %v2379_v23  ;;  %v2402_v29 = vmul.f32 %v2380_v2, %v2380_v2  ;;  %v2383_v52 = vmul.f32 %v2361_v17, %v5255_v33  ;;  %v2403_v30 = vmul.f32 %v2381_v31, %v2381_v31  ;;  %v2434_v33 = vld [vmem:[%s5439_s2] sm:$0x1] }
 0x284   :  { %v2410_v46 = vadd.f32 %v2409_v25, %v2389_v18  ;;  %v2404_v49 = vmul.f32 %v2382_v21, %v2382_v21  ;;  %v2439_v16 = vlaneseq }
 0x285   :  { %v2405_v63 = vmul.f32 %v2383_v52, %v2383_v52 }
 0x286   :  { %v2411_v42 = vadd.f32 %v2410_v46, %v2390_v13  ;;  %v2440_v9 = vshrl.u32 %v2439_v16, 7 }
 0x288   :  { %v2412_v60 = vadd.f32 %v2411_v42, %v2391_v45  ;;  %v2441_v17 = vsub.s32 0, %v2440_v9 }
 0x28a   :  { %v2413_v4 = vadd.f32 %v2412_v60, %v2392_v58 }
 0x28c   :  { %v2414_v47 = vadd.f32 %v2413_v4, %v2393_v38 }
 0x28e   :  { %v2415_v40 = vadd.f32 %v2414_v47, %v2394_v43 }
 0x290   :  { %v2416_v41 = vadd.f32 %v2415_v40, %v2395_v44 }
 0x292   :  { %v2417_v26 = vadd.f32 %v2416_v41, %v2396_v22 }
 0x294   :  { %v2418_v53 = vadd.f32 %v2417_v26, %v2397_v51 }
 0x296   :  { %v2419_v20 = vadd.f32 %v2418_v53, %v2398_v14 }
 0x298   :  { %v2420_v57 = vadd.f32 %v2419_v20, %v2399_v24 }
 0x29a   :  { %v2421_v15 = vadd.f32 %v2420_v57, %v2400_v34 }
 0x29c   :  { %v2422_v7 = vadd.f32 %v2421_v15, %v2401_v11 }
 0x29e   :  { %v2423_v61 = vadd.f32 %v2422_v7, %v2402_v29 }
 0x2a0   :  { %v2424_v1 = vadd.f32 %v2423_v61, %v2403_v30 }
 0x2a2   :  { %v2425_v36 = vadd.f32 %v2424_v1, %v2404_v49 }
 0x2a4   :  { %v2426_v18 = vadd.f32 %v2425_v36, %v2405_v63 }
 0x2a6   :  { %v2427_v59 = vrot.slane %v2426_v18, 4 }
 0x2a8   :  { %v2428_v37 = vadd.f32 %v2427_v59, %v2426_v18 }
 0x2aa   :  { %v2429_v25 = vrot.slane %v2428_v37, 2 }
 0x2ac   :  { %v2430_v13 = vadd.f32 %v2429_v25, %v2428_v37 }
 0x2ae   :  { %v2431_v56 = vrot.slane %v2430_v13, 1 }
 0x2b0   :  { %v2432_v0 = vadd.f32 %v2431_v56, %v2430_v13 }
 0x2b2   :  { %v2433_v46 = vmul.f32 0.0078125, %v2432_v0 }
 0x2b4   :  { %v2435_v45 = vadd.f32 1e-05, %v2433_v46 }
 0x2b6   :  { %3702 = vrsqrt.f32 %v2435_v45 }
 0x2c3   :  { %v3703_v42 = vpop.eup %3702 }
 0x2c4   :  { %v2437_v58 = vmul.f32 %v3703_v42, %v2434_v33 }
 0x2c6   :  { %v2442_v60 = vrot.slane %v2437_v58, %v2441_v17 }
 0x2c8   :  { %v2444_v38 = vmul.f32 %v2442_v60, %v5306_v35  ;;  %v2445_v4 = vmul.f32 %v2442_v60, %v5309_v5  ;;  %v2446_v43 = vmul.f32 %v2442_v60, %v5312_v19  ;;  %v2447_v47 = vmul.f32 %v2442_v60, %v5319_v55  ;;  %v2940_v19 = vld [vmem:[%s5440_s3] ss:$0 sm:$0xff] }
 0x2c9   :  { %v2448_v44 = vmul.f32 %v2442_v60, %v5322_v54  ;;  %v2449_v40 = vmul.f32 %v2442_v60, %v5327_v32  ;;  %v2450_v22 = vmul.f32 %v2442_v60, %v5332_v39  ;;  %v2451_v41 = vmul.f32 %v2442_v60, %v5337_v12 }
 0x2ca   :  { %v2452_v51 = vmul.f32 %v2442_v60, %v5342_v48  ;;  %v2453_v26 = vmul.f32 %v2442_v60, %v5347_v6  ;;  %v2454_v35 = vmul.f32 %v2442_v60, %v5352_v62  ;;  %v2455_v5 = vmul.f32 %v2442_v60, %v5357_v27 }
 0x2cb   :  { %v2456_v55 = vmul.f32 %v2442_v60, %v5362_v28  ;;  %v2457_v54 = vmul.f32 %v2442_v60, %v5367_v8  ;;  %v2458_v32 = vmul.f32 %v2442_v60, %v2376_v3  ;;  %v2459_v39 = vmul.f32 %v2442_v60, %v2377_v50 }
 0x2cc   :  { %v2460_v14 = vmul.f32 %v2442_v60, %v2378_v10  ;;  %v2461_v12 = vmul.f32 %v2442_v60, %v2379_v23  ;;  %v2462_v53 = vmul.f32 %v2442_v60, %v2380_v2  ;;  %v2463_v48 = vmul.f32 %v2442_v60, %v2381_v31 }
 0x2cd   :  { %v2464_v24 = vmul.f32 %v2442_v60, %v2382_v21  ;;  %v2465_v6 = vmul.f32 %v2442_v60, %v2383_v52  ;;  %v2473_v20 = vadd.f32 %v2940_v19, %v2444_v38  ;;  %v2474_v62 = vadd.f32 %v2940_v19, %v2445_v4 }
 0x2ce   :  { %v2475_v34 = vadd.f32 %v2940_v19, %v2446_v43  ;;  %v2476_v27 = vadd.f32 %v2940_v19, %v2447_v47  ;;  %v2477_v57 = vadd.f32 %v2940_v19, %v2448_v44  ;;  %v2478_v11 = vadd.f32 %v2940_v19, %v2449_v40 }
 0x2cf   :  { %v2479_v15 = vadd.f32 %v2940_v19, %v2450_v22  ;;  %v2480_v29 = vadd.f32 %v2940_v19, %v2451_v41  ;;  %v2481_v7 = vadd.f32 %v2940_v19, %v2452_v51  ;;  %v2482_v28 = vadd.f32 %v2940_v19, %v2453_v26 }
 0x2d0   :  { %v2483_v30 = vadd.f32 %v2940_v19, %v2454_v35  ;;  %v2484_v8 = vadd.f32 %v2940_v19, %v2455_v5  ;;  %v2485_v3 = vadd.f32 %v2940_v19, %v2456_v55  ;;  %v2486_v50 = vadd.f32 %v2940_v19, %v2457_v54 }
 0x2d1   :  { %v2487_v10 = vadd.f32 %v2940_v19, %v2458_v32  ;;  %v2488_v23 = vadd.f32 %v2940_v19, %v2459_v39  ;;  %v2489_v2 = vadd.f32 %v2940_v19, %v2460_v14  ;;  %v2490_v31 = vadd.f32 %v2940_v19, %v2461_v12 }
 0x2d2   :  { %v2491_v21 = vadd.f32 %v2940_v19, %v2462_v53  ;;  %v2492_v52 = vadd.f32 %v2940_v19, %v2463_v48  ;;  %v2493_v61 = vadd.f32 %v2940_v19, %v2464_v24  ;;  %v2494_v49 = vadd.f32 %v2940_v19, %v2465_v6 }
 0x2d3   :  { %v2495_v1 = vmax.f32 %v2473_v20, 0.0  ;;  %v2496_v63 = vmax.f32 %v2474_v62, 0.0  ;;  %v2497_v36 = vmax.f32 %v2475_v34, 0.0  ;;  %v2498_v18 = vmax.f32 %v2476_v27, 0.0 }
 0x2d4   :  { %v2499_v59 = vmax.f32 %v2477_v57, 0.0  ;;  %v2500_v37 = vmax.f32 %v2478_v11, 0.0  ;;  %v2501_v25 = vmax.f32 %v2479_v15, 0.0  ;;  %v2502_v13 = vmax.f32 %v2480_v29, 0.0 }
 0x2d5   :  { %v2503_v56 = vmax.f32 %v2481_v7, 0.0  ;;  %v2504_v0 = vmax.f32 %v2482_v28, 0.0  ;;  %v2505_v46 = vmax.f32 %v2483_v30, 0.0  ;;  %v2506_v45 = vmax.f32 %v2484_v8, 0.0 }
 0x2d6   :  { %v2507_v16 = vmax.f32 %v2485_v3, 0.0  ;;  %v2508_v9 = vmax.f32 %v2486_v50, 0.0  ;;  %v2509_v33 = vmax.f32 %v2487_v10, 0.0  ;;  %v2510_v17 = vmax.f32 %v2488_v23, 0.0 }
 0x2d7   :  { %v2511_v42 = vmax.f32 %v2489_v2, 0.0  ;;  %v2512_v58 = vmax.f32 %v2490_v31, 0.0  ;;  %v2513_v60 = vmax.f32 %v2491_v21, 0.0  ;;  %v2514_v38 = vmax.f32 %v2492_v52, 0.0 }
 0x2d8   :  { %v2515_v4 = vmax.f32 %v2493_v61, 0.0  ;;  %v2516_v43 = vmax.f32 %v2494_v49, 0.0  ;;  %v2988_v47 = vpack.c.bf16 %v2496_v63, %v2495_v1  ;;  %v2993_v44 = vpack.c.bf16 %v2498_v18, %v2497_v36 }
 0x2d9   :  { %v2998_v40 = vpack.c.bf16 %v2500_v37, %v2499_v59  ;;  %v3003_v22 = vpack.c.bf16 %v2502_v13, %v2501_v25  ;;  %v3008_v41 = vpack.c.bf16 %v2504_v0, %v2503_v56  ;;  %v3013_v51 = vpack.c.bf16 %v2506_v45, %v2505_v46 }
 0x2da   :  { %2989 = vst [vmem:[%s5441_s5] sm:$0xff] %v2988_v47   ;;  %3040 = vst [vmem:[%s5441_s5 + $0x8] sm:$0xff] %v2993_v44   ;;  %v3018_v26 = vpack.c.bf16 %v2508_v9, %v2507_v16  ;;  %v3023_v35 = vpack.c.bf16 %v2510_v17, %v2509_v33  ;;  %v3028_v5 = vpack.c.bf16 %v2512_v58, %v2511_v42 }
 0x2db   :  { %v3033_v19 = vpack.c.bf16 %v2514_v38, %v2513_v60  ;;  %3041 = vst [vmem:[%s5441_s5 + $0x10] sm:$0xff] %v2998_v40   ;;  %3042 = vst [vmem:[%s5441_s5 + $0x18] sm:$0xff] %v3003_v22   ;;  %v3038_v55 = vpack.c.bf16 %v2516_v43, %v2515_v4 }
 0x2dc   :  { %3043 = vst [vmem:[%s5441_s5 + $0x20] sm:$0xff] %v3008_v41   ;;  %3044 = vst [vmem:[%s5441_s5 + $0x28] sm:$0xff] %v3013_v51  }
 0x2dd   :  { %3045 = vst [vmem:[%s5441_s5 + $0x30] sm:$0xff] %v3018_v26   ;;  %3046 = vst [vmem:[%s5441_s5 + $0x38] sm:$0xff] %v3023_v35  }
 0x2de   :  { %3047 = vst [vmem:[%s5441_s5 + $0x40] sm:$0xff] %v3028_v5   ;;  %3048 = vst [vmem:[%s5441_s5 + $0x48] sm:$0xff] %v3033_v19  }
 0x2df   :  { %3049 = vst [vmem:[%s5441_s5 + $0x50] sm:$0xff] %v3038_v55  }

// kernel: basic_block_forward.5
= control target key start
LH: loop header
LB: loop body
LE: loop exit
PB: predicated region body
PF: predicated region fallthrough
CT: control target
= control target key end

     0   :  { %v4062_v0 = vmov 0.0   ;;  %vm4063_vm0 = vmmov 0   ;;  %s6303_s1 = inlined_call_operand.vmem [shape: bf16[9,128,128], index: 1, kind: input, shape index: {}]   ;;  %s6304_s0 = inlined_call_operand.vmem [shape: f32[1,230,128], index: 0, kind: input, shape index: {}]   ;;  %s6305_s4 = inlined_call_operand.vmem [shape: f32[208,1], index: 4, kind: input, shape index: {}]   ;;  %s6306_s5 = inlined_call_operand.vmem [shape: bf16[208,128], index: 5, kind: input, shape index: {}]   ;;  %s6307_s2 = inlined_call_operand.vmem [shape: f32[1,128], index: 2, kind: input, shape index: {}]   ;;  %s6308_s3 = inlined_call_operand.vmem [shape: f32[1,128], index: 3, kind: input, shape index: {}]   ;;  %s6309_s6 = inlined_call_operand.vmem [shape: f32[208,128], index: 6, kind: output, shape index: {}]  }
   0x1   :  { %3355 = vmatprep.subr.bf16.mxu0 %v4062_v0  ;;  %3967 = vmatprep.subr.bf16.mxu1 %v4062_v0  ;;  %v3988_v1 = vld [vmem:[%s6303_s1 + $0x78] sm:$0xff]   ;;  %v3989_v2 = vld [vmem:[%s6303_s1 + $0x70] sm:$0xff]   ;;  %v3990_v3 = vld [vmem:[%s6303_s1 + $0x68] sm:$0xff]  }
   0x2   :  { %3371 = vmatprep.mubr.msk.bf16.mxu0 %vm4063_vm0, %v4062_v0  ;;  %3399 = vmatprep.mubr.msk.bf16.mxu1 %vm4063_vm0, %v4062_v0  ;;  %v3991_v4 = vld [vmem:[%s6303_s1 + $0x60] sm:$0xff]   ;;  %v3992_v5 = vld [vmem:[%s6303_s1 + $0x58] sm:$0xff]   ;;  %v3993_v6 = vld [vmem:[%s6303_s1 + $0x50] sm:$0xff]  }
   0x3   :  { %3356 = vmatpush3.bf16.msra.mxu0 %v3988_v1  ;;  %3975 = vmatpush3.bf16.msra.mxu1 %v3988_v1  ;;  %v3994_v7 = vld [vmem:[%s6303_s1 + $0x48] sm:$0xff]   ;;  %v3995_v8 = vld [vmem:[%s6303_s1 + $0x40] sm:$0xff]   ;;  %v93_v11 = vld [vmem:[%s6304_s0 + $0x71] sm:$0xff] }
   0x4   :  { %3357 = vmatprep.subr.bf16.mxu0 %v4062_v0  ;;  %3968 = vmatprep.subr.bf16.mxu1 %v4062_v0  ;;  %v79_v9 = vld [vmem:[%s6304_s0 + $0x1] sm:$0xff]  ;;  %v80_v10 = vld [vmem:[%s6304_s0 + $0x9] sm:$0xff]  ;;  %v94_v12 = vld [vmem:[%s6304_s0 + $0x79] sm:$0xff] }
   0x5   :  { %v105_v13 = vpack.c.bf16 %v80_v10, %v79_v9  ;;  %v112_v14 = vpack.c.bf16 %v94_v12, %v93_v11  ;;  %v3996_v15 = vld [vmem:[%s6303_s1 + $0xb8] sm:$0xff]   ;;  %v95_v19 = vld [vmem:[%s6304_s0 + $0x81] sm:$0xff]  ;;  %v96_v20 = vld [vmem:[%s6304_s0 + $0x89] sm:$0xff] }
   0x6   :  { %v3997_v16 = vld [vmem:[%s6303_s1 + $0x38] sm:$0xff]   ;;  %v3998_v21 = vld [vmem:[%s6303_s1 + $0xb0] sm:$0xff]   ;;  %v113_v24 = vpack.c.bf16 %v96_v20, %v95_v19  ;;  %v4000_v25 = vld [vmem:[%s6303_s1 + $0xa8] sm:$0xff]  }
   0x7   :  { %3358 = vmatpush3.bf16.msra.mxu0 %v3989_v2  ;;  %3976 = vmatpush3.bf16.msra.mxu1 %v3989_v2  ;;  %v81_v17 = vld [vmem:[%s6304_s0 + $0x11] sm:$0xff]  ;;  %v82_v18 = vld [vmem:[%s6304_s0 + $0x19] sm:$0xff]  ;;  %v4001_v26 = vld [vmem:[%s6303_s1 + $0x28] sm:$0xff]  }
   0x8   :  { %3359 = vmatprep.subr.bf16.mxu0 %v4062_v0  ;;  %3969 = vmatprep.subr.bf16.mxu1 %v4062_v0  ;;  %v3999_v22 = vld [vmem:[%s6303_s1 + $0x30] sm:$0xff]   ;;  %v106_v23 = vpack.c.bf16 %v82_v18, %v81_v17  ;;  %v83_v27 = vld [vmem:[%s6304_s0 + $0x21] sm:$0xff]  ;;  %v98_v30 = vld [vmem:[%s6304_s0 + $0x99] sm:$0xff] }
   0x9   :  { %v84_v28 = vld [vmem:[%s6304_s0 + $0x29] sm:$0xff]  ;;  %v97_v29 = vld [vmem:[%s6304_s0 + $0x91] sm:$0xff]  ;;  %v4002_v31 = vld [vmem:[%s6303_s1 + $0xa0] sm:$0xff]  }
   0xa   :  { %v4003_v32 = vld [vmem:[%s6303_s1 + $0x20] sm:$0xff]   ;;  %v107_v33 = vpack.c.bf16 %v84_v28, %v83_v27  ;;  %v114_v34 = vpack.c.bf16 %v98_v30, %v97_v29  ;;  %v4004_v35 = vld [vmem:[%s6303_s1 + $0x98] sm:$0xff]   ;;  %v100_v40 = vld [vmem:[%s6304_s0 + $0xa9] sm:$0xff] }
   0xb   :  { %3360 = vmatpush3.bf16.msra.mxu0 %v3990_v3  ;;  %3977 = vmatpush3.bf16.msra.mxu1 %v3990_v3  ;;  %v4005_v36 = vld [vmem:[%s6303_s1 + $0x18] sm:$0xff]   ;;  %v99_v39 = vld [vmem:[%s6304_s0 + $0xa1] sm:$0xff]  ;;  %v4006_v41 = vld [vmem:[%s6303_s1 + $0x90] sm:$0xff]  }
   0xc   :  { %3361 = vmatprep.subr.bf16.mxu0 %v4062_v0  ;;  %3970 = vmatprep.subr.bf16.mxu1 %v4062_v0  ;;  %v85_v37 = vld [vmem:[%s6304_s0 + $0x31] sm:$0xff]  ;;  %v86_v38 = vld [vmem:[%s6304_s0 + $0x39] sm:$0xff]  ;;  %v115_v44 = vpack.c.bf16 %v100_v40, %v99_v39  ;;  %v4008_v45 = vld [vmem:[%s6303_s1 + $0x8] sm:$0xff]  }
   0xd   :  { %v4007_v42 = vld [vmem:[%s6303_s1 + $0x10] sm:$0xff]   ;;  %v108_v43 = vpack.c.bf16 %v86_v38, %v85_v37  ;;  %v4009_v48 = vld [vmem:[%s6303_s1 + $0x88] sm:$0xff]   ;;  %v102_v53 = vld [vmem:[%s6304_s0 + $0xb9] sm:$0xff] }
   0xe   :  { %v4258_v46 = vld [vmem:[%s6304_s0 + $0xa] sm:$0xff]  ;;  %v4263_v47 = vld [vmem:[%s6304_s0 + $0x12] sm:$0xff]  ;;  %v87_v50 = vld [vmem:[%s6304_s0 + $0x41] sm:$0xff] }
   0xf   :  { %3362 = vmatpush3.bf16.msra.mxu0 %v3991_v4  ;;  %3978 = vmatpush3.bf16.msra.mxu1 %v3991_v4  ;;  %v798_v49 = vpack.c.bf16 %v4263_v47, %v4258_v46  ;;  %v88_v51 = vld [vmem:[%s6304_s0 + $0x49] sm:$0xff]  ;;  %v101_v52 = vld [vmem:[%s6304_s0 + $0xb1] sm:$0xff]  ;;  %v4010_v54 = vld [vmem:[%s6303_s1] sm:$0xff]  }
  0x10   :  { %3363 = vmatprep.subr.bf16.mxu0 %v4062_v0  ;;  %3971 = vmatprep.subr.bf16.mxu1 %v4062_v0  ;;  %v4294_v55 = vld [vmem:[%s6304_s0 + $0x1a] sm:$0xff]  ;;  %v4299_v56 = vld [vmem:[%s6304_s0 + $0x22] sm:$0xff]  ;;  %v109_v59 = vpack.c.bf16 %v88_v51, %v87_v50  ;;  %v116_v60 = vpack.c.bf16 %v102_v53, %v101_v52  ;;  %v89_v61 = vld [vmem:[%s6304_s0 + $0x51] sm:$0xff] }
  0x11   :  { %v4011_v57 = vld [vmem:[%s6303_s1 + $0x80] sm:$0xff]   ;;  %v799_v58 = vpack.c.bf16 %v4299_v56, %v4294_v55  ;;  %v104_v1 = vld [vmem:[%s6304_s0 + $0xc9] sm:$0xff]  ;;  %v4334_v3 = vld [vmem:[%s6304_s0 + $0x32] sm:$0xff] }
  0x12   :  { %v90_v62 = vld [vmem:[%s6304_s0 + $0x59] sm:$0xff]  ;;  %v103_v63 = vld [vmem:[%s6304_s0 + $0xc1] sm:$0xff]  ;;  %v4325_v2 = vld [vmem:[%s6304_s0 + $0x2a] sm:$0xff] }
  0x13   :  { %3364 = vmatpush3.bf16.msra.mxu0 %v3992_v5  ;;  %3979 = vmatpush3.bf16.msra.mxu1 %v3992_v5  ;;  %v800_v4 = vpack.c.bf16 %v4334_v3, %v4325_v2  ;;  %v110_v5 = vpack.c.bf16 %v90_v62, %v89_v61  ;;  %v24_v9 = vld [vmem:[%s6304_s0] sm:$0xff]  ;;  %v25_v10 = vld [vmem:[%s6304_s0 + $0x8] sm:$0xff]  ;;  %v4377_v18 = vld [vmem:[%s6304_s0 + $0x52] sm:$0xff] }
  0x14   :  { %3365 = vmatprep.subr.bf16.mxu0 %v4062_v0  ;;  %3972 = vmatprep.subr.bf16.mxu1 %v4062_v0  ;;  %v4353_v11 = vld [vmem:[%s6304_s0 + $0x3a] sm:$0xff]  ;;  %v4358_v12 = vld [vmem:[%s6304_s0 + $0x42] sm:$0xff]  ;;  %v4372_v17 = vld [vmem:[%s6304_s0 + $0x4a] sm:$0xff] }
  0x15   :  { %v26_v19 = vld [vmem:[%s6304_s0 + $0x10] sm:$0xff]  ;;  %v27_v20 = vld [vmem:[%s6304_s0 + $0x18] sm:$0xff]  ;;  %v4016_v27 = vld [vmem:[%s6303_s1 + $0xe8] sm:$0xff]   ;;  %v534_v61 = vpack.c.bf16 %v4353_v11, %v4334_v3 }
  0x16   :  { %v28_v28 = vld [vmem:[%s6304_s0 + $0x20] sm:$0xff]  ;;  %v29_v29 = vld [vmem:[%s6304_s0 + $0x28] sm:$0xff]  ;;  %v4015_v30 = vld [vmem:[%s6303_s1 + $0x130] sm:$0xff]  }
  0x17   :  { %3366 = vmatpush3.bf16.msra.mxu0 %v3993_v6  ;;  %3980 = vmatpush3.bf16.msra.mxu1 %v3993_v6  ;;  %v117_v6 = vpack.c.bf16 %v104_v1, %v103_v63  ;;  %v4020_v38 = vld [vmem:[%s6303_s1 + $0xd8] sm:$0xff]   ;;  %v30_v39 = vld [vmem:[%s6304_s0 + $0x30] sm:$0xff]  ;;  %v4024_v52 = vld [vmem:[%s6303_s1 + $0xc8] sm:$0xff]  }
  0x18   :  { %3367 = vmatprep.subr.bf16.mxu0 %v4062_v0  ;;  %3973 = vmatprep.subr.bf16.mxu1 %v4062_v0  ;;  %v31_v40 = vld [vmem:[%s6304_s0 + $0x38] sm:$0xff]  ;;  %v32_v53 = vld [vmem:[%s6304_s0 + $0x40] sm:$0xff]  ;;  %v4025_v1 = vld [vmem:[%s6303_s1 + $0x108] sm:$0xff]  }
  0x19   :  { %v4021_v50 = vld [vmem:[%s6303_s1 + $0x118] sm:$0xff]   ;;  %v4514_v63 = vld [vmem:[%s6304_s0 + $0x82] sm:$0xff]  ;;  %v4038_v3 = vld [vmem:[%s6303_s1 + $0x150] sm:$0xff]  }
  0x1a   :  { %v4509_v62 = vld [vmem:[%s6304_s0 + $0x7a] sm:$0xff] }
  0x1b   :  { %3368 = vmatpush3.bf16.msra.mxu0 %v3994_v7  ;;  %3981 = vmatpush3.bf16.msra.mxu1 %v3994_v7  ;;  %v91_v7 = vld [vmem:[%s6304_s0 + $0x61] sm:$0xff] }
  0x1c   :  { %3369 = vmatprep.subr.bf16.mxu0 %v4062_v0  ;;  %3974 = vmatprep.subr.bf16.mxu1 %v4062_v0 }
  0x1f   :  { %3370 = vmatpush3.bf16.msra.mxu0 %v3995_v8  ;;  %3982 = vmatpush3.bf16.msra.mxu1 %v3995_v8  ;;  %v92_v8 = vld [vmem:[%s6304_s0 + $0x69] sm:$0xff] }
  0x20   :  { %3491 = vmatprep.subr.bf16.mxu0 %v4062_v0  ;;  %3423 = vmatprep.subr.bf16.mxu1 %v4062_v0 }
  0x22   :  { %3372 = vmatmul.mubr.bf16.vlgmr.msra.gmra.mxu0 %v105_v13  ;;  %3400 = vmatmul.mubr.bf16.vlgmr.msra.gmra.mxu1 %v112_v14  ;;  %v801_v13 = vpack.c.bf16 %v4358_v12, %v4353_v11  ;;  %v111_v14 = vpack.c.bf16 %v92_v8, %v91_v7  ;;  %v35_v7 = vld [vmem:[%s6304_s0 + $0x58] sm:$0xff]  ;;  %v4027_v8 = vld [vmem:[%s6303_s1 + $0x100] sm:$0xff]   ;;  %v4039_v11 = vld [vmem:[%s6303_s1 + $0x190] sm:$0xff]  }
  0x23   :  { %3492 = vmatpush3.bf16.msra.mxu0 %v3996_v15  ;;  %3375 = vmatprep.mubr.msk.bf16.mxu0 %vm4063_vm0, %v4062_v0  ;;  %v50_v15 = vpack.c.bf16 %v25_v10, %v24_v9  ;;  %v535_v10 = vpack.c.bf16 %v4372_v17, %v4358_v12  ;;  %v4042_v12 = vld [vmem:[%s6303_s1 + $0x140] sm:$0xff]  }
  0x24   :  { %3403 = vmatprep.mubr.msk.bf16.mxu1 %vm4063_vm0, %v4062_v0  ;;  %3424 = vmatpush3.bf16.msra.mxu1 %v3997_v16  ;;  %v4012_v16 = vld [vmem:[%s6303_s1 + $0xf8] sm:$0xff]  }
  0x25   :  { %3493 = vmatprep.subr.bf16.mxu0 %v4062_v0  ;;  %3425 = vmatprep.subr.bf16.mxu1 %v4062_v0 }
  0x27   :  { %3494 = vmatpush3.bf16.msra.mxu0 %v3998_v21  ;;  %v505_v21 = vld [vmem:[%s6304_s0 + $0x2] sm:$0xff] }
  0x28   :  { %3426 = vmatpush3.bf16.msra.mxu1 %v3999_v22  ;;  %3495 = vmatprep.subr.bf16.mxu0 %v4062_v0  ;;  %v4014_v22 = vld [vmem:[%s6303_s1 + $0xf0] sm:$0xff]  }
  0x29   :  { %3427 = vmatprep.subr.bf16.mxu1 %v4062_v0 }
  0x2a   :  { %3376 = vmatmul.mubr.bf16.gmra.mxu0 %v106_v23  ;;  %3404 = vmatmul.mubr.bf16.gmra.mxu1 %v113_v24  ;;  %v802_v23 = vpack.c.bf16 %v4377_v18, %v4372_v17  ;;  %v51_v24 = vpack.c.bf16 %v27_v20, %v26_v19  ;;  %v36_v19 = vld [vmem:[%s6304_s0 + $0x60] sm:$0xff]  ;;  %v37_v20 = vld [vmem:[%s6304_s0 + $0x68] sm:$0xff] }
  0x2b   :  { %3379 = vmatprep.mubr.msk.bf16.mxu0 %vm4063_vm0, %v4062_v0  ;;  %3407 = vmatprep.mubr.msk.bf16.mxu1 %vm4063_vm0, %v4062_v0  ;;  %v4043_v17 = vld [vmem:[%s6303_s1 + $0x180] sm:$0xff]  }
  0x2c   :  { %3496 = vmatpush3.bf16.msra.mxu0 %v4000_v25  ;;  %3428 = vmatpush3.bf16.msra.mxu1 %v4001_v26  ;;  %v531_v25 = vpack.c.bf16 %v4258_v46, %v505_v21  ;;  %v4013_v26 = vld [vmem:[%s6303_s1 + $0x138] sm:$0xff]   ;;  %v56_v21 = vpack.c.bf16 %v37_v20, %v36_v19  ;;  %v1039_v20 = vld [vmem:[%s6304_s0 + $0xb] sm:$0xff] }
  0x2d   :  { %3497 = vmatprep.subr.bf16.mxu0 %v4062_v0  ;;  %3429 = vmatprep.subr.bf16.mxu1 %v4062_v0  ;;  %v4028_v19 = vld [vmem:[%s6303_s1 + $0x178] sm:$0xff]   ;;  %v4030_v46 = vld [vmem:[%s6303_s1 + $0x170] sm:$0xff]  }
  0x30   :  { %3498 = vmatpush3.bf16.msra.mxu0 %v4002_v31  ;;  %3430 = vmatpush3.bf16.msra.mxu1 %v4003_v32  ;;  %v4018_v31 = vld [vmem:[%s6303_s1 + $0xe0] sm:$0xff]   ;;  %v52_v32 = vpack.c.bf16 %v29_v29, %v28_v28  ;;  %v41_v29 = vld [vmem:[%s6304_s0 + $0x88] sm:$0xff] }
  0x31   :  { %3499 = vmatprep.subr.bf16.mxu0 %v4062_v0  ;;  %3431 = vmatprep.subr.bf16.mxu1 %v4062_v0  ;;  %v40_v28 = vld [vmem:[%s6304_s0 + $0x80] sm:$0xff] }
  0x32   :  { %3380 = vmatmul.mubr.bf16.gmra.mxu0 %v107_v33  ;;  %3408 = vmatmul.mubr.bf16.gmra.mxu1 %v114_v34  ;;  %v532_v33 = vpack.c.bf16 %v4294_v55, %v4263_v47  ;;  %v4429_v34 = vld [vmem:[%s6304_s0 + $0x5a] sm:$0xff] }
  0x33   :  { %3383 = vmatprep.mubr.msk.bf16.mxu0 %vm4063_vm0, %v4062_v0  ;;  %3411 = vmatprep.mubr.msk.bf16.mxu1 %vm4063_vm0, %v4062_v0  ;;  %v4034_v55 = vld [vmem:[%s6303_s1 + $0x160] sm:$0xff]  }
  0x34   :  { %3500 = vmatpush3.bf16.msra.mxu0 %v4004_v35  ;;  %3432 = vmatpush3.bf16.msra.mxu1 %v4005_v36  ;;  %v4434_v35 = vld [vmem:[%s6304_s0 + $0x62] sm:$0xff] }
  0x35   :  { %3501 = vmatprep.subr.bf16.mxu0 %v4062_v0  ;;  %3433 = vmatprep.subr.bf16.mxu1 %v4062_v0  ;;  %v4017_v36 = vld [vmem:[%s6303_s1 + $0x128] sm:$0xff]   ;;  %v803_v37 = vpack.c.bf16 %v4434_v35, %v4429_v34 }
  0x38   :  { %3502 = vmatpush3.bf16.msra.mxu0 %v4006_v41  ;;  %3434 = vmatpush3.bf16.msra.mxu1 %v4007_v42  ;;  %v4019_v41 = vld [vmem:[%s6303_s1 + $0x120] sm:$0xff]   ;;  %v4022_v42 = vld [vmem:[%s6303_s1 + $0xd0] sm:$0xff]  }
  0x39   :  { %3435 = vmatprep.subr.bf16.mxu1 %v4062_v0  ;;  %3503 = vmatprep.subr.bf16.mxu0 %v4062_v0 }
  0x3a   :  { %3384 = vmatmul.mubr.bf16.gmra.mxu0 %v108_v43  ;;  %3412 = vmatmul.mubr.bf16.gmra.mxu1 %v115_v44  ;;  %v53_v43 = vpack.c.bf16 %v31_v40, %v30_v39  ;;  %v533_v44 = vpack.c.bf16 %v4325_v2, %v4299_v56  ;;  %v44_v39 = vld [vmem:[%s6304_s0 + $0xa0] sm:$0xff]  ;;  %v45_v40 = vld [vmem:[%s6304_s0 + $0xa8] sm:$0xff] }
  0x3b   :  { %3387 = vmatprep.mubr.msk.bf16.mxu0 %vm4063_vm0, %v4062_v0  ;;  %3415 = vmatprep.mubr.msk.bf16.mxu1 %vm4063_vm0, %v4062_v0  ;;  %v4035_v2 = vld [vmem:[%s6303_s1 + $0x1a0] sm:$0xff]  }
  0x3c   :  { %3436 = vmatpush3.bf16.msra.mxu1 %v4008_v45  ;;  %3504 = vmatpush3.bf16.msra.mxu0 %v4009_v48  ;;  %v4469_v45 = vld [vmem:[%s6304_s0 + $0x6a] sm:$0xff]  ;;  %v4474_v48 = vld [vmem:[%s6304_s0 + $0x72] sm:$0xff] }
  0x3d   :  { %3437 = vmatprep.subr.bf16.mxu1 %v4062_v0  ;;  %3505 = vmatprep.subr.bf16.mxu0 %v4062_v0  ;;  %v804_v51 = vpack.c.bf16 %v4474_v48, %v4469_v45 }
  0x40   :  { %3438 = vmatpush3.bf16.msra.mxu1 %v4010_v54  ;;  %3506 = vmatpush3.bf16.msra.mxu0 %v4011_v57  ;;  %v33_v54 = vld [vmem:[%s6304_s0 + $0x48] sm:$0xff]  ;;  %v4023_v57 = vld [vmem:[%s6303_s1 + $0x110] sm:$0xff]  }
  0x41   :  { %3559 = vmatprep.subr.bf16.mxu1 %v4062_v0  ;;  %3627 = vmatprep.subr.bf16.mxu0 %v4062_v0 }
  0x42   :  { %3388 = vmatmul.mubr.bf16.gmra.mxu0 %v109_v59  ;;  %3416 = vmatmul.mubr.bf16.gmra.mxu1 %v116_v60  ;;  %v4026_v59 = vld [vmem:[%s6303_s1 + $0xc0] sm:$0xff]   ;;  %v54_v60 = vpack.c.bf16 %v33_v54, %v32_v53  ;;  %v4635_v53 = vld [vmem:[%s6304_s0 + $0xaa] sm:$0xff] }
  0x43   :  { %3391 = vmatprep.mubr.msk.bf16.mxu0 %vm4063_vm0, %v4062_v0  ;;  %3419 = vmatprep.mubr.msk.bf16.mxu1 %vm4063_vm0, %v4062_v0 }
  0x4a   :  { %3392 = vmatmul.mubr.bf16.gmra.mxu0 %v110_v5  ;;  %3420 = vmatmul.mubr.bf16.gmra.mxu1 %v117_v6  ;;  %v805_v5 = vpack.c.bf16 %v4514_v63, %v4509_v62  ;;  %v34_v6 = vld [vmem:[%s6304_s0 + $0x50] sm:$0xff] }
  0x4b   :  { %3395 = vmatprep.mubr.msk.bf16.mxu0 %vm4063_vm0, %v4062_v0  ;;  %3439 = vmatprep.mubr.msk.bf16.mxu1 %vm4063_vm0, %v4062_v0  ;;  %v55_v9 = vpack.c.bf16 %v35_v7, %v34_v6 }
  0x52   :  { %3396 = vmatmul.mubr.bf16.gmra.mxu0 %v111_v14  ;;  %3440 = vmatmul.mubr.bf16.vlgmr.msra.gmra.mxu1 %v50_v15  ;;  %v4542_v14 = vld [vmem:[%s6304_s0 + $0x8a] sm:$0xff]  ;;  %v4547_v15 = vld [vmem:[%s6304_s0 + $0x92] sm:$0xff] }
  0x53   :  { %3443 = vmatprep.mubr.msk.bf16.mxu1 %vm4063_vm0, %v4062_v0  ;;  %3507 = vmatprep.mubr.msk.bf16.mxu0 %vm4063_vm0, %v4062_v0 }
  0x54   :  { %3560 = vmatpush3.bf16.msra.mxu1 %v4012_v16  ;;  %v806_v16 = vpack.c.bf16 %v4547_v15, %v4542_v14 }
  0x55   :  { %3561 = vmatprep.subr.bf16.mxu1 %v4062_v0 }
  0x58   :  { %3562 = vmatpush3.bf16.msra.mxu1 %v4014_v22  ;;  %v536_v22 = vpack.c.bf16 %v4429_v34, %v4377_v18 }
  0x59   :  { %3563 = vmatprep.subr.bf16.mxu1 %v4062_v0 }
  0x5a   :  { %3444 = vmatmul.mubr.bf16.gmra.mxu1 %v51_v24  ;;  %3508 = vmatmul.mubr.bf16.vlgmr.msra.gmra.mxu0 %v531_v25  ;;  %v38_v24 = vld [vmem:[%s6304_s0 + $0x70] sm:$0xff]  ;;  %v39_v25 = vld [vmem:[%s6304_s0 + $0x78] sm:$0xff] }
  0x5b   :  { %3628 = vmatpush3.bf16.msra.mxu0 %v4013_v26  ;;  %3447 = vmatprep.mubr.msk.bf16.mxu1 %vm4063_vm0, %v4062_v0  ;;  %v57_v26 = vpack.c.bf16 %v39_v25, %v38_v24  ;;  %v1041_v24 = vld [vmem:[%s6304_s0 + $0x1b] sm:$0xff]  ;;  %v1042_v25 = vld [vmem:[%s6304_s0 + $0x23] sm:$0xff] }
  0x5c   :  { %3511 = vmatprep.mubr.msk.bf16.mxu0 %vm4063_vm0, %v4062_v0  ;;  %3629 = vmatprep.subr.bf16.mxu0 %v4062_v0  ;;  %v1066_v56 = vpack.c.bf16 %v1042_v25, %v1041_v24 }
  0x5d   :  { %3564 = vmatpush3.bf16.msra.mxu1 %v4016_v27  ;;  %v537_v27 = vpack.c.bf16 %v4469_v45, %v4434_v35 }
  0x5e   :  { %3565 = vmatprep.subr.bf16.mxu1 %v4062_v0 }
  0x5f   :  { %3630 = vmatpush3.bf16.msra.mxu0 %v4015_v30  ;;  %v58_v30 = vpack.c.bf16 %v41_v29, %v40_v28  ;;  %v1043_v28 = vld [vmem:[%s6304_s0 + $0x2b] sm:$0xff]  ;;  %v1044_v29 = vld [vmem:[%s6304_s0 + $0x33] sm:$0xff] }
  0x60   :  { %3631 = vmatprep.subr.bf16.mxu0 %v4062_v0 }
  0x61   :  { %3566 = vmatpush3.bf16.msra.mxu1 %v4018_v31  ;;  %v538_v31 = vpack.c.bf16 %v4509_v62, %v4474_v48 }
  0x62   :  { %3448 = vmatmul.mubr.bf16.gmra.mxu1 %v52_v32  ;;  %3512 = vmatmul.mubr.bf16.gmra.mxu0 %v532_v33  ;;  %v42_v32 = vld [vmem:[%s6304_s0 + $0x90] sm:$0xff]  ;;  %v43_v33 = vld [vmem:[%s6304_s0 + $0x98] sm:$0xff] }
  0x63   :  { %3451 = vmatprep.mubr.msk.bf16.mxu1 %vm4063_vm0, %v4062_v0  ;;  %3515 = vmatprep.mubr.msk.bf16.mxu0 %vm4063_vm0, %v4062_v0 }
  0x64   :  { %3632 = vmatpush3.bf16.msra.mxu0 %v4017_v36  ;;  %3567 = vmatprep.subr.bf16.mxu1 %v4062_v0  ;;  %v59_v36 = vpack.c.bf16 %v43_v33, %v42_v32  ;;  %v1045_v32 = vld [vmem:[%s6304_s0 + $0x3b] sm:$0xff]  ;;  %v1046_v33 = vld [vmem:[%s6304_s0 + $0x43] sm:$0xff] }
  0x65   :  { %3633 = vmatprep.subr.bf16.mxu0 %v4062_v0  ;;  %3568 = vmatpush3.bf16.msra.mxu1 %v4020_v38  ;;  %v539_v38 = vpack.c.bf16 %v4542_v14, %v4514_v63 }
  0x66   :  { %3569 = vmatprep.subr.bf16.mxu1 %v4062_v0 }
  0x68   :  { %3634 = vmatpush3.bf16.msra.mxu0 %v4019_v41  ;;  %v4613_v41 = vld [vmem:[%s6304_s0 + $0x9a] sm:$0xff] }
  0x69   :  { %3635 = vmatprep.subr.bf16.mxu0 %v4062_v0  ;;  %3570 = vmatpush3.bf16.msra.mxu1 %v4022_v42  ;;  %v60_v42 = vpack.c.bf16 %v45_v40, %v44_v39  ;;  %v1048_v39 = vld [vmem:[%s6304_s0 + $0x53] sm:$0xff] }
  0x6a   :  { %3452 = vmatmul.mubr.bf16.gmra.mxu1 %v53_v43  ;;  %3516 = vmatmul.mubr.bf16.gmra.mxu0 %v533_v44  ;;  %v540_v43 = vpack.c.bf16 %v4613_v41, %v4547_v15  ;;  %v46_v44 = vld [vmem:[%s6304_s0 + $0xb0] sm:$0xff] }
  0x6b   :  { %3455 = vmatprep.mubr.msk.bf16.mxu1 %vm4063_vm0, %v4062_v0  ;;  %3519 = vmatprep.mubr.msk.bf16.mxu0 %vm4063_vm0, %v4062_v0 }
  0x6c   :  { %3636 = vmatpush3.bf16.msra.mxu0 %v4021_v50  ;;  %3571 = vmatprep.subr.bf16.mxu1 %v4062_v0  ;;  %v47_v50 = vld [vmem:[%s6304_s0 + $0xb8] sm:$0xff] }
  0x6d   :  { %3637 = vmatprep.subr.bf16.mxu0 %v4062_v0  ;;  %3572 = vmatpush3.bf16.msra.mxu1 %v4024_v52  ;;  %v4630_v52 = vld [vmem:[%s6304_s0 + $0xa2] sm:$0xff]  ;;  %v61_v54 = vpack.c.bf16 %v47_v50, %v46_v44 }
  0x6e   :  { %3573 = vmatprep.subr.bf16.mxu1 %v4062_v0  ;;  %v807_v15 = vpack.c.bf16 %v4630_v52, %v4613_v41  ;;  %v1058_v41 = vld [vmem:[%s6304_s0 + $0xa3] sm:$0xff] }
  0x70   :  { %3638 = vmatpush3.bf16.msra.mxu0 %v4023_v57  ;;  %v541_v57 = vpack.c.bf16 %v4635_v53, %v4630_v52 }
  0x71   :  { %3639 = vmatprep.subr.bf16.mxu0 %v4062_v0  ;;  %3574 = vmatpush3.bf16.msra.mxu1 %v4026_v59  ;;  %v48_v59 = vld [vmem:[%s6304_s0 + $0xc0] sm:$0xff] }
  0x72   :  { %3456 = vmatmul.mubr.bf16.gmra.mxu1 %v54_v60  ;;  %3520 = vmatmul.mubr.bf16.gmra.mxu0 %v534_v61  ;;  %v49_v60 = vld [vmem:[%s6304_s0 + $0xc8] sm:$0xff]  ;;  %v4652_v61 = vld [vmem:[%s6304_s0 + $0xb2] sm:$0xff] }
  0x73   :  { %3459 = vmatprep.mubr.msk.bf16.mxu1 %vm4063_vm0, %v4062_v0  ;;  %3523 = vmatprep.mubr.msk.bf16.mxu0 %vm4063_vm0, %v4062_v0  ;;  %v62_v6 = vpack.c.bf16 %v49_v60, %v48_v59 }
  0x74   :  { %3640 = vmatpush3.bf16.msra.mxu0 %v4025_v1  ;;  %3695 = vmatprep.subr.bf16.mxu1 %v4062_v0  ;;  %v4657_v1 = vld [vmem:[%s6304_s0 + $0xba] sm:$0xff] }
  0x75   :  { %3641 = vmatprep.subr.bf16.mxu0 %v4062_v0  ;;  %v542_v7 = vpack.c.bf16 %v4657_v1, %v4652_v61 }
  0x78   :  { %3642 = vmatpush3.bf16.msra.mxu0 %v4027_v8  ;;  %v4668_v8 = vld [vmem:[%s6304_s0 + $0xc2] sm:$0xff] }
  0x79   :  { %3763 = vmatprep.subr.bf16.mxu0 %v4062_v0 }
  0x7a   :  { %3460 = vmatmul.mubr.bf16.gmra.mxu1 %v55_v9  ;;  %3524 = vmatmul.mubr.bf16.gmra.mxu0 %v535_v10  ;;  %v4673_v9 = vld [vmem:[%s6304_s0 + $0xca] sm:$0xff] }
  0x7b   :  { %3463 = vmatprep.mubr.msk.bf16.mxu1 %vm4063_vm0, %v4062_v0  ;;  %3527 = vmatprep.mubr.msk.bf16.mxu0 %vm4063_vm0, %v4062_v0  ;;  %v543_v10 = vpack.c.bf16 %v4673_v9, %v4668_v8 }
  0x82   :  { %3464 = vmatmul.mubr.bf16.gmra.mxu1 %v56_v21  ;;  %3528 = vmatmul.mubr.bf16.gmra.mxu0 %v536_v22  ;;  %v1040_v21 = vld [vmem:[%s6304_s0 + $0x13] sm:$0xff]  ;;  %v4032_v22 = vld [vmem:[%s6303_s1 + $0x168] sm:$0xff]  }
  0x83   :  { %3467 = vmatprep.mubr.msk.bf16.mxu1 %vm4063_vm0, %v4062_v0  ;;  %3531 = vmatprep.mubr.msk.bf16.mxu0 %vm4063_vm0, %v4062_v0  ;;  %v1065_v47 = vpack.c.bf16 %v1040_v21, %v1039_v20 }
  0x8a   :  { %3468 = vmatmul.mubr.bf16.gmra.mxu1 %v57_v26  ;;  %3532 = vmatmul.mubr.bf16.gmra.mxu0 %v537_v27  ;;  %v4031_v26 = vld [vmem:[%s6303_s1 + $0x1b0] sm:$0xff]   ;;  %v4036_v27 = vld [vmem:[%s6303_s1 + $0x158] sm:$0xff]  }
  0x8b   :  { %3471 = vmatprep.mubr.msk.bf16.mxu1 %vm4063_vm0, %v4062_v0  ;;  %3535 = vmatprep.mubr.msk.bf16.mxu0 %vm4063_vm0, %v4062_v0 }
  0x92   :  { %3472 = vmatmul.mubr.bf16.gmra.mxu1 %v58_v30  ;;  %3536 = vmatmul.mubr.bf16.gmra.mxu0 %v538_v31  ;;  %v4037_v30 = vld [vmem:[%s6303_s1 + $0x198] sm:$0xff]   ;;  %v4040_v31 = vld [vmem:[%s6303_s1 + $0x148] sm:$0xff]  }
  0x93   :  { %3475 = vmatprep.mubr.msk.bf16.mxu1 %vm4063_vm0, %v4062_v0  ;;  %3539 = vmatprep.mubr.msk.bf16.mxu0 %vm4063_vm0, %v4062_v0 }
  0x9a   :  { %3476 = vmatmul.mubr.bf16.gmra.mxu1 %v59_v36  ;;  %3540 = vmatmul.mubr.bf16.gmra.mxu0 %v539_v38  ;;  %v4041_v36 = vld [vmem:[%s6303_s1 + $0x188] sm:$0xff]  }
  0x9b   :  { %3479 = vmatprep.mubr.msk.bf16.mxu1 %vm4063_vm0, %v4062_v0  ;;  %3543 = vmatprep.mubr.msk.bf16.mxu0 %vm4063_vm0, %v4062_v0  ;;  %v1047_v38 = vld [vmem:[%s6304_s0 + $0x4b] sm:$0xff] }
  0x9c   :  { %v1069_v18 = vpack.c.bf16 %v1048_v39, %v1047_v38 }
  0xa2   :  { %3480 = vmatmul.mubr.bf16.gmra.mxu1 %v60_v42  ;;  %3544 = vmatmul.mubr.bf16.gmra.mxu0 %v540_v43  ;;  %v1049_v42 = vld [vmem:[%s6304_s0 + $0x5b] sm:$0xff]  ;;  %v1050_v43 = vld [vmem:[%s6304_s0 + $0x63] sm:$0xff] }
  0xa3   :  { %3483 = vmatprep.mubr.msk.bf16.mxu1 %vm4063_vm0, %v4062_v0  ;;  %3547 = vmatprep.mubr.msk.bf16.mxu0 %vm4063_vm0, %v4062_v0  ;;  %v1070_v35 = vpack.c.bf16 %v1050_v43, %v1049_v42  ;;  %v1059_v43 = vld [vmem:[%s6304_s0 + $0xab] sm:$0xff] }
  0xaa   :  { %3484 = vmatmul.mubr.bf16.gmra.mxu1 %v61_v54  ;;  %3548 = vmatmul.mubr.bf16.gmra.mxu0 %v541_v57 }
  0xab   :  { %3487 = vmatprep.mubr.msk.bf16.mxu1 %vm4063_vm0, %v4062_v0  ;;  %3551 = vmatprep.mubr.msk.bf16.mxu0 %vm4063_vm0, %v4062_v0 }
  0xb2   :  { %3488 = vmatmul.mubr.bf16.gmra.mxu1 %v62_v6  ;;  %3552 = vmatmul.mubr.bf16.gmra.mxu0 %v542_v7  ;;  %v1051_v6 = vld [vmem:[%s6304_s0 + $0x6b] sm:$0xff]  ;;  %v1052_v7 = vld [vmem:[%s6304_s0 + $0x73] sm:$0xff] }
  0xb3   :  { %3555 = vmatprep.mubr.msk.bf16.mxu0 %vm4063_vm0, %v4062_v0  ;;  %3575 = vmatprep.mubr.msk.bf16.mxu1 %vm4063_vm0, %v4062_v0  ;;  %v1071_v48 = vpack.c.bf16 %v1052_v7, %v1051_v6 }
  0xba   :  { %3556 = vmatmul.mubr.bf16.gmra.mxu0 %v543_v10  ;;  %3576 = vmatmul.mubr.bf16.vlgmr.msra.gmra.mxu1 %v798_v49  ;;  %v4029_v49 = vld [vmem:[%s6303_s1 + $0x1b8] sm:$0xff]  }
  0xbb   :  { %3579 = vmatprep.mubr.msk.bf16.mxu1 %vm4063_vm0, %v4062_v0  ;;  %3643 = vmatprep.mubr.msk.bf16.mxu0 %vm4063_vm0, %v4062_v0 }
  0xbc   :  { %3696 = vmatpush3.bf16.msra.mxu1 %v4028_v19 }
  0xbd   :  { %3697 = vmatprep.subr.bf16.mxu1 %v4062_v0 }
  0xc0   :  { %3698 = vmatpush3.bf16.msra.mxu1 %v4030_v46 }
  0xc1   :  { %3699 = vmatprep.subr.bf16.mxu1 %v4062_v0 }
  0xc2   :  { %3580 = vmatmul.mubr.bf16.gmra.mxu1 %v799_v58  ;;  %3644 = vmatmul.mubr.bf16.vlgmr.msra.gmra.mxu0 %v1065_v47  ;;  %v4033_v58 = vld [vmem:[%s6303_s1 + $0x1a8] sm:$0xff]  }
  0xc3   :  { %3764 = vmatpush3.bf16.msra.mxu0 %v4029_v49  ;;  %3583 = vmatprep.mubr.msk.bf16.mxu1 %vm4063_vm0, %v4062_v0  ;;  %v1053_v49 = vld [vmem:[%s6304_s0 + $0x7b] sm:$0xff] }
  0xc4   :  { %3647 = vmatprep.mubr.msk.bf16.mxu0 %vm4063_vm0, %v4062_v0  ;;  %3765 = vmatprep.subr.bf16.mxu0 %v4062_v0 }
  0xc5   :  { %3700 = vmatpush3.bf16.msra.mxu1 %v4032_v22  ;;  %v1054_v22 = vld [vmem:[%s6304_s0 + $0x83] sm:$0xff] }
  0xc6   :  { %3701 = vmatprep.subr.bf16.mxu1 %v4062_v0  ;;  %v1072_v63 = vpack.c.bf16 %v1054_v22, %v1053_v49 }
  0xc7   :  { %3766 = vmatpush3.bf16.msra.mxu0 %v4031_v26 }
  0xc8   :  { %3767 = vmatprep.subr.bf16.mxu0 %v4062_v0 }
  0xc9   :  { %3702 = vmatpush3.bf16.msra.mxu1 %v4034_v55 }
  0xca   :  { %3584 = vmatmul.mubr.bf16.gmra.mxu1 %v800_v4  ;;  %3648 = vmatmul.mubr.bf16.gmra.mxu0 %v1066_v56  ;;  %v1067_v4 = vpack.c.bf16 %v1044_v29, %v1043_v28  ;;  %v1056_v28 = vld [vmem:[%s6304_s0 + $0x93] sm:$0xff] }
  0xcb   :  { %3587 = vmatprep.mubr.msk.bf16.mxu1 %vm4063_vm0, %v4062_v0  ;;  %3651 = vmatprep.mubr.msk.bf16.mxu0 %vm4063_vm0, %v4062_v0 }
  0xcc   :  { %3768 = vmatpush3.bf16.msra.mxu0 %v4033_v58  ;;  %3703 = vmatprep.subr.bf16.mxu1 %v4062_v0 }
  0xcd   :  { %3769 = vmatprep.subr.bf16.mxu0 %v4062_v0  ;;  %3704 = vmatpush3.bf16.msra.mxu1 %v4036_v27  ;;  %v1055_v27 = vld [vmem:[%s6304_s0 + $0x8b] sm:$0xff] }
  0xce   :  { %3705 = vmatprep.subr.bf16.mxu1 %v4062_v0 }
  0xd0   :  { %3770 = vmatpush3.bf16.msra.mxu0 %v4035_v2 }
  0xd1   :  { %3771 = vmatprep.subr.bf16.mxu0 %v4062_v0  ;;  %3706 = vmatpush3.bf16.msra.mxu1 %v4038_v3 }
  0xd2   :  { %3588 = vmatmul.mubr.bf16.gmra.mxu1 %v801_v13  ;;  %3652 = vmatmul.mubr.bf16.gmra.mxu0 %v1067_v4  ;;  %v1068_v13 = vpack.c.bf16 %v1046_v33, %v1045_v32  ;;  %v1057_v33 = vld [vmem:[%s6304_s0 + $0x9b] sm:$0xff] }
  0xd3   :  { %3591 = vmatprep.mubr.msk.bf16.mxu1 %vm4063_vm0, %v4062_v0  ;;  %3655 = vmatprep.mubr.msk.bf16.mxu0 %vm4063_vm0, %v4062_v0  ;;  %v1074_v38 = vpack.c.bf16 %v1058_v41, %v1057_v33 }
  0xd4   :  { %3772 = vmatpush3.bf16.msra.mxu0 %v4037_v30  ;;  %3707 = vmatprep.subr.bf16.mxu1 %v4062_v0 }
  0xd5   :  { %3773 = vmatprep.subr.bf16.mxu0 %v4062_v0  ;;  %3708 = vmatpush3.bf16.msra.mxu1 %v4040_v31 }
  0xd6   :  { %3709 = vmatprep.subr.bf16.mxu1 %v4062_v0 }
  0xd8   :  { %3774 = vmatpush3.bf16.msra.mxu0 %v4039_v11 }
  0xd9   :  { %3775 = vmatprep.subr.bf16.mxu0 %v4062_v0  ;;  %3710 = vmatpush3.bf16.msra.mxu1 %v4042_v12 }
  0xda   :  { %3592 = vmatmul.mubr.bf16.gmra.mxu1 %v802_v23  ;;  %3656 = vmatmul.mubr.bf16.gmra.mxu0 %v1068_v13 }
  0xdb   :  { %3595 = vmatprep.mubr.msk.bf16.mxu1 %vm4063_vm0, %v4062_v0  ;;  %3659 = vmatprep.mubr.msk.bf16.mxu0 %vm4063_vm0, %v4062_v0 }
  0xdc   :  { %3776 = vmatpush3.bf16.msra.mxu0 %v4041_v36  ;;  %3831 = vmatprep.subr.bf16.mxu1 %v4062_v0  ;;  %v808_v36 = vpack.c.bf16 %v4652_v61, %v4635_v53  ;;  %v1060_v53 = vld [vmem:[%s6304_s0 + $0xb3] sm:$0xff] }
  0xdd   :  { %3777 = vmatprep.subr.bf16.mxu0 %v4062_v0 }
  0xe0   :  { %3778 = vmatpush3.bf16.msra.mxu0 %v4043_v17 }
  0xe1   :  { %3899 = vmatprep.subr.bf16.mxu0 %v4062_v0 }
  0xe2   :  { %v4806_v23 = vpop.f32.mrf.mxu0  ;;  %v4808_v40 = vpop.f32.mrf.mxu1  ;;  %3596 = vmatmul.mubr.bf16.gmra.mxu1 %v803_v37  ;;  %3660 = vmatmul.mubr.bf16.gmra.mxu0 %v1069_v18 }
  0xe3   :  { %3599 = vmatprep.mubr.msk.bf16.mxu1 %vm4063_vm0, %v4062_v0  ;;  %3663 = vmatprep.mubr.msk.bf16.mxu0 %vm4063_vm0, %v4062_v0 }
  0xe4   :  { %v3373_v44 = vpop.f32.mrf.mxu0  ;;  %v3401_v50 = vpop.f32.mrf.mxu1 }
  0xe6   :  { %v4823_v54 = vpop.f32.mrf.mxu0  ;;  %v4825_v34 = vpop.f32.mrf.mxu1 }
  0xe8   :  { %v3374_v37 = vpop.f32.mrf.mxu0  ;;  %v3402_v57 = vpop.f32.mrf.mxu1 }
  0xe9   :  { %v809_v37 = vpack.c.bf16 %v4668_v8, %v4657_v1  ;;  %v1075_v57 = vpack.c.bf16 %v1060_v53, %v1059_v43  ;;  %v797_v1 = vld [vmem:[%s6304_s0 + $0xd2] sm:$0xff]  ;;  %v1061_v8 = vld [vmem:[%s6304_s0 + $0xbb] sm:$0xff] }
  0xea   :  { %v4827_v59 = vpop.f32.mrf.mxu0  ;;  %v4829_v60 = vpop.f32.mrf.mxu1  ;;  %3600 = vmatmul.mubr.bf16.gmra.mxu1 %v804_v51  ;;  %3664 = vmatmul.mubr.bf16.gmra.mxu0 %v1070_v35 }
  0xeb   :  { %3603 = vmatprep.mubr.msk.bf16.mxu1 %vm4063_vm0, %v4062_v0  ;;  %3667 = vmatprep.mubr.msk.bf16.mxu0 %vm4063_vm0, %v4062_v0 }
  0xec   :  { %v3377_v10 = vpop.f32.mrf.mxu0  ;;  %v3405_v19 = vpop.f32.mrf.mxu1 }
  0xee   :  { %v4844_v20 = vpop.f32.mrf.mxu0  ;;  %v4846_v45 = vpop.f32.mrf.mxu1 }
  0xf0   :  { %v3378_v51 = vpop.f32.mrf.mxu0  ;;  %v3406_v21 = vpop.f32.mrf.mxu1 }
  0xf1   :  { %v1062_v51 = vld [vmem:[%s6304_s0 + $0xc3] sm:$0xff] }
  0xf2   :  { %v4848_v46 = vpop.f32.mrf.mxu0  ;;  %v4850_v47 = vpop.f32.mrf.mxu1  ;;  %3604 = vmatmul.mubr.bf16.gmra.mxu1 %v805_v5  ;;  %3668 = vmatmul.mubr.bf16.gmra.mxu0 %v1071_v48 }
  0xf3   :  { %3607 = vmatprep.mubr.msk.bf16.mxu1 %vm4063_vm0, %v4062_v0  ;;  %3671 = vmatprep.mubr.msk.bf16.mxu0 %vm4063_vm0, %v4062_v0 }
  0xf4   :  { %v3381_v24 = vpop.f32.mrf.mxu0  ;;  %v3409_v25 = vpop.f32.mrf.mxu1 }
  0xf5   :  { %v810_v24 = vpack.c.bf16 %v797_v1, %v4673_v9  ;;  %v1076_v25 = vpack.c.bf16 %v1062_v51, %v1061_v8  ;;  %v1064_v9 = vld [vmem:[%s6304_s0 + $0xd3] sm:$0xff] }
  0xf6   :  { %v4865_v26 = vpop.f32.mrf.mxu0  ;;  %v4867_v62 = vpop.f32.mrf.mxu1 }
  0xf8   :  { %v3382_v5 = vpop.f32.mrf.mxu0  ;;  %v3410_v55 = vpop.f32.mrf.mxu1 }
  0xfa   :  { %v4869_v56 = vpop.f32.mrf.mxu0  ;;  %v4871_v58 = vpop.f32.mrf.mxu1  ;;  %3608 = vmatmul.mubr.bf16.gmra.mxu1 %v806_v16  ;;  %3672 = vmatmul.mubr.bf16.gmra.mxu0 %v1072_v63  ;;  %v1073_v16 = vpack.c.bf16 %v1056_v28, %v1055_v27 }
  0xfb   :  { %3611 = vmatprep.mubr.msk.bf16.mxu1 %vm4063_vm0, %v4062_v0  ;;  %3675 = vmatprep.mubr.msk.bf16.mxu0 %vm4063_vm0, %v4062_v0 }
  0xfc   :  { %v3385_v29 = vpop.f32.mrf.mxu0  ;;  %v3413_v2 = vpop.f32.mrf.mxu1 }
  0xfd   :  { %v1063_v29 = vld [vmem:[%s6304_s0 + $0xcb] sm:$0xff] }
  0xfe   :  { %v4886_v3 = vpop.f32.mrf.mxu0  ;;  %v4888_v14 = vpop.f32.mrf.mxu1  ;;  %v1077_v41 = vpack.c.bf16 %v1064_v9, %v1063_v29 }
 0x100   :  { %v3386_v4 = vpop.f32.mrf.mxu0  ;;  %v3414_v30 = vpop.f32.mrf.mxu1 }
 0x102   :  { %v4892_v31 = vpop.f32.mrf.mxu0  ;;  %v4894_v32 = vpop.f32.mrf.mxu1  ;;  %3612 = vmatmul.mubr.bf16.gmra.mxu1 %v807_v15  ;;  %3676 = vmatmul.mubr.bf16.gmra.mxu0 %v1073_v16 }
 0x103   :  { %3615 = vmatprep.mubr.msk.bf16.mxu1 %vm4063_vm0, %v4062_v0  ;;  %3679 = vmatprep.mubr.msk.bf16.mxu0 %vm4063_vm0, %v4062_v0 }
 0x104   :  { %v3389_v52 = vpop.f32.mrf.mxu0  ;;  %v3417_v11 = vpop.f32.mrf.mxu1 }
 0x106   :  { %v4906_v12 = vpop.f32.mrf.mxu0  ;;  %v4908_v13 = vpop.f32.mrf.mxu1 }
 0x108   :  { %v3390_v39 = vpop.f32.mrf.mxu0  ;;  %v3418_v17 = vpop.f32.mrf.mxu1 }
 0x109   :  { %v4044_v17 = vld [vmem:[%s6303_s1 + $0x1f8] sm:$0xff]  }
 0x10a   :  { %v4912_v18 = vpop.f32.mrf.mxu0  ;;  %v4914_v42 = vpop.f32.mrf.mxu1  ;;  %3616 = vmatmul.mubr.bf16.gmra.mxu1 %v808_v36  ;;  %3680 = vmatmul.mubr.bf16.gmra.mxu0 %v1074_v38 }
 0x10b   :  { %3619 = vmatprep.mubr.msk.bf16.mxu1 %vm4063_vm0, %v4062_v0  ;;  %3683 = vmatprep.mubr.msk.bf16.mxu0 %vm4063_vm0, %v4062_v0 }
 0x10c   :  { %v3393_v61 = vpop.f32.mrf.mxu0  ;;  %v3421_v44 = vpop.f32.mrf.mxu1 }
 0x10e   :  { %v4926_v50 = vpop.f32.mrf.mxu0  ;;  %v4928_v35 = vpop.f32.mrf.mxu1 }
 0x110   :  { %v3394_v6 = vpop.f32.mrf.mxu0  ;;  %v3422_v7 = vpop.f32.mrf.mxu1 }
 0x112   :  { %v4932_v10 = vpop.f32.mrf.mxu0  ;;  %v402_v19 = vpop.f32.mrf.mxu1  ;;  %3620 = vmatmul.mubr.bf16.gmra.mxu1 %v809_v37  ;;  %3684 = vmatmul.mubr.bf16.gmra.mxu0 %v1075_v57  ;;  %v1309_v37 = vld [vmem:[%s6304_s0 + $0x24] sm:$0xff] }
 0x113   :  { %v403_v48 = vadd.f32 %v402_v19, %v4806_v23  ;;  %3623 = vmatprep.mubr.msk.bf16.mxu1 %vm4063_vm0, %v4062_v0  ;;  %3687 = vmatprep.mubr.msk.bf16.mxu0 %vm4063_vm0, %v4062_v0 }
 0x114   :  { %v3397_v21 = vpop.f32.mrf.mxu0  ;;  %v3441_v23 = vpop.f32.mrf.mxu1 }
 0x115   :  { %v4045_v21 = vld [vmem:[%s6303_s1 + $0x238] sm:$0xff]  }
 0x116   :  { %v4948_v49 = vpop.f32.mrf.mxu0  ;;  %v405_v22 = vpop.f32.mrf.mxu1 }
 0x117   :  { %v406_v63 = vadd.f32 %v405_v22, %v4823_v54  ;;  %v1306_v54 = vld [vmem:[%s6304_s0 + $0xc] sm:$0xff] }
 0x118   :  { %v3398_v5 = vpop.f32.mrf.mxu0  ;;  %v3442_v55 = vpop.f32.mrf.mxu1 }
 0x119   :  { %v1310_v55 = vld [vmem:[%s6304_s0 + $0x2c] sm:$0xff] }
 0x11a   :  { %v410_v27 = vpop.f32.mrf.mxu1  ;;  %v643_v28 = vpop.f32.mrf.mxu0  ;;  %3624 = vmatmul.mubr.bf16.gmra.mxu1 %v810_v24  ;;  %3688 = vmatmul.mubr.bf16.gmra.mxu0 %v1076_v25  ;;  %v4048_v24 = vld [vmem:[%s6303_s1 + $0x1e8] sm:$0xff]  }
 0x11b   :  { %v411_v2 = vadd.f32 %v410_v27, %v4827_v59  ;;  %v4956_v15 = vadd.f32 %v643_v28, %v403_v48  ;;  %3691 = vmatprep.mubr.msk.bf16.mxu0 %vm4063_vm0, %v4062_v0  ;;  %3711 = vmatprep.mubr.msk.bf16.mxu1 %vm4063_vm0, %v4062_v0  ;;  %v1307_v59 = vld [vmem:[%s6304_s0 + $0x14] sm:$0xff] }
 0x11c   :  { %v3445_v16 = vpop.f32.mrf.mxu1  ;;  %v3509_v4 = vpop.f32.mrf.mxu0  ;;  %v1332_v52 = vpack.c.bf16 %v1307_v59, %v1306_v54  ;;  %v1311_v27 = vld [vmem:[%s6304_s0 + $0x34] sm:$0xff] }
 0x11d   :  { %v4047_v28 = vld [vmem:[%s6303_s1 + $0x230] sm:$0xff]   ;;  %v1600_v16 = vpack.c.bf16 %v1310_v55, %v1309_v37 }
 0x11e   :  { %v413_v30 = vpop.f32.mrf.mxu1  ;;  %v646_v33 = vpop.f32.mrf.mxu0 }
 0x11f   :  { %v414_v11 = vadd.f32 %v413_v30, %v4844_v20  ;;  %v4972_v36 = vadd.f32 %v646_v33, %v406_v63  ;;  %v1308_v20 = vld [vmem:[%s6304_s0 + $0x1c] sm:$0xff] }
 0x120   :  { %v3446_v38 = vpop.f32.mrf.mxu1  ;;  %v3510_v39 = vpop.f32.mrf.mxu0  ;;  %v1333_v48 = vpack.c.bf16 %v1309_v37, %v1308_v20  ;;  %v1599_v1 = vpack.c.bf16 %v1308_v20, %v1307_v59  ;;  %v1334_v59 = vpack.c.bf16 %v1311_v27, %v1310_v55  ;;  %v4054_v37 = vld [vmem:[%s6303_s1 + $0x1d0] sm:$0xff]  }
 0x122   :  { %v418_v43 = vpop.f32.mrf.mxu1  ;;  %v651_v53 = vpop.f32.mrf.mxu0  ;;  %3692 = vmatmul.mubr.bf16.gmra.mxu0 %v1077_v41  ;;  %3712 = vmatmul.mubr.bf16.vlgmr.msra.gmra.mxu1 %v1332_v52  ;;  %v4049_v52 = vld [vmem:[%s6303_s1 + $0x228] sm:$0xff]  }
 0x123   :  { %v419_v61 = vadd.f32 %v418_v43, %v4848_v46  ;;  %v4978_v44 = vadd.f32 %v651_v53, %v411_v2  ;;  %3715 = vmatprep.mubr.msk.bf16.mxu1 %vm4063_vm0, %v4062_v0  ;;  %3779 = vmatprep.mubr.msk.bf16.mxu0 %vm4063_vm0, %v4062_v0  ;;  %v4046_v46 = vld [vmem:[%s6303_s1 + $0x1f0] sm:$0xff]   ;;  %v4050_v2 = vld [vmem:[%s6303_s1 + $0x1e0] sm:$0xff]  }
 0x124   :  { %v3449_v57 = vpop.f32.mrf.mxu1  ;;  %v3513_v6 = vpop.f32.mrf.mxu0  ;;  %3832 = vmatpush3.bf16.msra.mxu1 %v4044_v17  ;;  %v1312_v43 = vld [vmem:[%s6304_s0 + $0x3c] sm:$0xff]  ;;  %v1313_v53 = vld [vmem:[%s6304_s0 + $0x44] sm:$0xff] }
 0x125   :  { %3833 = vmatprep.subr.bf16.mxu1 %v4062_v0 }
 0x126   :  { %v421_v7 = vpop.f32.mrf.mxu1  ;;  %v654_v19 = vpop.f32.mrf.mxu0 }
 0x127   :  { %v422_v8 = vadd.f32 %v421_v7, %v4865_v26  ;;  %v4995_v51 = vadd.f32 %v654_v19, %v414_v11  ;;  %v4052_v11 = vld [vmem:[%s6303_s1 + $0x1d8] sm:$0xff]   ;;  %v1601_v7 = vpack.c.bf16 %v1312_v43, %v1311_v27 }
 0x128   :  { %v3450_v23 = vpop.f32.mrf.mxu1  ;;  %v3514_v22 = vpop.f32.mrf.mxu0  ;;  %3834 = vmatpush3.bf16.msra.mxu1 %v4046_v46  ;;  %v1335_v46 = vpack.c.bf16 %v1313_v53, %v1312_v43 }
 0x129   :  { %3835 = vmatprep.subr.bf16.mxu1 %v4062_v0  ;;  %v4056_v23 = vld [vmem:[%s6303_s1 + $0x1c8] sm:$0xff]  }
 0x12a   :  { %v426_v25 = vpop.f32.mrf.mxu1  ;;  %v659_v63 = vpop.f32.mrf.mxu0  ;;  %3716 = vmatmul.mubr.bf16.gmra.mxu1 %v1333_v48  ;;  %3780 = vmatmul.mubr.bf16.vlgmr.msra.gmra.mxu0 %v1599_v1 }
 0x12b   :  { %v427_v26 = vadd.f32 %v426_v25, %v4869_v56  ;;  %v5005_v5 = vadd.f32 %v659_v63, %v419_v61  ;;  %3900 = vmatpush3.bf16.msra.mxu0 %v4045_v21  ;;  %3719 = vmatprep.mubr.msk.bf16.mxu1 %vm4063_vm0, %v4062_v0  ;;  %v4053_v21 = vld [vmem:[%s6303_s1 + $0x218] sm:$0xff]   ;;  %v1314_v63 = vld [vmem:[%s6304_s0 + $0x4c] sm:$0xff] }
 0x12c   :  { %v3453_v29 = vpop.f32.mrf.mxu1  ;;  %v3517_v56 = vpop.f32.mrf.mxu0  ;;  %3783 = vmatprep.mubr.msk.bf16.mxu0 %vm4063_vm0, %v4062_v0  ;;  %3901 = vmatprep.subr.bf16.mxu0 %v4062_v0 }
 0x12d   :  { %3836 = vmatpush3.bf16.msra.mxu1 %v4048_v24 }
 0x12e   :  { %v429_v9 = vpop.f32.mrf.mxu1  ;;  %v662_v54 = vpop.f32.mrf.mxu0  ;;  %3837 = vmatprep.subr.bf16.mxu1 %v4062_v0 }
 0x12f   :  { %v430_v4 = vadd.f32 %v429_v9, %v4886_v3  ;;  %v5026_v30 = vadd.f32 %v662_v54, %v422_v8  ;;  %3902 = vmatpush3.bf16.msra.mxu0 %v4047_v28  ;;  %v4058_v28 = vld [vmem:[%s6303_s1 + $0x1c0] sm:$0xff]   ;;  %v1602_v9 = vpack.c.bf16 %v1314_v63, %v1313_v53 }
 0x130   :  { %v3454_v33 = vpop.f32.mrf.mxu1  ;;  %v3518_v41 = vpop.f32.mrf.mxu0  ;;  %3903 = vmatprep.subr.bf16.mxu0 %v4062_v0 }
 0x131   :  { %3838 = vmatpush3.bf16.msra.mxu1 %v4050_v2  ;;  %v4057_v33 = vld [vmem:[%s6303_s1 + $0x208] sm:$0xff]  }
 0x132   :  { %v434_v38 = vpop.f32.mrf.mxu1  ;;  %v667_v39 = vpop.f32.mrf.mxu0  ;;  %3720 = vmatmul.mubr.bf16.gmra.mxu1 %v1334_v59  ;;  %3784 = vmatmul.mubr.bf16.gmra.mxu0 %v1600_v16 }
 0x133   :  { %v435_v3 = vadd.f32 %v434_v38, %v4892_v31  ;;  %v5036_v17 = vadd.f32 %v667_v39, %v427_v26  ;;  %3723 = vmatprep.mubr.msk.bf16.mxu1 %vm4063_vm0, %v4062_v0  ;;  %3787 = vmatprep.mubr.msk.bf16.mxu0 %vm4063_vm0, %v4062_v0  ;;  %v4051_v31 = vld [vmem:[%s6303_s1 + $0x220] sm:$0xff]   ;;  %v1315_v26 = vld [vmem:[%s6304_s0 + $0x54] sm:$0xff] }
 0x134   :  { %v3457_v61 = vpop.f32.mrf.mxu1  ;;  %v3521_v20 = vpop.f32.mrf.mxu0  ;;  %3904 = vmatpush3.bf16.msra.mxu0 %v4049_v52  ;;  %3839 = vmatprep.subr.bf16.mxu1 %v4062_v0  ;;  %v1336_v2 = vpack.c.bf16 %v1315_v26, %v1314_v63  ;;  %v1317_v39 = vld [vmem:[%s6304_s0 + $0x64] sm:$0xff] }
 0x135   :  { %3905 = vmatprep.subr.bf16.mxu0 %v4062_v0  ;;  %3840 = vmatpush3.bf16.msra.mxu1 %v4052_v11 }
 0x136   :  { %v437_v57 = vpop.f32.mrf.mxu1  ;;  %v670_v6 = vpop.f32.mrf.mxu0  ;;  %3841 = vmatprep.subr.bf16.mxu1 %v4062_v0 }
 0x137   :  { %v438_v19 = vadd.f32 %v437_v57, %v4906_v12  ;;  %v5058_v48 = vadd.f32 %v670_v6, %v430_v4 }
 0x138   :  { %v3458_v1 = vpop.f32.mrf.mxu1  ;;  %v3522_v8 = vpop.f32.mrf.mxu0  ;;  %3906 = vmatpush3.bf16.msra.mxu0 %v4051_v31 }
 0x139   :  { %3907 = vmatprep.subr.bf16.mxu0 %v4062_v0  ;;  %3842 = vmatpush3.bf16.msra.mxu1 %v4054_v37  ;;  %v1319_v8 = vld [vmem:[%s6304_s0 + $0x74] sm:$0xff] }
 0x13a   :  { %v442_v22 = vpop.f32.mrf.mxu1  ;;  %v675_v24 = vpop.f32.mrf.mxu0  ;;  %3724 = vmatmul.mubr.bf16.gmra.mxu1 %v1335_v46  ;;  %3788 = vmatmul.mubr.bf16.gmra.mxu0 %v1601_v7 }
 0x13b   :  { %v443_v12 = vadd.f32 %v442_v22, %v4912_v18  ;;  %v5068_v25 = vadd.f32 %v675_v24, %v435_v3  ;;  %3727 = vmatprep.mubr.msk.bf16.mxu1 %vm4063_vm0, %v4062_v0  ;;  %3791 = vmatprep.mubr.msk.bf16.mxu0 %vm4063_vm0, %v4062_v0  ;;  %v4055_v18 = vld [vmem:[%s6303_s1 + $0x210] sm:$0xff]  }
 0x13c   :  { %v3461_v55 = vpop.f32.mrf.mxu1  ;;  %v3525_v27 = vpop.f32.mrf.mxu0  ;;  %3908 = vmatpush3.bf16.msra.mxu0 %v4053_v21  ;;  %3843 = vmatprep.subr.bf16.mxu1 %v4062_v0 }
 0x13d   :  { %3909 = vmatprep.subr.bf16.mxu0 %v4062_v0  ;;  %3844 = vmatpush3.bf16.msra.mxu1 %v4056_v23 }
 0x13e   :  { %v445_v29 = vpop.f32.mrf.mxu1  ;;  %v678_v56 = vpop.f32.mrf.mxu0  ;;  %3845 = vmatprep.subr.bf16.mxu1 %v4062_v0 }
 0x13f   :  { %v446_v54 = vadd.f32 %v445_v29, %v4926_v50  ;;  %v5090_v59 = vadd.f32 %v678_v56, %v438_v19  ;;  %v1316_v50 = vld [vmem:[%s6304_s0 + $0x5c] sm:$0xff] }
 0x140   :  { %v3462_v16 = vpop.f32.mrf.mxu1  ;;  %v3526_v4 = vpop.f32.mrf.mxu0  ;;  %3910 = vmatpush3.bf16.msra.mxu0 %v4055_v18  ;;  %v1337_v20 = vpack.c.bf16 %v1317_v39, %v1316_v50  ;;  %v1603_v31 = vpack.c.bf16 %v1316_v50, %v1315_v26 }
 0x141   :  { %3911 = vmatprep.subr.bf16.mxu0 %v4062_v0  ;;  %3846 = vmatpush3.bf16.msra.mxu1 %v4058_v28 }
 0x142   :  { %v450_v41 = vpop.f32.mrf.mxu1  ;;  %v683_v52 = vpop.f32.mrf.mxu0  ;;  %3728 = vmatmul.mubr.bf16.gmra.mxu1 %v1336_v2  ;;  %3792 = vmatmul.mubr.bf16.gmra.mxu0 %v1602_v9  ;;  %v1320_v2 = vld [vmem:[%s6304_s0 + $0x7c] sm:$0xff] }
 0x143   :  { %v451_v11 = vadd.f32 %v450_v41, %v4932_v10  ;;  %v5097_v38 = vadd.f32 %v683_v52, %v443_v12  ;;  %3731 = vmatprep.mubr.msk.bf16.mxu1 %vm4063_vm0, %v4062_v0  ;;  %3795 = vmatprep.mubr.msk.bf16.mxu0 %vm4063_vm0, %v4062_v0  ;;  %v4059_v10 = vld [vmem:[%s6303_s1 + $0x200] sm:$0xff]   ;;  %v1605_v52 = vpack.c.bf16 %v1320_v2, %v1319_v8 }
 0x144   :  { %v3465_v3 = vpop.f32.mrf.mxu1  ;;  %v3529_v43 = vpop.f32.mrf.mxu0  ;;  %3912 = vmatpush3.bf16.msra.mxu0 %v4057_v33 }
 0x145   :  { %3913 = vmatprep.subr.bf16.mxu0 %v4062_v0  ;;  %v4064_v3 = vmov 0   ;;  %v2374_v43 = vld [vmem:[%s6305_s4] sm:$0xff] }
 0x146   :  { %v453_v53 = vpop.f32.mrf.mxu1  ;;  %v686_v61 = vpop.f32.mrf.mxu0  ;;  %3986 = vset.pattern.permute.xlu0 %v4064_v3  ;;  %3987 = vset.pattern.permute.xlu1 %v4064_v3  ;;  %v2381_v3 = vld [vmem:[%s6305_s4 + $0x38] sm:$0xff] }
 0x147   :  { %v454_v37 = vadd.f32 %v453_v53, %v4948_v49  ;;  %v5114_v57 = vadd.f32 %v686_v61, %v446_v54  ;;  %v1318_v49 = vld [vmem:[%s6304_s0 + $0x6c] sm:$0xff]  ;;  %2402 = vperm.xlu0 %3986, %v2374_v43   ;;  %v2382_v43 = vld [vmem:[%s6305_s4 + $0x40] sm:$0xff] }
 0x148   :  { %v3466_v6 = vpop.f32.mrf.mxu1  ;;  %v3530_v46 = vpop.f32.mrf.mxu0  ;;  %3914 = vmatpush3.bf16.msra.mxu0 %v4059_v10  ;;  %v1338_v12 = vpack.c.bf16 %v1319_v8, %v1318_v49  ;;  %v1604_v63 = vpack.c.bf16 %v1318_v49, %v1317_v39 }
 0x149   :  { %v2375_v6 = vld [vmem:[%s6305_s4 + $0x8] sm:$0xff]  ;;  %v2376_v46 = vld [vmem:[%s6305_s4 + $0x10] sm:$0xff] }
 0x14a   :  { %v458_v7 = vpop.f32.mrf.mxu1  ;;  %v691_v19 = vpop.f32.mrf.mxu0  ;;  %3732 = vmatmul.mubr.bf16.gmra.mxu1 %v1337_v20  ;;  %3796 = vmatmul.mubr.bf16.gmra.mxu0 %v1603_v31  ;;  %v1322_v20 = vld [vmem:[%s6304_s0 + $0x8c] sm:$0xff] }
 0x14b   :  { %v5116_v1 = vadd.f32 %v691_v19, %v451_v11  ;;  %3735 = vmatprep.mubr.msk.bf16.mxu1 %vm4063_vm0, %v4062_v0  ;;  %3799 = vmatprep.mubr.msk.bf16.mxu0 %vm4063_vm0, %v4062_v0  ;;  %v459_v18 = vadd.f32 %v458_v7, %v4808_v40  ;;  %v1321_v40 = vld [vmem:[%s6304_s0 + $0x84] sm:$0xff] }
 0x14c   :  { %v3469_v21 = vpop.f32.mrf.mxu1  ;;  %v3533_v23 = vpop.f32.mrf.mxu0  ;;  %v1339_v41 = vpack.c.bf16 %v1321_v40, %v1320_v2  ;;  %2407 = vperm.xlu0 %3986, %v2375_v6   ;;  %2412 = vperm.xlu1 %3987, %v2376_v46   ;;  %v2384_v6 = vld [vmem:[%s6305_s4 + $0x50] sm:$0xff] }
 0x14d   :  { %v1606_v21 = vpack.c.bf16 %v1322_v20, %v1321_v40  ;;  %v2379_v40 = vld [vmem:[%s6305_s4 + $0x28] sm:$0xff] }
 0x14e   :  { %v461_v22 = vpop.f32.mrf.mxu1  ;;  %v694_v24 = vpop.f32.mrf.mxu0 }
 0x14f   :  { %v5128_v26 = vadd.f32 %v694_v24, %v454_v37  ;;  %v462_v16 = vadd.f32 %v461_v22, %v4825_v34 }
 0x150   :  { %v3470_v55 = vpop.f32.mrf.mxu1  ;;  %v3534_v27 = vpop.f32.mrf.mxu0 }
 0x152   :  { %v466_v28 = vpop.f32.mrf.mxu1  ;;  %v699_v29 = vpop.f32.mrf.mxu0  ;;  %3736 = vmatmul.mubr.bf16.gmra.mxu1 %v1338_v12  ;;  %3800 = vmatmul.mubr.bf16.gmra.mxu0 %v1604_v63  ;;  %v2377_v12 = vld [vmem:[%s6305_s4 + $0x18] sm:$0xff]  ;;  %v2378_v63 = vld [vmem:[%s6305_s4 + $0x20] sm:$0xff] }
 0x153   :  { %v5131_v56 = vadd.f32 %v699_v29, %v459_v18  ;;  %3739 = vmatprep.mubr.msk.bf16.mxu1 %vm4063_vm0, %v4062_v0  ;;  %3803 = vmatprep.mubr.msk.bf16.mxu0 %vm4063_vm0, %v4062_v0  ;;  %v467_v10 = vadd.f32 %v466_v28, %v4829_v60  ;;  %v1323_v60 = vld [vmem:[%s6304_s0 + $0x94] sm:$0xff]  ;;  %v1324_v28 = vld [vmem:[%s6304_s0 + $0x9c] sm:$0xff] }
 0x154   :  { %v3473_v9 = vpop.f32.mrf.mxu1  ;;  %v3537_v54 = vpop.f32.mrf.mxu0  ;;  %v1340_v8 = vpack.c.bf16 %v1323_v60, %v1322_v20  ;;  %2417 = vperm.xlu1 %3987, %v2377_v12   ;;  %2422 = vperm.xlu0 %3986, %v2378_v63   ;;  %v1326_v20 = vld [vmem:[%s6304_s0 + $0xac] sm:$0xff]  ;;  %v2385_v12 = vld [vmem:[%s6305_s4 + $0x58] sm:$0xff]  ;;  %v2386_v63 = vld [vmem:[%s6305_s4 + $0x60] sm:$0xff] }
 0x155   :  { %v2380_v9 = vld [vmem:[%s6305_s4 + $0x30] sm:$0xff] }
 0x156   :  { %v469_v4 = vpop.f32.mrf.mxu1  ;;  %v702_v33 = vpop.f32.mrf.mxu0 }
 0x157   :  { %v5144_v11 = vadd.f32 %v702_v33, %v462_v16  ;;  %v470_v7 = vadd.f32 %v469_v4, %v4846_v45 }
 0x158   :  { %v3474_v50 = vpop.f32.mrf.mxu1  ;;  %v3538_v39 = vpop.f32.mrf.mxu0  ;;  %2427 = vperm.xlu1 %3987, %v2379_v40   ;;  %2432 = vperm.xlu0 %3986, %v2380_v9   ;;  %v2388_v40 = vld [vmem:[%s6305_s4 + $0x70] sm:$0xff] }
 0x15a   :  { %v474_v53 = vpop.f32.mrf.mxu1  ;;  %v707_v34 = vpop.f32.mrf.mxu0  ;;  %3740 = vmatmul.mubr.bf16.gmra.mxu1 %v1339_v41  ;;  %3804 = vmatmul.mubr.bf16.gmra.mxu0 %v1605_v52  ;;  %v1607_v41 = vpack.c.bf16 %v1324_v28, %v1323_v60 }
 0x15b   :  { %v5150_v61 = vadd.f32 %v707_v34, %v467_v10  ;;  %3743 = vmatprep.mubr.msk.bf16.mxu1 %vm4063_vm0, %v4062_v0  ;;  %3807 = vmatprep.mubr.msk.bf16.mxu0 %vm4063_vm0, %v4062_v0  ;;  %v475_v45 = vadd.f32 %v474_v53, %v4850_v47  ;;  %v1325_v47 = vld [vmem:[%s6304_s0 + $0xa4] sm:$0xff] }
 0x15c   :  { %v3477_v31 = vpop.f32.mrf.mxu1  ;;  %v3541_v37 = vpop.f32.mrf.mxu0  ;;  %v1341_v33 = vpack.c.bf16 %v1325_v47, %v1324_v28  ;;  %2437 = vperm.xlu1 %3987, %v2381_v3   ;;  %2442 = vperm.xlu0 %3986, %v2382_v43   ;;  %v1328_v28 = vld [vmem:[%s6304_s0 + $0xbc] sm:$0xff] }
 0x15d   :  { %v2383_v37 = vld [vmem:[%s6305_s4 + $0x48] sm:$0xff]  ;;  %v2389_v3 = vld [vmem:[%s6305_s4 + $0x78] sm:$0xff]  ;;  %v2390_v43 = vld [vmem:[%s6305_s4 + $0x80] sm:$0xff] }
 0x15e   :  { %v477_v19 = vpop.f32.mrf.mxu1  ;;  %v710_v49 = vpop.f32.mrf.mxu0 }
 0x15f   :  { %v5169_v23 = vadd.f32 %v710_v49, %v470_v7  ;;  %v478_v54 = vadd.f32 %v477_v19, %v4867_v62 }
 0x160   :  { %v3478_v22 = vpop.f32.mrf.mxu1  ;;  %v3542_v24 = vpop.f32.mrf.mxu0  ;;  %2447 = vperm.xlu1 %3987, %v2383_v37   ;;  %2452 = vperm.xlu0 %3986, %v2384_v6   ;;  %v2392_v37 = vld [vmem:[%s6305_s4 + $0x90] sm:$0xff] }
 0x162   :  { %v482_v55 = vpop.f32.mrf.mxu1  ;;  %v715_v27 = vpop.f32.mrf.mxu0  ;;  %3744 = vmatmul.mubr.bf16.gmra.mxu1 %v1340_v8  ;;  %3808 = vmatmul.mubr.bf16.gmra.mxu0 %v1606_v21  ;;  %v1608_v8 = vpack.c.bf16 %v1326_v20, %v1325_v47 }
 0x163   :  { %v5178_v18 = vadd.f32 %v715_v27, %v475_v45  ;;  %3747 = vmatprep.mubr.msk.bf16.mxu1 %vm4063_vm0, %v4062_v0  ;;  %3811 = vmatprep.mubr.msk.bf16.mxu0 %vm4063_vm0, %v4062_v0  ;;  %v483_v62 = vadd.f32 %v482_v55, %v4871_v58  ;;  %v1327_v58 = vld [vmem:[%s6304_s0 + $0xb4] sm:$0xff] }
 0x164   :  { %v3481_v29 = vpop.f32.mrf.mxu1  ;;  %v3545_v2 = vpop.f32.mrf.mxu0  ;;  %v1342_v49 = vpack.c.bf16 %v1327_v58, %v1326_v20  ;;  %2457 = vperm.xlu1 %3987, %v2385_v12   ;;  %2462 = vperm.xlu0 %3986, %v2386_v63   ;;  %v2393_v63 = vld [vmem:[%s6305_s4 + $0x98] sm:$0xff] }
 0x165   :  { %v2387_v2 = vld [vmem:[%s6305_s4 + $0x68] sm:$0xff] }
 0x166   :  { %v485_v16 = vpop.f32.mrf.mxu1  ;;  %v718_v4 = vpop.f32.mrf.mxu0 }
 0x167   :  { %v5197_v52 = vadd.f32 %v718_v4, %v478_v54  ;;  %v486_v46 = vadd.f32 %v485_v16, %v4888_v14 }
 0x168   :  { %v3482_v50 = vpop.f32.mrf.mxu1  ;;  %v3546_v39 = vpop.f32.mrf.mxu0  ;;  %2467 = vperm.xlu1 %3987, %v2387_v2   ;;  %2472 = vperm.xlu0 %3986, %v2388_v40   ;;  %v2395_v2 = vld [vmem:[%s6305_s4 + $0xa8] sm:$0xff]  ;;  %v2396_v40 = vld [vmem:[%s6305_s4 + $0xb0] sm:$0xff] }
 0x16a   :  { %v490_v10 = vpop.f32.mrf.mxu1  ;;  %v723_v53 = vpop.f32.mrf.mxu0  ;;  %3748 = vmatmul.mubr.bf16.gmra.mxu1 %v1341_v33  ;;  %3812 = vmatmul.mubr.bf16.gmra.mxu0 %v1607_v41  ;;  %v1609_v33 = vpack.c.bf16 %v1328_v28, %v1327_v58  ;;  %v1331_v58 = vld [vmem:[%s6304_s0 + $0xd4] sm:$0xff] }
 0x16b   :  { %v5206_v34 = vadd.f32 %v723_v53, %v483_v62  ;;  %3751 = vmatprep.mubr.msk.bf16.mxu1 %vm4063_vm0, %v4062_v0  ;;  %3815 = vmatprep.mubr.msk.bf16.mxu0 %vm4063_vm0, %v4062_v0  ;;  %v491_v14 = vadd.f32 %v490_v10, %v4894_v32  ;;  %v1329_v32 = vld [vmem:[%s6304_s0 + $0xc4] sm:$0xff] }
 0x16c   :  { %v3485_v60 = vpop.f32.mrf.mxu1  ;;  %v3549_v31 = vpop.f32.mrf.mxu0  ;;  %v1343_v4 = vpack.c.bf16 %v1329_v32, %v1328_v28  ;;  %2477 = vperm.xlu1 %3987, %v2389_v3   ;;  %2482 = vperm.xlu0 %3986, %v2390_v43   ;;  %v2397_v43 = vld [vmem:[%s6305_s4 + $0xb8] sm:$0xff] }
 0x16e   :  { %v493_v7 = vpop.f32.mrf.mxu1  ;;  %v726_v19 = vpop.f32.mrf.mxu0 }
 0x16f   :  { %v5225_v21 = vadd.f32 %v726_v19, %v486_v46  ;;  %v494_v9 = vadd.f32 %v493_v7, %v4908_v13 }
 0x170   :  { %v3486_v22 = vpop.f32.mrf.mxu1  ;;  %v3550_v24 = vpop.f32.mrf.mxu0  ;;  %2492 = vperm.xlu0 %3986, %v2392_v37   ;;  %v2399_v37 = vld [vmem:[%s6305_s4 + $0xc8] sm:$0xff] }
 0x172   :  { %v498_v45 = vpop.f32.mrf.mxu1  ;;  %v731_v55 = vpop.f32.mrf.mxu0  ;;  %3752 = vmatmul.mubr.bf16.gmra.mxu1 %v1342_v49  ;;  %3816 = vmatmul.mubr.bf16.gmra.mxu0 %v1608_v8 }
 0x173   :  { %v5234_v27 = vadd.f32 %v731_v55, %v491_v14  ;;  %3755 = vmatprep.mubr.msk.bf16.mxu1 %vm4063_vm0, %v4062_v0  ;;  %3819 = vmatprep.mubr.msk.bf16.mxu0 %vm4063_vm0, %v4062_v0  ;;  %v499_v13 = vadd.f32 %v498_v45, %v4914_v42  ;;  %v1330_v42 = vld [vmem:[%s6304_s0 + $0xcc] sm:$0xff] }
 0x174   :  { %v3489_v47 = vpop.f32.mrf.mxu1  ;;  %v3553_v29 = vpop.f32.mrf.mxu0  ;;  %v1344_v19 = vpack.c.bf16 %v1331_v58, %v1330_v42  ;;  %v1610_v49 = vpack.c.bf16 %v1330_v42, %v1329_v32  ;;  %v1840_v32 = vld [vmem:[%s6304_s0 + $0x15] sm:$0xff] }
 0x176   :  { %v501_v54 = vpop.f32.mrf.mxu1  ;;  %v734_v16 = vpop.f32.mrf.mxu0 }
 0x177   :  { %v5253_v41 = vadd.f32 %v734_v16, %v494_v9  ;;  %v502_v6 = vadd.f32 %v501_v54, %v4928_v35  ;;  %v2394_v35 = vld [vmem:[%s6305_s4 + $0xa0] sm:$0xff] }
 0x178   :  { %v3490_v50 = vpop.f32.mrf.mxu1  ;;  %v3554_v39 = vpop.f32.mrf.mxu0  ;;  %2502 = vperm.xlu0 %3986, %v2394_v35  }
 0x17a   :  { %v739_v62 = vpop.f32.mrf.mxu0  ;;  %v910_v10 = vpop.f32.mrf.mxu1  ;;  %3756 = vmatmul.mubr.bf16.gmra.mxu1 %v1343_v4  ;;  %3820 = vmatmul.mubr.bf16.gmra.mxu0 %v1609_v33 }
 0x17b   :  { %v5262_v53 = vadd.f32 %v739_v62, %v499_v13  ;;  %v1013_v20 = vadd.f32 %v910_v10, %v4956_v15  ;;  %3759 = vmatprep.mubr.msk.bf16.mxu1 %vm4063_vm0, %v4062_v0  ;;  %3823 = vmatprep.mubr.msk.bf16.mxu0 %vm4063_vm0, %v4062_v0  ;;  %v2391_v15 = vld [vmem:[%s6305_s4 + $0x88] sm:$0xff]  ;;  %v2398_v13 = vld [vmem:[%s6305_s4 + $0xc0] sm:$0xff] }
 0x17c   :  { %v3557_v60 = vpop.f32.mrf.mxu0  ;;  %v3577_v31 = vpop.f32.mrf.mxu1  ;;  %2487 = vperm.xlu1 %3987, %v2391_v15   ;;  %2512 = vperm.xlu0 %3986, %v2396_v40  }
 0x17d   :  { %v2107_v60 = vld [vmem:[%s6304_s0 + $0x16] sm:$0xff] }
 0x17e   :  { %v742_v46 = vpop.f32.mrf.mxu0  ;;  %v913_v7 = vpop.f32.mrf.mxu1 }
 0x17f   :  { %v5282_v8 = vadd.f32 %v742_v46, %v502_v6  ;;  %v1014_v22 = vadd.f32 %v913_v7, %v4972_v36  ;;  %v1598_v36 = vld [vmem:[%s6304_s0 + $0xdc] sm:$0xff] }
 0x180   :  { %v3558_v24 = vpop.f32.mrf.mxu0  ;;  %v3578_v12 = vpop.f32.mrf.mxu1  ;;  %2497 = vperm.xlu1 %3987, %v2393_v63   ;;  %v1611_v16 = vpack.c.bf16 %v1598_v36, %v1331_v58  ;;  %2522 = vperm.xlu0 %3986, %v2398_v13   ;;  %v1843_v58 = vld [vmem:[%s6304_s0 + $0x2d] sm:$0xff] }
 0x181   :  { %v2109_v36 = vld [vmem:[%s6304_s0 + $0x26] sm:$0xff] }
 0x182   :  { %v918_v14 = vpop.f32.mrf.mxu1  ;;  %v1177_v45 = vpop.f32.mrf.mxu0  ;;  %3760 = vmatmul.mubr.bf16.gmra.mxu1 %v1344_v19  ;;  %3824 = vmatmul.mubr.bf16.gmra.mxu0 %v1610_v49 }
 0x183   :  { %v1015_v55 = vadd.f32 %v918_v14, %v4978_v44  ;;  %v5292_v28 = vadd.f32 %v1177_v45, %v1013_v20  ;;  %3827 = vmatprep.mubr.msk.bf16.mxu0 %vm4063_vm0, %v4062_v0  ;;  %3847 = vmatprep.mubr.msk.bf16.mxu1 %vm4063_vm0, %v4062_v0  ;;  %v1841_v44 = vld [vmem:[%s6304_s0 + $0x1d] sm:$0xff]  ;;  %v1844_v14 = vld [vmem:[%s6304_s0 + $0x35] sm:$0xff] }
 0x184   :  { %v3581_v47 = vpop.f32.mrf.mxu1  ;;  %v3645_v29 = vpop.f32.mrf.mxu0  ;;  %2507 = vperm.xlu1 %3987, %v2395_v2   ;;  %v1866_v4 = vpack.c.bf16 %v1841_v44, %v1840_v32 }
 0x186   :  { %v921_v9 = vpop.f32.mrf.mxu1  ;;  %v1180_v54 = vpop.f32.mrf.mxu0 }
 0x187   :  { %v1016_v33 = vadd.f32 %v921_v9, %v4995_v51  ;;  %v5314_v50 = vadd.f32 %v1180_v54, %v1014_v22  ;;  %v1842_v51 = vld [vmem:[%s6304_s0 + $0x25] sm:$0xff] }
 0x188   :  { %v3582_v39 = vpop.f32.mrf.mxu1  ;;  %v3646_v3 = vpop.f32.mrf.mxu0  ;;  %2517 = vperm.xlu1 %3987, %v2397_v43   ;;  %v1867_v7 = vpack.c.bf16 %v1843_v58, %v1842_v51 }
 0x189   :  { %v1846_v3 = vld [vmem:[%s6304_s0 + $0x45] sm:$0xff] }
 0x18a   :  { %v926_v62 = vpop.f32.mrf.mxu1  ;;  %v1185_v10 = vpop.f32.mrf.mxu0  ;;  %3828 = vmatmul.mubr.bf16.gmra.mxu0 %v1611_v16  ;;  %3848 = vmatmul.mubr.bf16.vlgmr.msra.gmra.mxu1 %v1866_v4 }
 0x18b   :  { %v1017_v20 = vadd.f32 %v926_v62, %v5005_v5  ;;  %v5326_v42 = vadd.f32 %v1185_v10, %v1015_v55  ;;  %3851 = vmatprep.mubr.msk.bf16.mxu1 %vm4063_vm0, %v4062_v0  ;;  %3915 = vmatprep.mubr.msk.bf16.mxu0 %vm4063_vm0, %v4062_v0  ;;  %v2108_v5 = vld [vmem:[%s6304_s0 + $0x1e] sm:$0xff]  ;;  %v2111_v62 = vld [vmem:[%s6304_s0 + $0x36] sm:$0xff] }
 0x18c   :  { %v3585_v31 = vpop.f32.mrf.mxu1  ;;  %v3649_v15 = vpop.f32.mrf.mxu0  ;;  %2527 = vperm.xlu1 %3987, %v2399_v37   ;;  %v2133_v19 = vpack.c.bf16 %v2108_v5, %v2107_v60 }
 0x18e   :  { %v929_v6 = vpop.f32.mrf.mxu1  ;;  %v1188_v46 = vpop.f32.mrf.mxu0 }
 0x18f   :  { %v1018_v49 = vadd.f32 %v929_v6, %v5026_v30  ;;  %v5345_v22 = vadd.f32 %v1188_v46, %v1016_v33  ;;  %v1845_v30 = vld [vmem:[%s6304_s0 + $0x3d] sm:$0xff] }
 0x190   :  { %v3586_v24 = vpop.f32.mrf.mxu1  ;;  %v3650_v12 = vpop.f32.mrf.mxu0  ;;  %v1868_v2 = vpack.c.bf16 %v1845_v30, %v1844_v14 }
 0x191   :  { %v2113_v12 = vld [vmem:[%s6304_s0 + $0x46] sm:$0xff] }
 0x192   :  { %v934_v63 = vpop.f32.mrf.mxu1  ;;  %v1193_v35 = vpop.f32.mrf.mxu0  ;;  %3852 = vmatmul.mubr.bf16.gmra.mxu1 %v1867_v7  ;;  %3916 = vmatmul.mubr.bf16.vlgmr.msra.gmra.mxu0 %v2133_v19  ;;  %v1848_v19 = vld [vmem:[%s6304_s0 + $0x55] sm:$0xff] }
 0x193   :  { %v1019_v45 = vadd.f32 %v934_v63, %v5036_v17  ;;  %v5351_v55 = vadd.f32 %v1193_v35, %v1017_v20  ;;  %3855 = vmatprep.mubr.msk.bf16.mxu1 %vm4063_vm0, %v4062_v0  ;;  %3919 = vmatprep.mubr.msk.bf16.mxu0 %vm4063_vm0, %v4062_v0  ;;  %v2110_v17 = vld [vmem:[%s6304_s0 + $0x2e] sm:$0xff] }
 0x194   :  { %v3589_v32 = vpop.f32.mrf.mxu1  ;;  %v3653_v44 = vpop.f32.mrf.mxu0  ;;  %v2134_v40 = vpack.c.bf16 %v2110_v17, %v2109_v36 }
 0x196   :  { %v937_v47 = vpop.f32.mrf.mxu1  ;;  %v1196_v29 = vpop.f32.mrf.mxu0 }
 0x197   :  { %v1020_v9 = vadd.f32 %v937_v47, %v5058_v48  ;;  %v5367_v54 = vadd.f32 %v1196_v29, %v1018_v49  ;;  %v1847_v48 = vld [vmem:[%s6304_s0 + $0x4d] sm:$0xff] }
 0x198   :  { %v3590_v16 = vpop.f32.mrf.mxu1  ;;  %v3654_v4 = vpop.f32.mrf.mxu0  ;;  %v1869_v60 = vpack.c.bf16 %v1847_v48, %v1846_v3 }
 0x199   :  { %v2115_v4 = vld [vmem:[%s6304_s0 + $0x56] sm:$0xff] }
 0x19a   :  { %v942_v33 = vpop.f32.mrf.mxu1  ;;  %v1201_v39 = vpop.f32.mrf.mxu0  ;;  %3856 = vmatmul.mubr.bf16.gmra.mxu1 %v1868_v2  ;;  %3920 = vmatmul.mubr.bf16.gmra.mxu0 %v2134_v40  ;;  %v1850_v40 = vld [vmem:[%s6304_s0 + $0x65] sm:$0xff] }
 0x19b   :  { %v1021_v43 = vadd.f32 %v942_v33, %v5068_v25  ;;  %v5373_v13 = vadd.f32 %v1201_v39, %v1019_v45  ;;  %3859 = vmatprep.mubr.msk.bf16.mxu1 %vm4063_vm0, %v4062_v0  ;;  %3923 = vmatprep.mubr.msk.bf16.mxu0 %vm4063_vm0, %v4062_v0  ;;  %v2112_v25 = vld [vmem:[%s6304_s0 + $0x3e] sm:$0xff] }
 0x19c   :  { %v3593_v10 = vpop.f32.mrf.mxu1  ;;  %v3657_v51 = vpop.f32.mrf.mxu0  ;;  %v2135_v5 = vpack.c.bf16 %v2112_v25, %v2111_v62 }
 0x19e   :  { %v945_v20 = vpop.f32.mrf.mxu1  ;;  %v1204_v58 = vpop.f32.mrf.mxu0 }
 0x19f   :  { %v1022_v31 = vadd.f32 %v945_v20, %v5090_v59  ;;  %v5389_v15 = vadd.f32 %v1204_v58, %v1020_v9  ;;  %v1849_v59 = vld [vmem:[%s6304_s0 + $0x5d] sm:$0xff] }
 0x1a0   :  { %v3594_v37 = vpop.f32.mrf.mxu1  ;;  %v3658_v6 = vpop.f32.mrf.mxu0  ;;  %v1870_v30 = vpack.c.bf16 %v1849_v59, %v1848_v19 }
 0x1a1   :  { %v2117_v6 = vld [vmem:[%s6304_s0 + $0x66] sm:$0xff] }
 0x1a2   :  { %v950_v46 = vpop.f32.mrf.mxu1  ;;  %v1209_v7 = vpop.f32.mrf.mxu0  ;;  %3860 = vmatmul.mubr.bf16.gmra.mxu1 %v1869_v60  ;;  %3924 = vmatmul.mubr.bf16.gmra.mxu0 %v2135_v5  ;;  %v1852_v5 = vld [vmem:[%s6304_s0 + $0x75] sm:$0xff] }
 0x1a3   :  { %v1023_v49 = vadd.f32 %v950_v46, %v5097_v38  ;;  %v5395_v24 = vadd.f32 %v1209_v7, %v1021_v43  ;;  %3863 = vmatprep.mubr.msk.bf16.mxu1 %vm4063_vm0, %v4062_v0  ;;  %3927 = vmatprep.mubr.msk.bf16.mxu0 %vm4063_vm0, %v4062_v0  ;;  %v2114_v38 = vld [vmem:[%s6304_s0 + $0x4e] sm:$0xff] }
 0x1a4   :  { %v3597_v63 = vpop.f32.mrf.mxu1  ;;  %v3661_v35 = vpop.f32.mrf.mxu0  ;;  %v2136_v36 = vpack.c.bf16 %v2114_v38, %v2113_v12 }
 0x1a6   :  { %v953_v14 = vpop.f32.mrf.mxu1  ;;  %v1212_v45 = vpop.f32.mrf.mxu0 }
 0x1a7   :  { %v1024_v17 = vadd.f32 %v953_v14, %v5114_v57  ;;  %v5411_v32 = vadd.f32 %v1212_v45, %v1022_v31  ;;  %v1851_v57 = vld [vmem:[%s6304_s0 + $0x6d] sm:$0xff] }
 0x1a8   :  { %v3598_v44 = vpop.f32.mrf.mxu1  ;;  %v3662_v47 = vpop.f32.mrf.mxu0  ;;  %v1871_v48 = vpack.c.bf16 %v1851_v57, %v1850_v40 }
 0x1a9   :  { %v2119_v47 = vld [vmem:[%s6304_s0 + $0x76] sm:$0xff] }
 0x1aa   :  { %v958_v29 = vpop.f32.mrf.mxu1  ;;  %v1217_v2 = vpop.f32.mrf.mxu0  ;;  %3864 = vmatmul.mubr.bf16.gmra.mxu1 %v1870_v30  ;;  %3928 = vmatmul.mubr.bf16.gmra.mxu0 %v2136_v36  ;;  %v1854_v36 = vld [vmem:[%s6304_s0 + $0x85] sm:$0xff] }
 0x1ab   :  { %v1025_v9 = vadd.f32 %v958_v29, %v5116_v1  ;;  %v5417_v16 = vadd.f32 %v1217_v2, %v1023_v49  ;;  %3867 = vmatprep.mubr.msk.bf16.mxu1 %vm4063_vm0, %v4062_v0  ;;  %3931 = vmatprep.mubr.msk.bf16.mxu0 %vm4063_vm0, %v4062_v0  ;;  %v2116_v1 = vld [vmem:[%s6304_s0 + $0x5e] sm:$0xff] }
 0x1ac   :  { %v3601_v33 = vpop.f32.mrf.mxu1  ;;  %v3665_v39 = vpop.f32.mrf.mxu0  ;;  %v2137_v62 = vpack.c.bf16 %v2116_v1, %v2115_v4 }
 0x1ae   :  { %v961_v3 = vpop.f32.mrf.mxu1  ;;  %v1220_v43 = vpop.f32.mrf.mxu0 }
 0x1af   :  { %v1026_v25 = vadd.f32 %v961_v3, %v5128_v26  ;;  %v5433_v10 = vadd.f32 %v1220_v43, %v1024_v17  ;;  %v1853_v26 = vld [vmem:[%s6304_s0 + $0x7d] sm:$0xff] }
 0x1b0   :  { %v3602_v51 = vpop.f32.mrf.mxu1  ;;  %v3666_v20 = vpop.f32.mrf.mxu0  ;;  %v1872_v59 = vpack.c.bf16 %v1853_v26, %v1852_v5 }
 0x1b1   :  { %v2121_v20 = vld [vmem:[%s6304_s0 + $0x86] sm:$0xff] }
 0x1b2   :  { %v966_v58 = vpop.f32.mrf.mxu1  ;;  %v1225_v60 = vpop.f32.mrf.mxu0  ;;  %3868 = vmatmul.mubr.bf16.gmra.mxu1 %v1871_v48  ;;  %3932 = vmatmul.mubr.bf16.gmra.mxu0 %v2137_v62  ;;  %v1856_v62 = vld [vmem:[%s6304_s0 + $0x95] sm:$0xff] }
 0x1b3   :  { %v1027_v31 = vadd.f32 %v966_v58, %v5131_v56  ;;  %v5439_v37 = vadd.f32 %v1225_v60, %v1025_v9  ;;  %3871 = vmatprep.mubr.msk.bf16.mxu1 %vm4063_vm0, %v4062_v0  ;;  %3935 = vmatprep.mubr.msk.bf16.mxu0 %vm4063_vm0, %v4062_v0  ;;  %v2118_v56 = vld [vmem:[%s6304_s0 + $0x6e] sm:$0xff] }
 0x1b4   :  { %v3605_v46 = vpop.f32.mrf.mxu1  ;;  %v3669_v7 = vpop.f32.mrf.mxu0  ;;  %v2138_v12 = vpack.c.bf16 %v2118_v56, %v2117_v6 }
 0x1b6   :  { %v969_v19 = vpop.f32.mrf.mxu1  ;;  %v1228_v49 = vpop.f32.mrf.mxu0 }
 0x1b7   :  { %v1028_v38 = vadd.f32 %v969_v19, %v5144_v11  ;;  %v5455_v63 = vadd.f32 %v1228_v49, %v1026_v25  ;;  %v1855_v11 = vld [vmem:[%s6304_s0 + $0x8d] sm:$0xff] }
 0x1b8   :  { %v3606_v35 = vpop.f32.mrf.mxu1  ;;  %v3670_v14 = vpop.f32.mrf.mxu0  ;;  %v1873_v57 = vpack.c.bf16 %v1855_v11, %v1854_v36 }
 0x1b9   :  { %v2123_v14 = vld [vmem:[%s6304_s0 + $0x96] sm:$0xff] }
 0x1ba   :  { %v974_v45 = vpop.f32.mrf.mxu1  ;;  %v1233_v30 = vpop.f32.mrf.mxu0  ;;  %3872 = vmatmul.mubr.bf16.gmra.mxu1 %v1872_v59  ;;  %3936 = vmatmul.mubr.bf16.gmra.mxu0 %v2138_v12  ;;  %v1858_v12 = vld [vmem:[%s6304_s0 + $0xa5] sm:$0xff] }
 0x1bb   :  { %v1029_v17 = vadd.f32 %v974_v45, %v5150_v61  ;;  %v5461_v44 = vadd.f32 %v1233_v30, %v1027_v31  ;;  %3875 = vmatprep.mubr.msk.bf16.mxu1 %vm4063_vm0, %v4062_v0  ;;  %3939 = vmatprep.mubr.msk.bf16.mxu0 %vm4063_vm0, %v4062_v0  ;;  %v2120_v61 = vld [vmem:[%s6304_s0 + $0x7e] sm:$0xff] }
 0x1bc   :  { %v3609_v29 = vpop.f32.mrf.mxu1  ;;  %v3673_v2 = vpop.f32.mrf.mxu0  ;;  %v2139_v4 = vpack.c.bf16 %v2120_v61, %v2119_v47 }
 0x1be   :  { %v977_v40 = vpop.f32.mrf.mxu1  ;;  %v1236_v9 = vpop.f32.mrf.mxu0 }
 0x1bf   :  { %v1030_v1 = vadd.f32 %v977_v40, %v5169_v23  ;;  %v5477_v33 = vadd.f32 %v1236_v9, %v1028_v38  ;;  %v1857_v23 = vld [vmem:[%s6304_s0 + $0x9d] sm:$0xff] }
 0x1c0   :  { %v3610_v39 = vpop.f32.mrf.mxu1  ;;  %v3674_v3 = vpop.f32.mrf.mxu0  ;;  %v1874_v26 = vpack.c.bf16 %v1857_v23, %v1856_v62 }
 0x1c1   :  { %v2125_v3 = vld [vmem:[%s6304_s0 + $0xa6] sm:$0xff] }
 0x1c2   :  { %v982_v43 = vpop.f32.mrf.mxu1  ;;  %v1241_v48 = vpop.f32.mrf.mxu0  ;;  %3876 = vmatmul.mubr.bf16.gmra.mxu1 %v1873_v57  ;;  %3940 = vmatmul.mubr.bf16.gmra.mxu0 %v2139_v4  ;;  %v1860_v4 = vld [vmem:[%s6304_s0 + $0xb5] sm:$0xff] }
 0x1c3   :  { %v1031_v25 = vadd.f32 %v982_v43, %v5178_v18  ;;  %v5483_v51 = vadd.f32 %v1241_v48, %v1029_v17  ;;  %3879 = vmatprep.mubr.msk.bf16.mxu1 %vm4063_vm0, %v4062_v0  ;;  %3943 = vmatprep.mubr.msk.bf16.mxu0 %vm4063_vm0, %v4062_v0  ;;  %v2122_v18 = vld [vmem:[%s6304_s0 + $0x8e] sm:$0xff] }
 0x1c4   :  { %v3613_v58 = vpop.f32.mrf.mxu1  ;;  %v3677_v60 = vpop.f32.mrf.mxu0  ;;  %v2140_v6 = vpack.c.bf16 %v2122_v18, %v2121_v20 }
 0x1c6   :  { %v985_v5 = vpop.f32.mrf.mxu1  ;;  %v1244_v31 = vpop.f32.mrf.mxu0 }
 0x1c7   :  { %v1032_v56 = vadd.f32 %v985_v5, %v5197_v52  ;;  %v5499_v46 = vadd.f32 %v1244_v31, %v1030_v1  ;;  %v1859_v52 = vld [vmem:[%s6304_s0 + $0xad] sm:$0xff] }
 0x1c8   :  { %v3614_v7 = vpop.f32.mrf.mxu1  ;;  %v3678_v19 = vpop.f32.mrf.mxu0  ;;  %v1875_v11 = vpack.c.bf16 %v1859_v52, %v1858_v12 }
 0x1c9   :  { %v2127_v19 = vld [vmem:[%s6304_s0 + $0xb6] sm:$0xff] }
 0x1ca   :  { %v990_v49 = vpop.f32.mrf.mxu1  ;;  %v1249_v59 = vpop.f32.mrf.mxu0  ;;  %3880 = vmatmul.mubr.bf16.gmra.mxu1 %v1874_v26  ;;  %3944 = vmatmul.mubr.bf16.gmra.mxu0 %v2140_v6  ;;  %v1862_v6 = vld [vmem:[%s6304_s0 + $0xc5] sm:$0xff] }
 0x1cb   :  { %v1033_v38 = vadd.f32 %v990_v49, %v5206_v34  ;;  %v5505_v35 = vadd.f32 %v1249_v59, %v1031_v25  ;;  %3883 = vmatprep.mubr.msk.bf16.mxu1 %vm4063_vm0, %v4062_v0  ;;  %3947 = vmatprep.mubr.msk.bf16.mxu0 %vm4063_vm0, %v4062_v0  ;;  %v2124_v34 = vld [vmem:[%s6304_s0 + $0x9e] sm:$0xff] }
 0x1cc   :  { %v3617_v45 = vpop.f32.mrf.mxu1  ;;  %v3681_v30 = vpop.f32.mrf.mxu0  ;;  %v2141_v47 = vpack.c.bf16 %v2124_v34, %v2123_v14 }
 0x1ce   :  { %v993_v36 = vpop.f32.mrf.mxu1  ;;  %v1252_v17 = vpop.f32.mrf.mxu0 }
 0x1cf   :  { %v1034_v61 = vadd.f32 %v993_v36, %v5225_v21  ;;  %v5521_v29 = vadd.f32 %v1252_v17, %v1032_v56  ;;  %v1861_v21 = vld [vmem:[%s6304_s0 + $0xbd] sm:$0xff] }
 0x1d0   :  { %v3618_v2 = vpop.f32.mrf.mxu1  ;;  %v3682_v40 = vpop.f32.mrf.mxu0  ;;  %v1876_v23 = vpack.c.bf16 %v1861_v21, %v1860_v4 }
 0x1d1   :  { %v2129_v40 = vld [vmem:[%s6304_s0 + $0xc6] sm:$0xff] }
 0x1d2   :  { %v998_v9 = vpop.f32.mrf.mxu1  ;;  %v1257_v57 = vpop.f32.mrf.mxu0  ;;  %3884 = vmatmul.mubr.bf16.gmra.mxu1 %v1875_v11  ;;  %3948 = vmatmul.mubr.bf16.gmra.mxu0 %v2141_v47  ;;  %v1864_v47 = vld [vmem:[%s6304_s0 + $0xd5] sm:$0xff] }
 0x1d3   :  { %v1035_v1 = vadd.f32 %v998_v9, %v5234_v27  ;;  %v5527_v39 = vadd.f32 %v1257_v57, %v1033_v38  ;;  %3887 = vmatprep.mubr.msk.bf16.mxu1 %vm4063_vm0, %v4062_v0  ;;  %3951 = vmatprep.mubr.msk.bf16.mxu0 %vm4063_vm0, %v4062_v0  ;;  %v2126_v27 = vld [vmem:[%s6304_s0 + $0xae] sm:$0xff] }
 0x1d4   :  { %v3621_v43 = vpop.f32.mrf.mxu1  ;;  %v3685_v48 = vpop.f32.mrf.mxu0  ;;  %v2142_v20 = vpack.c.bf16 %v2126_v27, %v2125_v3  ;;  %v2130_v9 = vld [vmem:[%s6304_s0 + $0xce] sm:$0xff] }
 0x1d5   :  { %v2144_v3 = vpack.c.bf16 %v2130_v9, %v2129_v40 }
 0x1d6   :  { %v1001_v62 = vpop.f32.mrf.mxu1  ;;  %v1260_v25 = vpop.f32.mrf.mxu0 }
 0x1d7   :  { %v1036_v18 = vadd.f32 %v1001_v62, %v5253_v41  ;;  %v5543_v58 = vadd.f32 %v1260_v25, %v1034_v61  ;;  %v1863_v41 = vld [vmem:[%s6304_s0 + $0xcd] sm:$0xff] }
 0x1d8   :  { %v3622_v60 = vpop.f32.mrf.mxu1  ;;  %v3686_v5 = vpop.f32.mrf.mxu0  ;;  %v1877_v52 = vpack.c.bf16 %v1863_v41, %v1862_v6 }
 0x1d9   :  { %v2131_v60 = vld [vmem:[%s6304_s0 + $0xd6] sm:$0xff] }
 0x1da   :  { %v1006_v31 = vpop.f32.mrf.mxu1  ;;  %v1265_v26 = vpop.f32.mrf.mxu0  ;;  %3888 = vmatmul.mubr.bf16.gmra.mxu1 %v1876_v23  ;;  %3952 = vmatmul.mubr.bf16.gmra.mxu0 %v2142_v20 }
 0x1db   :  { %v1037_v56 = vadd.f32 %v1006_v31, %v5262_v53  ;;  %v5549_v7 = vadd.f32 %v1265_v26, %v1035_v1  ;;  %3891 = vmatprep.mubr.msk.bf16.mxu1 %vm4063_vm0, %v4062_v0  ;;  %3955 = vmatprep.mubr.msk.bf16.mxu0 %vm4063_vm0, %v4062_v0  ;;  %v2128_v53 = vld [vmem:[%s6304_s0 + $0xbe] sm:$0xff] }
 0x1dc   :  { %v3625_v49 = vpop.f32.mrf.mxu1  ;;  %v3689_v59 = vpop.f32.mrf.mxu0  ;;  %v2143_v14 = vpack.c.bf16 %v2128_v53, %v2127_v19 }
 0x1de   :  { %v1009_v12 = vpop.f32.mrf.mxu1  ;;  %v1268_v38 = vpop.f32.mrf.mxu0 }
 0x1df   :  { %v1038_v34 = vadd.f32 %v1009_v12, %v5282_v8  ;;  %v5565_v45 = vadd.f32 %v1268_v38, %v1036_v18  ;;  %v1865_v8 = vld [vmem:[%s6304_s0 + $0xdd] sm:$0xff] }
 0x1e0   :  { %v3626_v30 = vpop.f32.mrf.mxu1  ;;  %v3690_v36 = vpop.f32.mrf.mxu0  ;;  %v1878_v21 = vpack.c.bf16 %v1865_v8, %v1864_v47 }
 0x1e2   :  { %v1273_v17 = vpop.f32.mrf.mxu0  ;;  %v1444_v11 = vpop.f32.mrf.mxu1  ;;  %3892 = vmatmul.mubr.bf16.gmra.mxu1 %v1877_v52  ;;  %3956 = vmatmul.mubr.bf16.gmra.mxu0 %v2143_v14 }
 0x1e3   :  { %v5570_v61 = vadd.f32 %v1273_v17, %v1037_v56  ;;  %v1547_v2 = vadd.f32 %v1444_v11, %v5292_v28  ;;  %3895 = vmatprep.mubr.msk.bf16.mxu1 %vm4063_vm0, %v4062_v0  ;;  %3959 = vmatprep.mubr.msk.bf16.mxu0 %vm4063_vm0, %v4062_v0 }
 0x1e4   :  { %v3693_v57 = vpop.f32.mrf.mxu0  ;;  %v3713_v28 = vpop.f32.mrf.mxu1 }
 0x1e6   :  { %v1276_v4 = vpop.f32.mrf.mxu0  ;;  %v1447_v1 = vpop.f32.mrf.mxu1 }
 0x1e7   :  { %v5586_v27 = vadd.f32 %v1276_v4, %v1038_v34  ;;  %v1548_v43 = vadd.f32 %v1447_v1, %v5314_v50  ;;  %v2132_v50 = vld [vmem:[%s6304_s0 + $0xde] sm:$0xff] }
 0x1e8   :  { %v3694_v48 = vpop.f32.mrf.mxu0  ;;  %v3714_v62 = vpop.f32.mrf.mxu1  ;;  %v2145_v56 = vpack.c.bf16 %v2132_v50, %v2131_v60 }
 0x1ea   :  { %v1452_v25 = vpop.f32.mrf.mxu1  ;;  %v1711_v23 = vpop.f32.mrf.mxu0  ;;  %3896 = vmatmul.mubr.bf16.gmra.mxu1 %v1878_v21  ;;  %3960 = vmatmul.mubr.bf16.gmra.mxu0 %v2144_v3 }
 0x1eb   :  { %v1549_v20 = vadd.f32 %v1452_v25, %v5326_v42  ;;  %v5590_v18 = vadd.f32 %v1711_v23, %v1547_v2  ;;  %3963 = vmatprep.mubr.msk.bf16.mxu0 %vm4063_vm0, %v4062_v0 }
 0x1ec   :  { %v3717_v5 = vpop.f32.mrf.mxu1  ;;  %v3781_v31 = vpop.f32.mrf.mxu0 }
 0x1ee   :  { %v1455_v26 = vpop.f32.mrf.mxu1  ;;  %v1714_v6 = vpop.f32.mrf.mxu0 }
 0x1ef   :  { %v1550_v42 = vadd.f32 %v1455_v26, %v5345_v22  ;;  %v5601_v41 = vadd.f32 %v1714_v6, %v1548_v43 }
 0x1f0   :  { %v3718_v19 = vpop.f32.mrf.mxu1  ;;  %v3782_v53 = vpop.f32.mrf.mxu0 }
 0x1f2   :  { %v1460_v0 = vpop.f32.mrf.mxu1  ;;  %v1719_v49 = vpop.f32.mrf.mxu0  ;;  %3964 = vmatmul.mubr.bf16.gmra.mxu0 %v2145_v56 }
 0x1f3   :  { %v1551_v59 = vadd.f32 %v1460_v0, %v5351_v55  ;;  %v5604_v12 = vadd.f32 %v1719_v49, %v1549_v20 }
 0x1f4   :  { %v3721_v38 = vpop.f32.mrf.mxu1  ;;  %v3785_v52 = vpop.f32.mrf.mxu0 }
 0x1f6   :  { %v1463_v14 = vpop.f32.mrf.mxu1  ;;  %v1722_v34 = vpop.f32.mrf.mxu0 }
 0x1f7   :  { %v1552_v30 = vadd.f32 %v1463_v14, %v5367_v54  ;;  %v5607_v36 = vadd.f32 %v1722_v34, %v1550_v42 }
 0x1f8   :  { %v3722_v22 = vpop.f32.mrf.mxu1  ;;  %v3786_v17 = vpop.f32.mrf.mxu0 }
 0x1fa   :  { %v1468_v11 = vpop.f32.mrf.mxu1  ;;  %v1727_v47 = vpop.f32.mrf.mxu0 }
 0x1fb   :  { %v1553_v2 = vadd.f32 %v1468_v11, %v5373_v13  ;;  %v5610_v8 = vadd.f32 %v1727_v47, %v1551_v59 }
 0x1fc   :  { %v3725_v40 = vpop.f32.mrf.mxu1  ;;  %v3789_v55 = vpop.f32.mrf.mxu0 }
 0x1fe   :  { %v1471_v9 = vpop.f32.mrf.mxu1  ;;  %v1730_v57 = vpop.f32.mrf.mxu0 }
 0x1ff   :  { %v1554_v28 = vadd.f32 %v1471_v9, %v5389_v15  ;;  %v5613_v4 = vadd.f32 %v1730_v57, %v1552_v30 }
 0x200   :  { %v3726_v1 = vpop.f32.mrf.mxu1  ;;  %v3790_v54 = vpop.f32.mrf.mxu0 }
 0x202   :  { %v1476_v21 = vpop.f32.mrf.mxu1  ;;  %v1735_v3 = vpop.f32.mrf.mxu0 }
 0x203   :  { %v1555_v43 = vadd.f32 %v1476_v21, %v5395_v24  ;;  %v5616_v48 = vadd.f32 %v1735_v3, %v1553_v2 }
 0x204   :  { %v3729_v62 = vpop.f32.mrf.mxu1  ;;  %v3793_v13 = vpop.f32.mrf.mxu0 }
 0x206   :  { %v1479_v25 = vpop.f32.mrf.mxu1  ;;  %v1738_v23 = vpop.f32.mrf.mxu0 }
 0x207   :  { %v1556_v20 = vadd.f32 %v1479_v25, %v5411_v32  ;;  %v5619_v60 = vadd.f32 %v1738_v23, %v1554_v28 }
 0x208   :  { %v3730_v50 = vpop.f32.mrf.mxu1  ;;  %v3794_v15 = vpop.f32.mrf.mxu0 }
 0x20a   :  { %v1484_v5 = vpop.f32.mrf.mxu1  ;;  %v1743_v31 = vpop.f32.mrf.mxu0 }
 0x20b   :  { %v1557_v26 = vadd.f32 %v1484_v5, %v5417_v16  ;;  %v5622_v6 = vadd.f32 %v1743_v31, %v1555_v43 }
 0x20c   :  { %v3733_v56 = vpop.f32.mrf.mxu1  ;;  %v3797_v24 = vpop.f32.mrf.mxu0 }
 0x20e   :  { %v1487_v42 = vpop.f32.mrf.mxu1  ;;  %v1746_v19 = vpop.f32.mrf.mxu0 }
 0x20f   :  { %v1558_v53 = vadd.f32 %v1487_v42, %v5433_v10  ;;  %v5625_v0 = vadd.f32 %v1746_v19, %v1556_v20 }
 0x210   :  { %v3734_v49 = vpop.f32.mrf.mxu1  ;;  %v3798_v32 = vpop.f32.mrf.mxu0 }
 0x212   :  { %v1492_v59 = vpop.f32.mrf.mxu1  ;;  %v1751_v38 = vpop.f32.mrf.mxu0 }
 0x213   :  { %v1559_v52 = vadd.f32 %v1492_v59, %v5439_v37  ;;  %v5628_v14 = vadd.f32 %v1751_v38, %v1557_v26 }
 0x214   :  { %v3737_v34 = vpop.f32.mrf.mxu1  ;;  %v3801_v16 = vpop.f32.mrf.mxu0 }
 0x216   :  { %v1495_v30 = vpop.f32.mrf.mxu1  ;;  %v1754_v22 = vpop.f32.mrf.mxu0 }
 0x217   :  { %v1560_v17 = vadd.f32 %v1495_v30, %v5455_v63  ;;  %v5631_v11 = vadd.f32 %v1754_v22, %v1558_v53 }
 0x218   :  { %v3738_v47 = vpop.f32.mrf.mxu1  ;;  %v3802_v10 = vpop.f32.mrf.mxu0 }
 0x21a   :  { %v1500_v2 = vpop.f32.mrf.mxu1  ;;  %v1759_v40 = vpop.f32.mrf.mxu0 }
 0x21b   :  { %v1561_v55 = vadd.f32 %v1500_v2, %v5461_v44  ;;  %v5634_v9 = vadd.f32 %v1759_v40, %v1559_v52 }
 0x21c   :  { %v3741_v57 = vpop.f32.mrf.mxu1  ;;  %v3805_v37 = vpop.f32.mrf.mxu0 }
 0x21e   :  { %v1503_v28 = vpop.f32.mrf.mxu1  ;;  %v1762_v1 = vpop.f32.mrf.mxu0 }
 0x21f   :  { %v1562_v54 = vadd.f32 %v1503_v28, %v5477_v33  ;;  %v5637_v21 = vadd.f32 %v1762_v1, %v1560_v17 }
 0x220   :  { %v3742_v3 = vpop.f32.mrf.mxu1  ;;  %v3806_v63 = vpop.f32.mrf.mxu0 }
 0x222   :  { %v1508_v43 = vpop.f32.mrf.mxu1  ;;  %v1767_v62 = vpop.f32.mrf.mxu0 }
 0x223   :  { %v1563_v13 = vadd.f32 %v1508_v43, %v5483_v51  ;;  %v5640_v25 = vadd.f32 %v1767_v62, %v1561_v55 }
 0x224   :  { %v3745_v23 = vpop.f32.mrf.mxu1  ;;  %v3809_v44 = vpop.f32.mrf.mxu0 }
 0x226   :  { %v1511_v20 = vpop.f32.mrf.mxu1  ;;  %v1770_v50 = vpop.f32.mrf.mxu0 }
 0x227   :  { %v1564_v15 = vadd.f32 %v1511_v20, %v5499_v46  ;;  %v5643_v5 = vadd.f32 %v1770_v50, %v1562_v54 }
 0x228   :  { %v3746_v31 = vpop.f32.mrf.mxu1  ;;  %v3810_v33 = vpop.f32.mrf.mxu0 }
 0x22a   :  { %v1516_v26 = vpop.f32.mrf.mxu1  ;;  %v1775_v56 = vpop.f32.mrf.mxu0 }
 0x22b   :  { %v1565_v24 = vadd.f32 %v1516_v26, %v5505_v35  ;;  %v5646_v42 = vadd.f32 %v1775_v56, %v1563_v13 }
 0x22c   :  { %v3749_v19 = vpop.f32.mrf.mxu1  ;;  %v3813_v51 = vpop.f32.mrf.mxu0 }
 0x22e   :  { %v1519_v53 = vpop.f32.mrf.mxu1  ;;  %v1778_v49 = vpop.f32.mrf.mxu0 }
 0x22f   :  { %v1566_v32 = vadd.f32 %v1519_v53, %v5521_v29  ;;  %v5649_v59 = vadd.f32 %v1778_v49, %v1564_v15 }
 0x230   :  { %v3750_v38 = vpop.f32.mrf.mxu1  ;;  %v3814_v46 = vpop.f32.mrf.mxu0 }
 0x232   :  { %v1524_v52 = vpop.f32.mrf.mxu1  ;;  %v1783_v34 = vpop.f32.mrf.mxu0 }
 0x233   :  { %v1567_v16 = vadd.f32 %v1524_v52, %v5527_v39  ;;  %v5652_v30 = vadd.f32 %v1783_v34, %v1565_v24 }
 0x234   :  { %v3753_v22 = vpop.f32.mrf.mxu1  ;;  %v3817_v35 = vpop.f32.mrf.mxu0 }
 0x236   :  { %v1527_v17 = vpop.f32.mrf.mxu1  ;;  %v1786_v47 = vpop.f32.mrf.mxu0 }
 0x237   :  { %v1568_v10 = vadd.f32 %v1527_v17, %v5543_v58  ;;  %v5655_v2 = vadd.f32 %v1786_v47, %v1566_v32 }
 0x238   :  { %v3754_v40 = vpop.f32.mrf.mxu1  ;;  %v3818_v29 = vpop.f32.mrf.mxu0 }
 0x23a   :  { %v1532_v55 = vpop.f32.mrf.mxu1  ;;  %v1791_v57 = vpop.f32.mrf.mxu0 }
 0x23b   :  { %v1569_v37 = vadd.f32 %v1532_v55, %v5549_v7  ;;  %v5658_v28 = vadd.f32 %v1791_v57, %v1567_v16 }
 0x23c   :  { %v3757_v1 = vpop.f32.mrf.mxu1  ;;  %v3821_v39 = vpop.f32.mrf.mxu0 }
 0x23e   :  { %v1535_v54 = vpop.f32.mrf.mxu1  ;;  %v1794_v3 = vpop.f32.mrf.mxu0 }
 0x23f   :  { %v1570_v63 = vadd.f32 %v1535_v54, %v5565_v45  ;;  %v5661_v43 = vadd.f32 %v1794_v3, %v1568_v10 }
 0x240   :  { %v3758_v62 = vpop.f32.mrf.mxu1  ;;  %v3822_v58 = vpop.f32.mrf.mxu0 }
 0x242   :  { %v1540_v13 = vpop.f32.mrf.mxu1  ;;  %v1799_v23 = vpop.f32.mrf.mxu0 }
 0x243   :  { %v1571_v44 = vadd.f32 %v1540_v13, %v5570_v61  ;;  %v5664_v20 = vadd.f32 %v1799_v23, %v1569_v37 }
 0x244   :  { %v3761_v50 = vpop.f32.mrf.mxu1  ;;  %v3825_v7 = vpop.f32.mrf.mxu0 }
 0x245   :  { %v5687_v7 = vpop.permute.xlu0 %2402 }
 0x246   :  { %v1543_v15 = vpop.f32.mrf.mxu1  ;;  %v1802_v31 = vpop.f32.mrf.mxu0 }
 0x247   :  { %v1572_v33 = vadd.f32 %v1543_v15, %v5586_v27  ;;  %v5667_v26 = vadd.f32 %v1802_v31, %v1570_v63 }
 0x248   :  { %v3762_v56 = vpop.f32.mrf.mxu1  ;;  %v3826_v45 = vpop.f32.mrf.mxu0 }
 0x249   :  { %v5692_v56 = vpop.permute.xlu1 %2412 }
 0x24a   :  { %v1807_v24 = vpop.f32.mrf.mxu0  ;;  %v1978_v19 = vpop.f32.mrf.mxu1 }
 0x24b   :  { %v5669_v51 = vadd.f32 %v1807_v24, %v1571_v44  ;;  %v2081_v53 = vadd.f32 %v1978_v19, %v5590_v18 }
 0x24c   :  { %v3829_v49 = vpop.f32.mrf.mxu0  ;;  %v3849_v61 = vpop.f32.mrf.mxu1 }
 0x24d   :  { %v5697_v61 = vpop.permute.xlu0 %2407 }
 0x24e   :  { %v1810_v32 = vpop.f32.mrf.mxu0  ;;  %v1981_v38 = vpop.f32.mrf.mxu1 }
 0x24f   :  { %v5672_v46 = vadd.f32 %v1810_v32, %v1572_v33  ;;  %v2082_v52 = vadd.f32 %v1981_v38, %v5601_v41 }
 0x250   :  { %v3830_v34 = vpop.f32.mrf.mxu0  ;;  %v3850_v27 = vpop.f32.mrf.mxu1 }
 0x252   :  { %v1986_v16 = vpop.f32.mrf.mxu1  ;;  %v2245_v22 = vpop.f32.mrf.mxu0 }
 0x253   :  { %v2083_v35 = vadd.f32 %v1986_v16, %v5604_v12  ;;  %v5676_v17 = vadd.f32 %v2245_v22, %v2081_v53 }
 0x254   :  { %v3853_v47 = vpop.f32.mrf.mxu1  ;;  %v3917_v10 = vpop.f32.mrf.mxu0 }
 0x255   :  { %v5704_v47 = vpop.permute.xlu0 %2422 }
 0x256   :  { %v1989_v40 = vpop.f32.mrf.mxu1  ;;  %v2248_v18 = vpop.f32.mrf.mxu0 }
 0x257   :  { %v2084_v29 = vadd.f32 %v1989_v40, %v5607_v36  ;;  %v5679_v55 = vadd.f32 %v2248_v18, %v2082_v52  ;;  %v5699_v52 = vpop.permute.xlu1 %2417 }
 0x258   :  { %v3854_v57 = vpop.f32.mrf.mxu1  ;;  %v3918_v37 = vpop.f32.mrf.mxu0 }
 0x25a   :  { %v1994_v1 = vpop.f32.mrf.mxu1  ;;  %v2253_v41 = vpop.f32.mrf.mxu0 }
 0x25b   :  { %v2085_v39 = vadd.f32 %v1994_v1, %v5610_v8  ;;  %v5682_v54 = vadd.f32 %v2253_v41, %v2083_v35  ;;  %v5707_v18 = vpop.permute.xlu1 %2427  ;;  %v5711_v41 = vpop.permute.xlu0 %2432 }
 0x25c   :  { %v3857_v3 = vpop.f32.mrf.mxu1  ;;  %v3921_v12 = vpop.f32.mrf.mxu0 }
 0x25d   :  { %v2530_v12 = vmul.f32 %v5687_v7, %v5676_v17 }
 0x25e   :  { %v1997_v63 = vpop.f32.mrf.mxu1  ;;  %v2256_v62 = vpop.f32.mrf.mxu0 }
 0x25f   :  { %v2086_v58 = vadd.f32 %v1997_v63, %v5613_v4  ;;  %v5685_v13 = vadd.f32 %v2256_v62, %v2084_v29  ;;  %v5717_v63 = vpop.permute.xlu1 %2437 }
 0x260   :  { %v3858_v23 = vpop.f32.mrf.mxu1  ;;  %v3922_v36 = vpop.f32.mrf.mxu0 }
 0x261   :  { %v2533_v36 = vmul.f32 %v5699_v52, %v5685_v13 }
 0x262   :  { %v2002_v44 = vpop.f32.mrf.mxu1  ;;  %v2261_v50 = vpop.f32.mrf.mxu0 }
 0x263   :  { %v2087_v15 = vadd.f32 %v2002_v44, %v5616_v48  ;;  %v5690_v31 = vadd.f32 %v2261_v50, %v2085_v39 }
 0x264   :  { %v3861_v8 = vpop.f32.mrf.mxu1  ;;  %v3925_v33 = vpop.f32.mrf.mxu0 }
 0x265   :  { %v2534_v8 = vmul.f32 %v5704_v47, %v5690_v31  ;;  %v5723_v33 = vpop.permute.xlu0 %2442 }
 0x266   :  { %v2005_v45 = vpop.f32.mrf.mxu1  ;;  %v2264_v24 = vpop.f32.mrf.mxu0 }
 0x267   :  { %v2088_v4 = vadd.f32 %v2005_v45, %v5619_v60  ;;  %v5695_v19 = vadd.f32 %v2264_v24, %v2086_v58 }
 0x268   :  { %v3862_v53 = vpop.f32.mrf.mxu1  ;;  %v3926_v49 = vpop.f32.mrf.mxu0 }
 0x269   :  { %v2535_v49 = vmul.f32 %v5707_v18, %v5695_v19 }
 0x26a   :  { %v2010_v32 = vpop.f32.mrf.mxu1  ;;  %v2269_v38 = vpop.f32.mrf.mxu0 }
 0x26b   :  { %v2089_v48 = vadd.f32 %v2010_v32, %v5622_v6  ;;  %v5702_v34 = vadd.f32 %v2269_v38, %v2087_v15  ;;  %v2531_v6 = vmul.f32 %v5697_v61, %v5679_v55  ;;  %v5727_v32 = vpop.permute.xlu1 %2447 }
 0x26c   :  { %v3865_v27 = vpop.f32.mrf.mxu1  ;;  %v3929_v16 = vpop.f32.mrf.mxu0 }
 0x26d   :  { %v2556_v23 = vadd.f32 %v2531_v6, %v2530_v12  ;;  %v5735_v12 = vpop.permute.xlu0 %2452 }
 0x26e   :  { %v2013_v22 = vpop.f32.mrf.mxu1  ;;  %v2272_v35 = vpop.f32.mrf.mxu0 }
 0x26f   :  { %v2090_v60 = vadd.f32 %v2013_v22, %v5625_v0  ;;  %v2532_v0 = vmul.f32 %v5692_v56, %v5682_v54  ;;  %v5729_v38 = vadd.f32 %v2272_v35, %v2088_v4 }
 0x270   :  { %v3866_v10 = vpop.f32.mrf.mxu1  ;;  %v3930_v40 = vpop.f32.mrf.mxu0 }
 0x271   :  { %v2557_v15 = vadd.f32 %v2556_v23, %v2532_v0  ;;  %v2536_v10 = vmul.f32 %v5711_v41, %v5702_v34  ;;  %v2537_v0 = vmul.f32 %v5717_v63, %v5729_v38 }
 0x272   :  { %v2018_v29 = vpop.f32.mrf.mxu1  ;;  %v2277_v57 = vpop.f32.mrf.mxu0 }
 0x273   :  { %v2558_v53 = vadd.f32 %v2557_v15, %v2533_v36  ;;  %v5733_v40 = vadd.f32 %v2277_v57, %v2089_v48  ;;  %v5742_v36 = vpop.permute.xlu1 %2457 }
 0x274   :  { %v3869_v37 = vpop.f32.mrf.mxu1  ;;  %v3933_v1 = vpop.f32.mrf.mxu0 }
 0x275   :  { %v2559_v22 = vadd.f32 %v2558_v53, %v2534_v8  ;;  %v2538_v48 = vmul.f32 %v5723_v33, %v5733_v40 }
 0x276   :  { %v2021_v39 = vpop.f32.mrf.mxu1  ;;  %v2280_v3 = vpop.f32.mrf.mxu0 }
 0x277   :  { %v2560_v6 = vadd.f32 %v2559_v22, %v2535_v49  ;;  %v5740_v4 = vadd.f32 %v2280_v3, %v2090_v60  ;;  %v2092_v57 = vadd.f32 %v2021_v39, %v5631_v11  ;;  %v5754_v49 = vpop.permute.xlu0 %2462 }
 0x278   :  { %v3870_v62 = vpop.f32.mrf.mxu1  ;;  %v3934_v58 = vpop.f32.mrf.mxu0 }
 0x279   :  { %v2091_v62 = vadd.f32 %v2018_v29, %v5628_v14  ;;  %v2561_v23 = vadd.f32 %v2560_v6, %v2536_v10  ;;  %v2539_v14 = vmul.f32 %v5727_v32, %v5740_v4 }
 0x27a   :  { %v2026_v44 = vpop.f32.mrf.mxu1  ;;  %v2285_v50 = vpop.f32.mrf.mxu0 }
 0x27b   :  { %v5747_v15 = vadd.f32 %v2285_v50, %v2091_v62  ;;  %v2093_v60 = vadd.f32 %v2026_v44, %v5634_v9 }
 0x27c   :  { %v3873_v45 = vpop.f32.mrf.mxu1  ;;  %v3937_v24 = vpop.f32.mrf.mxu0 }
 0x27d   :  { %v2562_v24 = vadd.f32 %v2561_v23, %v2537_v0  ;;  %v2540_v11 = vmul.f32 %v5735_v12, %v5747_v15 }
 0x27e   :  { %v2029_v27 = vpop.f32.mrf.mxu1  ;;  %v2288_v16 = vpop.f32.mrf.mxu0 }
 0x27f   :  { %v5752_v29 = vadd.f32 %v2288_v16, %v2092_v57  ;;  %v2563_v22 = vadd.f32 %v2562_v24, %v2538_v48  ;;  %v2094_v39 = vadd.f32 %v2029_v27, %v5637_v21  ;;  %v5772_v57 = vpop.permute.xlu0 %2472 }
 0x280   :  { %v3874_v37 = vpop.f32.mrf.mxu1  ;;  %v3938_v1 = vpop.f32.mrf.mxu0 }
 0x281   :  { %v5761_v1 = vpop.permute.xlu1 %2467  ;;  %v2564_v6 = vadd.f32 %v2563_v22, %v2539_v14  ;;  %v2541_v9 = vmul.f32 %v5742_v36, %v5752_v29 }
 0x282   :  { %v2034_v35 = vpop.f32.mrf.mxu1  ;;  %v2293_v58 = vpop.f32.mrf.mxu0 }
 0x283   :  { %v5759_v50 = vadd.f32 %v2293_v58, %v2093_v60  ;;  %v2095_v44 = vadd.f32 %v2034_v35, %v5640_v25  ;;  %v2565_v23 = vadd.f32 %v2564_v6, %v2540_v11 }
 0x284   :  { %v3877_v8 = vpop.f32.mrf.mxu1  ;;  %v3941_v45 = vpop.f32.mrf.mxu0 }
 0x285   :  { %v2542_v21 = vmul.f32 %v5754_v49, %v5759_v50  ;;  %v2566_v8 = vadd.f32 %v2565_v23, %v2541_v9  ;;  %v5777_v14 = vpop.permute.xlu1 %2477  ;;  %v5786_v9 = vpop.permute.xlu0 %2482 }
 0x286   :  { %v2037_v3 = vpop.f32.mrf.mxu1  ;;  %v2296_v53 = vpop.f32.mrf.mxu0  ;;  %6319 = vst [vmem:[#allocation2_spill] sm:$0xff] %v5777_v14  ;;  %6320 = vst [vmem:[#allocation3_spill] sm:$0xff] %v5786_v9 }
 0x287   :  { %v5766_v16 = vadd.f32 %v2296_v53, %v2094_v39  ;;  %v2096_v45 = vadd.f32 %v2037_v3, %v5643_v5  ;;  %v2567_v60 = vadd.f32 %v2566_v8, %v2542_v21 }
 0x288   :  { %v3878_v10 = vpop.f32.mrf.mxu1  ;;  %v3942_v37 = vpop.f32.mrf.mxu0 }
 0x289   :  { %v2543_v25 = vmul.f32 %v5761_v1, %v5766_v16 }
 0x28a   :  { %v2042_v0 = vpop.f32.mrf.mxu1  ;;  %v2301_v62 = vpop.f32.mrf.mxu0 }
 0x28b   :  { %v5770_v27 = vadd.f32 %v2301_v62, %v2095_v44  ;;  %v2568_v10 = vadd.f32 %v2567_v60, %v2543_v25  ;;  %v2097_v37 = vadd.f32 %v2042_v0, %v5646_v42  ;;  %v5793_v0 = vpop.permute.xlu1 %2487 }
 0x28c   :  { %v3881_v58 = vpop.f32.mrf.mxu1  ;;  %v3945_v48 = vpop.f32.mrf.mxu0  ;;  %6321 = vst [vmem:[#allocation4_spill] sm:$0xff] %v5793_v0 }
 0x28d   :  { %v2544_v53 = vmul.f32 %v5772_v57, %v5770_v27 }
 0x28e   :  { %v2045_v35 = vpop.f32.mrf.mxu1  ;;  %v2304_v24 = vpop.f32.mrf.mxu0 }
 0x28f   :  { %v5781_v22 = vadd.f32 %v2304_v24, %v2096_v45  ;;  %v2569_v44 = vadd.f32 %v2568_v10, %v2544_v53  ;;  %v2098_v58 = vadd.f32 %v2045_v35, %v5649_v59  ;;  %v5800_v35 = vpop.permute.xlu0 %2492 }
 0x290   :  { %v3882_v11 = vpop.f32.mrf.mxu1  ;;  %v3946_v39 = vpop.f32.mrf.mxu0  ;;  %6322 = vst [vmem:[#allocation5_spill] sm:$0xff] %v5800_v35 }
 0x291   :  { %v2545_v5 = vmul.f32 %v5777_v14, %v5781_v22 }
 0x292   :  { %v2050_v3 = vpop.f32.mrf.mxu1  ;;  %v2309_v6 = vpop.f32.mrf.mxu0 }
 0x293   :  { %v5788_v62 = vadd.f32 %v2309_v6, %v2097_v37  ;;  %v2570_v48 = vadd.f32 %v2569_v44, %v2545_v5  ;;  %v2099_v53 = vadd.f32 %v2050_v3, %v5652_v30  ;;  %v5807_v30 = vpop.permute.xlu1 %2497 }
 0x294   :  { %v3885_v23 = vpop.f32.mrf.mxu1  ;;  %v3949_v21 = vpop.f32.mrf.mxu0  ;;  %6323 = vst [vmem:[#allocation6_spill] sm:$0xff] %v5807_v30 }
 0x295   :  { %v2546_v8 = vmul.f32 %v5786_v9, %v5788_v62 }
 0x296   :  { %v2053_v45 = vpop.f32.mrf.mxu1  ;;  %v2312_v42 = vpop.f32.mrf.mxu0 }
 0x297   :  { %v2571_v25 = vadd.f32 %v2570_v48, %v2546_v8  ;;  %v5795_v24 = vadd.f32 %v2312_v42, %v2098_v58  ;;  %v2100_v23 = vadd.f32 %v2053_v45, %v5655_v2  ;;  %v5814_v2 = vpop.permute.xlu0 %2502 }
 0x298   :  { %v3886_v60 = vpop.f32.mrf.mxu1  ;;  %v3950_v11 = vpop.f32.mrf.mxu0  ;;  %6324 = vst [vmem:[#allocation7_spill] sm:$0xff] %v5814_v2 }
 0x299   :  { %v2547_v39 = vmul.f32 %v5793_v0, %v5795_v24 }
 0x29a   :  { %v2058_v10 = vpop.f32.mrf.mxu1  ;;  %v2317_v59 = vpop.f32.mrf.mxu0 }
 0x29b   :  { %v2572_v37 = vadd.f32 %v2571_v25, %v2547_v39  ;;  %v5802_v5 = vadd.f32 %v2317_v59, %v2099_v53  ;;  %v2101_v25 = vadd.f32 %v2058_v10, %v5658_v28  ;;  %v5821_v28 = vpop.permute.xlu1 %2507 }
 0x29c   :  { %v3889_v6 = vpop.f32.mrf.mxu1  ;;  %v3953_v44 = vpop.f32.mrf.mxu0  ;;  %6325 = vst [vmem:[#allocation8_spill] sm:$0xff] %v5821_v28 }
 0x29d   :  { %v2548_v21 = vmul.f32 %v5800_v35, %v5802_v5 }
 0x29e   :  { %v2061_v58 = vpop.f32.mrf.mxu1  ;;  %v2320_v48 = vpop.f32.mrf.mxu0 }
 0x29f   :  { %v2573_v3 = vadd.f32 %v2572_v37, %v2548_v21  ;;  %v5809_v8 = vadd.f32 %v2320_v48, %v2100_v23  ;;  %v2102_v37 = vadd.f32 %v2061_v58, %v5661_v43  ;;  %v5828_v43 = vpop.permute.xlu0 %2512 }
 0x2a0   :  { %v3890_v42 = vpop.f32.mrf.mxu1  ;;  %v3954_v60 = vpop.f32.mrf.mxu0  ;;  %6326 = vst [vmem:[#allocation9_spill] sm:$0xff] %v5828_v43 }
 0x2a1   :  { %v2549_v11 = vmul.f32 %v5807_v30, %v5809_v8 }
 0x2a2   :  { %v2066_v53 = vpop.f32.mrf.mxu1  ;;  %v2325_v39 = vpop.f32.mrf.mxu0 }
 0x2a3   :  { %v2574_v45 = vadd.f32 %v2573_v3, %v2549_v11  ;;  %v5816_v59 = vadd.f32 %v2325_v39, %v2101_v25  ;;  %v2103_v3 = vadd.f32 %v2066_v53, %v5664_v20  ;;  %v5835_v20 = vpop.permute.xlu1 %2517 }
 0x2a4   :  { %v3893_v6 = vpop.f32.mrf.mxu1  ;;  %v3957_v44 = vpop.f32.mrf.mxu0  ;;  %6327 = vst [vmem:[#allocation10_spill] sm:$0xff] %v5835_v20 }
 0x2a5   :  { %v2550_v23 = vmul.f32 %v5814_v2, %v5816_v59 }
 0x2a6   :  { %v2069_v21 = vpop.f32.mrf.mxu1  ;;  %v2328_v48 = vpop.f32.mrf.mxu0 }
 0x2a7   :  { %v2575_v10 = vadd.f32 %v2574_v45, %v2550_v23  ;;  %v5823_v42 = vadd.f32 %v2328_v48, %v2102_v37  ;;  %v2104_v45 = vadd.f32 %v2069_v21, %v5667_v26  ;;  %v2523_v21 = vpop.permute.xlu0 %2522 }
 0x2a8   :  { %v3894_v60 = vpop.f32.mrf.mxu1  ;;  %v3958_v30 = vpop.f32.mrf.mxu0 }
 0x2a9   :  { %v2551_v25 = vmul.f32 %v5821_v28, %v5823_v42 }
 0x2aa   :  { %v2074_v11 = vpop.f32.mrf.mxu1  ;;  %v2333_v39 = vpop.f32.mrf.mxu0 }
 0x2ab   :  { %v2576_v58 = vadd.f32 %v2575_v10, %v2551_v25  ;;  %v5830_v6 = vadd.f32 %v2333_v39, %v2103_v3  ;;  %v2105_v10 = vadd.f32 %v2074_v11, %v5669_v51 }
 0x2ac   :  { %v3897_v44 = vpop.f32.mrf.mxu1  ;;  %v3961_v2 = vpop.f32.mrf.mxu0 }
 0x2ad   :  { %v2552_v37 = vmul.f32 %v5828_v43, %v5830_v6 }
 0x2ae   :  { %v2077_v30 = vpop.f32.mrf.mxu1  ;;  %v2336_v23 = vpop.f32.mrf.mxu0 }
 0x2af   :  { %v2577_v53 = vadd.f32 %v2576_v58, %v2552_v37  ;;  %v5837_v48 = vadd.f32 %v2336_v23, %v2104_v45  ;;  %v2106_v44 = vadd.f32 %v2077_v30, %v5672_v46  ;;  %v2528_v45 = vpop.permute.xlu1 %2527 }
 0x2b0   :  { %v3962_v60 = vpop.f32.mrf.mxu0  ;;  %v3898_v28 = vpop.f32.mrf.mxu1 }
 0x2b1   :  { %v2553_v3 = vmul.f32 %v5835_v20, %v5837_v48 }
 0x2b2   :  { %v2341_v2 = vpop.f32.mrf.mxu0 }
 0x2b3   :  { %v2578_v25 = vadd.f32 %v2577_v53, %v2553_v3  ;;  %v2372_v26 = vadd.f32 %v2341_v2, %v2105_v10 }
 0x2b4   :  { %v3965_v39 = vpop.f32.mrf.mxu0 }
 0x2b5   :  { %v2554_v43 = vmul.f32 %v2523_v21, %v2372_v26 }
 0x2b6   :  { %v2344_v35 = vpop.f32.mrf.mxu0 }
 0x2b7   :  { %v2579_v0 = vadd.f32 %v2578_v25, %v2554_v43  ;;  %v2373_v58 = vadd.f32 %v2344_v35, %v2106_v44 }
 0x2b8   :  { %v3966_v37 = vpop.f32.mrf.mxu0 }
 0x2b9   :  { %v2555_v23 = vmul.f32 %v2528_v45, %v2373_v58 }
 0x2bb   :  { %v2580_v28 = vadd.f32 %v2579_v0, %v2555_v23 }
 0x2bd   :  { %v2581_v60 = vrot.slane %v2580_v28, 4 }
 0x2bf   :  { %v2582_v51 = vadd.f32 %v2581_v60, %v2580_v28 }
 0x2c1   :  { %v2583_v11 = vrot.slane %v2582_v51, 2 }
 0x2c3   :  { %v2584_v9 = vadd.f32 %v2583_v11, %v2582_v51 }
 0x2c5   :  { %v2585_v20 = vrot.slane %v2584_v9, 1 }
 0x2c7   :  { %v2586_v14 = vadd.f32 %v2585_v20, %v2584_v9 }
 0x2c9   :  { %v5843_v53 = vmul.f32 0.0078125, %v2586_v14 }
 0x2cb   :  { %v2603_v10 = vsub.f32 %v5781_v22, %v5843_v53  ;;  %v2604_v46 = vsub.f32 %v5788_v62, %v5843_v53  ;;  %v2605_v35 = vsub.f32 %v5795_v24, %v5843_v53  ;;  %v2606_v0 = vsub.f32 %v5802_v5, %v5843_v53 }
 0x2cc   :  { %v2607_v43 = vsub.f32 %v5809_v8, %v5843_v53  ;;  %v2608_v9 = vsub.f32 %v5816_v59, %v5843_v53  ;;  %v2609_v14 = vsub.f32 %v5823_v42, %v5843_v53  ;;  %v2610_v30 = vsub.f32 %v5830_v6, %v5843_v53 }
 0x2cd   :  { %v2611_v20 = vsub.f32 %v5837_v48, %v5843_v53  ;;  %v2612_v3 = vsub.f32 %v2372_v26, %v5843_v53  ;;  %v2613_v2 = vsub.f32 %v2373_v58, %v5843_v53  ;;  %v2588_v25 = vsub.f32 %v5676_v17, %v5843_v53 }
 0x2ce   :  { %v2589_v39 = vsub.f32 %v5679_v55, %v5843_v53  ;;  %v2590_v44 = vsub.f32 %v5682_v54, %v5843_v53  ;;  %v2591_v58 = vsub.f32 %v5685_v13, %v5843_v53  ;;  %v2592_v17 = vsub.f32 %v5690_v31, %v5843_v53 }
 0x2cf   :  { %v5872_v37 = vmul.f32 %v2588_v25, %v5687_v7  ;;  %v5877_v28 = vmul.f32 %v2612_v3, %v2523_v21  ;;  %v5879_v26 = vmul.f32 %v2613_v2, %v2528_v45  ;;  %v2594_v13 = vsub.f32 %v5702_v34, %v5843_v53 }
 0x2d0   :  { %v5875_v23 = vmul.f32 %v2589_v39, %v5697_v61  ;;  %v5886_v55 = vmul.f32 %v2590_v44, %v5692_v56  ;;  %v2593_v61 = vsub.f32 %v5695_v19, %v5843_v53  ;;  %v5895_v21 = vmul.f32 %v2591_v58, %v5699_v52 }
 0x2d1   :  { %v2640_v54 = vmul.f32 %v5872_v37, %v5872_v37  ;;  %v5900_v31 = vmul.f32 %v2592_v17, %v5704_v47  ;;  %v2595_v60 = vsub.f32 %v5729_v38, %v5843_v53  ;;  %v2596_v34 = vsub.f32 %v5733_v40, %v5843_v53 }
 0x2d2   :  { %v2641_v7 = vmul.f32 %v5875_v23, %v5875_v23  ;;  %v2642_v56 = vmul.f32 %v5886_v55, %v5886_v55  ;;  %v5907_v51 = vmul.f32 %v2593_v61, %v5707_v18  ;;  %v2643_v19 = vmul.f32 %v5895_v21, %v5895_v21 }
 0x2d3   :  { %v5914_v47 = vmul.f32 %v2594_v13, %v5711_v41  ;;  %v2644_v11 = vmul.f32 %v5900_v31, %v5900_v31  ;;  %v2597_v38 = vsub.f32 %v5740_v4, %v5843_v53  ;;  %v5921_v18 = vmul.f32 %v2595_v60, %v5717_v63 }
 0x2d4   :  { %v2666_v45 = vadd.f32 %v2641_v7, %v2640_v54  ;;  %v2645_v2 = vmul.f32 %v5907_v51, %v5907_v51  ;;  %v2598_v40 = vsub.f32 %v5747_v15, %v5843_v53  ;;  %v5928_v41 = vmul.f32 %v2596_v34, %v5723_v33 }
 0x2d5   :  { %v2646_v39 = vmul.f32 %v5914_v47, %v5914_v47  ;;  %v2599_v4 = vsub.f32 %v5752_v29, %v5843_v53  ;;  %v5935_v63 = vmul.f32 %v2597_v38, %v5727_v32  ;;  %v2647_v58 = vmul.f32 %v5921_v18, %v5921_v18 }
 0x2d6   :  { %v2667_v52 = vadd.f32 %v2666_v45, %v2642_v56  ;;  %v2600_v15 = vsub.f32 %v5759_v50, %v5843_v53  ;;  %v5942_v33 = vmul.f32 %v2598_v40, %v5735_v12  ;;  %v2648_v54 = vmul.f32 %v5928_v41, %v5928_v41 }
 0x2d7   :  { %v2601_v29 = vsub.f32 %v5766_v16, %v5843_v53  ;;  %v5949_v32 = vmul.f32 %v2599_v4, %v5742_v36  ;;  %v2649_v61 = vmul.f32 %v5935_v63, %v5935_v63  ;;  %v2602_v50 = vsub.f32 %v5770_v27, %v5843_v53  ;;  %v6332_v4 = vld [vmem:[#allocation6_spill] sm:$0xff] }
 0x2d8   :  { %v2668_v3 = vadd.f32 %v2667_v52, %v2643_v19  ;;  %v5956_v12 = vmul.f32 %v2600_v15, %v5754_v49  ;;  %v2650_v56 = vmul.f32 %v5942_v33, %v5942_v33  ;;  %v6328_v49 = vld [vmem:[#allocation2_spill] sm:$0xff]  ;;  %v6006_v24 = vmul.f32 %v2607_v43, %v6332_v4 }
 0x2d9   :  { %v5961_v60 = vmul.f32 %v2601_v29, %v5761_v1  ;;  %v2651_v36 = vmul.f32 %v5949_v32, %v5949_v32  ;;  %v5966_v19 = vmul.f32 %v2602_v50, %v5772_v57  ;;  %v5974_v34 = vmul.f32 %v2603_v10, %v6328_v49  ;;  %v6335_v29 = vld [vmem:[#allocation9_spill] sm:$0xff] }
 0x2da   :  { %v2669_v25 = vadd.f32 %v2668_v3, %v2644_v11  ;;  %v2652_v27 = vmul.f32 %v5956_v12, %v5956_v12  ;;  %v6329_v3 = vld [vmem:[#allocation3_spill] sm:$0xff]  ;;  %v2659_v43 = vmul.f32 %v6006_v24, %v6006_v24  ;;  %v6030_v59 = vmul.f32 %v2610_v30, %v6335_v29  ;;  %v6095_v29 = vld [vmem:[%s6306_s5 + $0x38] sm:$0xff]  }
 0x2db   :  { %v2653_v1 = vmul.f32 %v5961_v60, %v5961_v60  ;;  %v5982_v57 = vmul.f32 %v2604_v46, %v6329_v3  ;;  %v2654_v38 = vmul.f32 %v5966_v19, %v5966_v19  ;;  %v2655_v10 = vmul.f32 %v5974_v34, %v5974_v34 }
 0x2dc   :  { %v2670_v44 = vadd.f32 %v2669_v25, %v2645_v2  ;;  %v6330_v25 = vld [vmem:[#allocation4_spill] sm:$0xff]  ;;  %v2665_v48 = vmul.f32 %v5879_v26, %v5879_v26 }
 0x2dd   :  { %v5990_v22 = vmul.f32 %v2605_v35, %v6330_v25  ;;  %v2656_v46 = vmul.f32 %v5982_v57, %v5982_v57  ;;  %v2703_v25 = vlaneseq }
 0x2de   :  { %v2671_v17 = vadd.f32 %v2670_v44, %v2646_v39  ;;  %v6331_v39 = vld [vmem:[#allocation5_spill] sm:$0xff] }
 0x2df   :  { %v5998_v62 = vmul.f32 %v2606_v0, %v6331_v39  ;;  %v2657_v35 = vmul.f32 %v5990_v22, %v5990_v22  ;;  %v6058_v39 = vld [vmem:[%s6306_s5 + $0x8] sm:$0xff]  }
 0x2e0   :  { %v2672_v7 = vadd.f32 %v2671_v17, %v2647_v58  ;;  %v6333_v17 = vld [vmem:[#allocation7_spill] sm:$0xff] }
 0x2e1   :  { %v6014_v5 = vmul.f32 %v2608_v9, %v6333_v17  ;;  %v2658_v0 = vmul.f32 %v5998_v62, %v5998_v62  ;;  %v2698_v17 = vld [vmem:[%s6307_s2] sm:$0x1] }
 0x2e2   :  { %v2673_v13 = vadd.f32 %v2672_v7, %v2648_v54  ;;  %v6334_v54 = vld [vmem:[#allocation8_spill] sm:$0xff] }
 0x2e3   :  { %v6022_v8 = vmul.f32 %v2609_v14, %v6334_v54  ;;  %v2660_v9 = vmul.f32 %v6014_v5, %v6014_v5  ;;  %v3108_v54 = vunpack.c.l.bf16 %v6058_v39 }
 0x2e4   :  { %v2674_v45 = vadd.f32 %v2673_v13, %v2649_v61  ;;  %v6336_v13 = vld [vmem:[#allocation10_spill] sm:$0xff] }
 0x2e5   :  { %v6038_v42 = vmul.f32 %v2611_v20, %v6336_v13  ;;  %v2661_v14 = vmul.f32 %v6022_v8, %v6022_v8 }
 0x2e6   :  { %v2675_v16 = vadd.f32 %v2674_v45, %v2650_v56  ;;  %v2662_v56 = vmul.f32 %v6030_v59, %v6030_v59 }
 0x2e7   :  { %v2663_v30 = vmul.f32 %v6038_v42, %v6038_v42 }
 0x2e8   :  { %v2676_v52 = vadd.f32 %v2675_v16, %v2651_v36  ;;  %v2664_v36 = vmul.f32 %v5877_v28, %v5877_v28 }
 0x2ea   :  { %v2677_v11 = vadd.f32 %v2676_v52, %v2652_v27 }
 0x2ec   :  { %v2678_v2 = vadd.f32 %v2677_v11, %v2653_v1 }
 0x2ee   :  { %v2679_v40 = vadd.f32 %v2678_v2, %v2654_v38 }
 0x2f0   :  { %v2680_v44 = vadd.f32 %v2679_v40, %v2655_v10  ;;  %v2704_v10 = vshrl.u32 %v2703_v25, 7  ;;  %v6053_v40 = vld [vmem:[%s6306_s5] sm:$0xff]  }
 0x2f2   :  { %v2681_v58 = vadd.f32 %v2680_v44, %v2656_v46  ;;  %v6063_v46 = vld [vmem:[%s6306_s5 + $0x10] sm:$0xff]   ;;  %v6068_v44 = vld [vmem:[%s6306_s5 + $0x18] sm:$0xff]   ;;  %v2705_v4 = vsub.s32 0, %v2704_v10 }
 0x2f4   :  { %v2682_v15 = vadd.f32 %v2681_v58, %v2657_v35  ;;  %v6073_v35 = vld [vmem:[%s6306_s5 + $0x20] sm:$0xff]   ;;  %v6078_v58 = vld [vmem:[%s6306_s5 + $0x28] sm:$0xff]  }
 0x2f6   :  { %v2683_v7 = vadd.f32 %v2682_v15, %v2658_v0  ;;  %v3104_v0 = vunpack.c.l.bf16 %v6053_v40  ;;  %v3105_v15 = vunpack.c.h.bf16 %v6053_v40  ;;  %v6342_v40 = vunpack.c.l.bf16 %v6073_v35 }
 0x2f8   :  { %v2684_v61 = vadd.f32 %v2683_v7, %v2659_v43  ;;  %v6090_v7 = vld [vmem:[%s6306_s5 + $0x30] sm:$0xff]  }
 0x2fa   :  { %v2685_v50 = vadd.f32 %v2684_v61, %v2660_v9 }
 0x2fc   :  { %v2686_v6 = vadd.f32 %v2685_v50, %v2661_v14  ;;  %v6104_v50 = vld [vmem:[%s6306_s5 + $0x40] sm:$0xff]  }
 0x2fe   :  { %v2687_v45 = vadd.f32 %v2686_v6, %v2662_v56  ;;  %v6109_v56 = vld [vmem:[%s6306_s5 + $0x48] sm:$0xff]  }
 0x300   :  { %v2688_v16 = vadd.f32 %v2687_v45, %v2663_v30 }
 0x302   :  { %v2689_v53 = vadd.f32 %v2688_v16, %v2664_v36 }
 0x304   :  { %v2690_v20 = vadd.f32 %v2689_v53, %v2665_v48  ;;  %v6118_v48 = vld [vmem:[%s6306_s5 + $0x50] sm:$0xff]  }
 0x306   :  { %v2691_v27 = vrot.slane %v2690_v20, 4 }
 0x308   :  { %v2692_v52 = vadd.f32 %v2691_v27, %v2690_v20 }
 0x30a   :  { %v2693_v49 = vrot.slane %v2692_v52, 2 }
 0x30c   :  { %v2694_v1 = vadd.f32 %v2693_v49, %v2692_v52  ;;  %v6126_v49 = vld [vmem:[%s6306_s5 + $0x58] sm:$0xff]  }
 0x30e   :  { %v2695_v11 = vrot.slane %v2694_v1, 1 }
 0x310   :  { %v2696_v3 = vadd.f32 %v2695_v11, %v2694_v1  ;;  %v6131_v1 = vld [vmem:[%s6306_s5 + $0x60] sm:$0xff]  }
 0x312   :  { %v2697_v38 = vmul.f32 0.0078125, %v2696_v3 }
 0x314   :  { %v2699_v2 = vadd.f32 1e-05, %v2697_v38 }
 0x316   :  { %4060 = vrsqrt.f32 %v2699_v2 }
 0x323   :  { %v4061_v6 = vpop.eup %4060 }
 0x324   :  { %v2701_v53 = vmul.f32 %v4061_v6, %v2698_v17 }
 0x326   :  { %v2706_v25 = vrot.slane %v2701_v53, %v2705_v4 }
 0x328   :  { %v2708_v3 = vmul.f32 %v2706_v25, %v5872_v37  ;;  %v2709_v38 = vmul.f32 %v2706_v25, %v5875_v23  ;;  %v2710_v4 = vmul.f32 %v2706_v25, %v5886_v55  ;;  %v2711_v53 = vmul.f32 %v2706_v25, %v5895_v21 }
 0x329   :  { %v2712_v17 = vmul.f32 %v2706_v25, %v5900_v31  ;;  %v2713_v6 = vmul.f32 %v2706_v25, %v5907_v51  ;;  %v2714_v52 = vmul.f32 %v2706_v25, %v5914_v47  ;;  %v2715_v27 = vmul.f32 %v2706_v25, %v5921_v18  ;;  %v3101_v47 = vld [vmem:[%s6308_s3] ss:$0 sm:$0xff] }
 0x32a   :  { %v2716_v20 = vmul.f32 %v2706_v25, %v5928_v41  ;;  %v2717_v11 = vmul.f32 %v2706_v25, %v5935_v63  ;;  %v2718_v37 = vmul.f32 %v2706_v25, %v5942_v33  ;;  %v2719_v23 = vmul.f32 %v2706_v25, %v5949_v32 }
 0x32b   :  { %v2720_v55 = vmul.f32 %v2706_v25, %v5956_v12  ;;  %v2721_v21 = vmul.f32 %v2706_v25, %v5961_v60  ;;  %v2722_v31 = vmul.f32 %v2706_v25, %v5966_v19  ;;  %v2723_v51 = vmul.f32 %v2706_v25, %v5974_v34 }
 0x32c   :  { %v2724_v18 = vmul.f32 %v2706_v25, %v5982_v57  ;;  %v2725_v41 = vmul.f32 %v2706_v25, %v5990_v22  ;;  %v2726_v63 = vmul.f32 %v2706_v25, %v5998_v62  ;;  %v2727_v33 = vmul.f32 %v2706_v25, %v6006_v24 }
 0x32d   :  { %v2728_v32 = vmul.f32 %v2706_v25, %v6014_v5  ;;  %v2729_v12 = vmul.f32 %v2706_v25, %v6022_v8  ;;  %v2730_v60 = vmul.f32 %v2706_v25, %v6030_v59  ;;  %v2731_v19 = vmul.f32 %v2706_v25, %v6038_v42 }
 0x32e   :  { %v2732_v34 = vmul.f32 %v2706_v25, %v5877_v28  ;;  %v2733_v10 = vmul.f32 %v2706_v25, %v5879_v26  ;;  %v2741_v2 = vadd.f32 %v3101_v47, %v2708_v3  ;;  %v2742_v57 = vadd.f32 %v3101_v47, %v2709_v38 }
 0x32f   :  { %v2743_v16 = vadd.f32 %v3101_v47, %v2710_v4  ;;  %v2744_v22 = vadd.f32 %v3101_v47, %v2711_v53  ;;  %v2745_v36 = vadd.f32 %v3101_v47, %v2712_v17  ;;  %v2746_v62 = vadd.f32 %v3101_v47, %v2713_v6 }
 0x330   :  { %v2747_v45 = vadd.f32 %v3101_v47, %v2714_v52  ;;  %v2748_v24 = vadd.f32 %v3101_v47, %v2715_v27  ;;  %v2749_v30 = vadd.f32 %v3101_v47, %v2716_v20  ;;  %v2750_v5 = vadd.f32 %v3101_v47, %v2717_v11 }
 0x331   :  { %v2751_v14 = vadd.f32 %v3101_v47, %v2718_v37  ;;  %v2752_v8 = vadd.f32 %v3101_v47, %v2719_v23  ;;  %v2753_v13 = vadd.f32 %v3101_v47, %v2720_v55  ;;  %v2754_v59 = vadd.f32 %v3101_v47, %v2721_v21 }
 0x332   :  { %v2755_v61 = vadd.f32 %v3101_v47, %v2722_v31  ;;  %v2756_v42 = vadd.f32 %v3101_v47, %v2723_v51  ;;  %v2757_v9 = vadd.f32 %v3101_v47, %v2724_v18  ;;  %v2758_v28 = vadd.f32 %v3101_v47, %v2725_v41 }
 0x333   :  { %v2759_v43 = vadd.f32 %v3101_v47, %v2726_v63  ;;  %v2760_v26 = vadd.f32 %v3101_v47, %v2727_v33  ;;  %v2761_v3 = vadd.f32 %v3101_v47, %v2728_v32  ;;  %v2762_v38 = vadd.f32 %v3101_v47, %v2729_v12 }
 0x334   :  { %v2763_v25 = vadd.f32 %v3101_v47, %v2730_v60  ;;  %v2764_v4 = vadd.f32 %v3101_v47, %v2731_v19  ;;  %v2765_v17 = vadd.f32 %v3101_v47, %v2732_v34  ;;  %v2766_v6 = vadd.f32 %v3101_v47, %v2733_v10 }
 0x335   :  { %v2819_v20 = vadd.f32 %v3104_v0, %v2741_v2  ;;  %v2820_v27 = vadd.f32 %v3105_v15, %v2742_v57  ;;  %v2821_v52 = vadd.f32 %v3108_v54, %v2743_v16  ;;  %v6337_v11 = vunpack.c.h.bf16 %v6058_v39 }
 0x336   :  { %v6338_v37 = vunpack.c.l.bf16 %v6063_v46  ;;  %v6339_v55 = vunpack.c.h.bf16 %v6063_v46  ;;  %v6340_v10 = vunpack.c.l.bf16 %v6068_v44  ;;  %v6341_v0 = vunpack.c.h.bf16 %v6068_v44 }
 0x337   :  { %v2822_v53 = vadd.f32 %v6337_v11, %v2744_v22  ;;  %v2827_v15 = vadd.f32 %v6342_v40, %v2749_v30  ;;  %v6343_v54 = vunpack.c.h.bf16 %v6073_v35  ;;  %v6344_v39 = vunpack.c.l.bf16 %v6078_v58 }
 0x338   :  { %v2823_v23 = vadd.f32 %v6338_v37, %v2745_v36  ;;  %v2824_v21 = vadd.f32 %v6339_v55, %v2746_v62  ;;  %v2825_v31 = vadd.f32 %v6340_v10, %v2747_v45  ;;  %v2826_v2 = vadd.f32 %v6341_v0, %v2748_v24 }
 0x339   :  { %v2828_v16 = vadd.f32 %v6343_v54, %v2750_v5  ;;  %v2829_v51 = vadd.f32 %v6344_v39, %v2751_v14  ;;  %v6345_v36 = vunpack.c.h.bf16 %v6078_v58  ;;  %v6346_v46 = vunpack.c.l.bf16 %v6090_v7 }
 0x33a   :  { %v6347_v45 = vunpack.c.h.bf16 %v6090_v7  ;;  %v6348_v44 = vunpack.c.l.bf16 %v6095_v29  ;;  %v6349_v30 = vunpack.c.h.bf16 %v6095_v29  ;;  %v6350_v35 = vunpack.c.l.bf16 %v6104_v50 }
 0x33b   :  { %v2830_v47 = vadd.f32 %v6345_v36, %v2752_v8  ;;  %v2831_v18 = vadd.f32 %v6346_v46, %v2753_v13  ;;  %v6351_v14 = vunpack.c.h.bf16 %v6104_v50  ;;  %v6352_v58 = vunpack.c.l.bf16 %v6109_v56 }
 0x33c   :  { %v2832_v41 = vadd.f32 %v6347_v45, %v2754_v59  ;;  %v2833_v63 = vadd.f32 %v6348_v44, %v2755_v61  ;;  %v2834_v33 = vadd.f32 %v6349_v30, %v2756_v42  ;;  %v2835_v32 = vadd.f32 %v6350_v35, %v2757_v9 }
 0x33d   :  { %v2836_v12 = vadd.f32 %v6351_v14, %v2758_v28  ;;  %v2837_v60 = vadd.f32 %v6352_v58, %v2759_v43  ;;  %v6353_v13 = vunpack.c.h.bf16 %v6109_v56  ;;  %v6354_v7 = vunpack.c.l.bf16 %v6118_v48 }
 0x33e   :  { %v6355_v61 = vunpack.c.h.bf16 %v6118_v48  ;;  %v6356_v29 = vunpack.c.l.bf16 %v6126_v49  ;;  %v6357_v9 = vunpack.c.h.bf16 %v6126_v49  ;;  %v6358_v50 = vunpack.c.l.bf16 %v6131_v1 }
 0x33f   :  { %v2838_v19 = vadd.f32 %v6353_v13, %v2760_v26  ;;  %v2839_v34 = vadd.f32 %v6354_v7, %v2761_v3  ;;  %v6359_v43 = vunpack.c.h.bf16 %v6131_v1  ;;  %v2845_v56 = vmax.f32 %v2819_v20, 0.0 }
 0x340   :  { %v2840_v57 = vadd.f32 %v6355_v61, %v2762_v38  ;;  %v2841_v22 = vadd.f32 %v6356_v29, %v2763_v25  ;;  %v2842_v62 = vadd.f32 %v6357_v9, %v2764_v4  ;;  %v2843_v24 = vadd.f32 %v6358_v50, %v2765_v17 }
 0x341   :  { %v2844_v5 = vadd.f32 %v6359_v43, %v2766_v6  ;;  %v2846_v8 = vmax.f32 %v2820_v27, 0.0  ;;  %v2847_v59 = vmax.f32 %v2821_v52, 0.0  ;;  %v2848_v42 = vmax.f32 %v2822_v53, 0.0  ;;  %2871 = vst [vmem:[%s6309_s6] sm:$0xff] %v2845_v56 }
 0x342   :  { %v2849_v28 = vmax.f32 %v2823_v23, 0.0  ;;  %v2850_v26 = vmax.f32 %v2824_v21, 0.0  ;;  %v2851_v48 = vmax.f32 %v2825_v31, 0.0  ;;  %v2852_v3 = vmax.f32 %v2826_v2, 0.0 }
 0x343   :  { %v2853_v38 = vmax.f32 %v2827_v15, 0.0  ;;  %v2854_v11 = vmax.f32 %v2828_v16, 0.0  ;;  %2872 = vst [vmem:[%s6309_s6 + $0x8] sm:$0xff] %v2846_v8  ;;  %v2855_v49 = vmax.f32 %v2829_v51, 0.0  ;;  %v2856_v1 = vmax.f32 %v2830_v47, 0.0  ;;  %2873 = vst [vmem:[%s6309_s6 + $0x10] sm:$0xff] %v2847_v59 }
 0x344   :  { %v2857_v25 = vmax.f32 %v2831_v18, 0.0  ;;  %v2858_v4 = vmax.f32 %v2832_v41, 0.0  ;;  %2874 = vst [vmem:[%s6309_s6 + $0x18] sm:$0xff] %v2848_v42  ;;  %2875 = vst [vmem:[%s6309_s6 + $0x20] sm:$0xff] %v2849_v28  ;;  %v2859_v17 = vmax.f32 %v2833_v63, 0.0  ;;  %v2860_v6 = vmax.f32 %v2834_v33, 0.0 }
 0x345   :  { %2876 = vst [vmem:[%s6309_s6 + $0x28] sm:$0xff] %v2850_v26  ;;  %v2861_v20 = vmax.f32 %v2835_v32, 0.0  ;;  %v2862_v27 = vmax.f32 %v2836_v12, 0.0  ;;  %2877 = vst [vmem:[%s6309_s6 + $0x30] sm:$0xff] %v2851_v48  ;;  %v2863_v52 = vmax.f32 %v2837_v60, 0.0  ;;  %v2864_v53 = vmax.f32 %v2838_v19, 0.0 }
 0x346   :  { %2878 = vst [vmem:[%s6309_s6 + $0x38] sm:$0xff] %v2852_v3  ;;  %2879 = vst [vmem:[%s6309_s6 + $0x40] sm:$0xff] %v2853_v38  ;;  %v2865_v37 = vmax.f32 %v2839_v34, 0.0  ;;  %v2866_v23 = vmax.f32 %v2840_v57, 0.0  ;;  %v2867_v55 = vmax.f32 %v2841_v22, 0.0  ;;  %v2868_v21 = vmax.f32 %v2842_v62, 0.0 }
 0x347   :  { %2880 = vst [vmem:[%s6309_s6 + $0x48] sm:$0xff] %v2854_v11  ;;  %2881 = vst [vmem:[%s6309_s6 + $0x50] sm:$0xff] %v2855_v49  ;;  %v2869_v10 = vmax.f32 %v2843_v24, 0.0  ;;  %v2870_v31 = vmax.f32 %v2844_v5, 0.0 }
 0x348   :  { %2882 = vst [vmem:[%s6309_s6 + $0x58] sm:$0xff] %v2856_v1  ;;  %2883 = vst [vmem:[%s6309_s6 + $0x60] sm:$0xff] %v2857_v25 }
 0x349   :  { %2884 = vst [vmem:[%s6309_s6 + $0x68] sm:$0xff] %v2858_v4  ;;  %2885 = vst [vmem:[%s6309_s6 + $0x70] sm:$0xff] %v2859_v17 }
 0x34a   :  { %2886 = vst [vmem:[%s6309_s6 + $0x78] sm:$0xff] %v2860_v6  ;;  %2887 = vst [vmem:[%s6309_s6 + $0x80] sm:$0xff] %v2861_v20 }
 0x34b   :  { %2888 = vst [vmem:[%s6309_s6 + $0x88] sm:$0xff] %v2862_v27  ;;  %2889 = vst [vmem:[%s6309_s6 + $0x90] sm:$0xff] %v2863_v52 }
 0x34c   :  { %2890 = vst [vmem:[%s6309_s6 + $0x98] sm:$0xff] %v2864_v53  ;;  %2891 = vst [vmem:[%s6309_s6 + $0xa0] sm:$0xff] %v2865_v37 }
 0x34d   :  { %2892 = vst [vmem:[%s6309_s6 + $0xa8] sm:$0xff] %v2866_v23  ;;  %2893 = vst [vmem:[%s6309_s6 + $0xb0] sm:$0xff] %v2867_v55 }
 0x34e   :  { %2894 = vst [vmem:[%s6309_s6 + $0xb8] sm:$0xff] %v2868_v21  ;;  %2895 = vst [vmem:[%s6309_s6 + $0xc0] sm:$0xff] %v2869_v10 }
 0x34f   :  { %2896 = vst [vmem:[%s6309_s6 + $0xc8] sm:$0xff] %v2870_v31 }

</bundles_post_ra>
